<compile_context>
chip_gen: v7x
topology: tpu7x:2x2x1
jax: 0.10.0
libtpu: 0.0.40
codegen_flags: <defaults>
</compile_context>

<pallas_src>
import numpy as np
import jax
import jax.numpy as jnp
from jax import lax
from jax.experimental import pallas as pl
from jax.experimental.pallas import tpu as pltpu

N_COARSE = 64


def _round_up(x, m):
    return ((x + m - 1) // m) * m


# ------------------------------ fused kernel -------------------------------

def _fused_render_kernel(rays_ref, lat_ref, z_ref, delta_ref, w1_ref, b1_ref,
                         w2b_ref, w_ref, stats_ref):
    T, K = z_ref.shape            # rays-per-tile, samples-per-ray
    F, H = w1_ref.shape           # MLP in-features (3+3+L), hidden width
    L = lat_ref.shape[1]

    rays = rays_ref[...]          # (T, 8)  [ox oy oz dx dy dz near far]
    lat = lat_ref[...]            # (T, L)
    z = z_ref[...]                # (T, K)
    w1 = w1_ref[...]              # (F, H)

    o0, o1, o2 = rays[:, 0:1], rays[:, 1:2], rays[:, 2:3]
    d0, d1, d2 = rays[:, 3:4], rays[:, 4:5], rays[:, 5:6]

    # Collapsed first layer: pre-act(r,k,j) = z[r,k]*slope[r,j] + inter[r,j]
    slope = d0 * w1[0:1, :] + d1 * w1[1:2, :] + d2 * w1[2:3, :]          # (T,H)
    inter = (b1_ref[...]
             + o0 * w1[0:1, :] + o1 * w1[1:2, :] + o2 * w1[2:3, :]
             + d0 * w1[3:4, :] + d1 * w1[4:5, :] + d2 * w1[5:6, :])      # (T,H)
    for li in range(L):
        inter = inter + lat[:, li:li + 1] * w1[6 + li:7 + li, :]

    # Second layer (H -> 4) as VPU FMAs on (T, K) tiles; W2|b2 scalars in SMEM.
    acc_r = jnp.zeros_like(z)
    acc_g = jnp.zeros_like(z)
    acc_b = jnp.zeros_like(z)
    acc_s = jnp.zeros_like(z)
    for j in range(H):
        a = jnp.maximum(z * slope[:, j:j + 1] + inter[:, j:j + 1], 0.0)  # ReLU
        acc_r = acc_r + a * w2b_ref[4 * j + 0]
        acc_g = acc_g + a * w2b_ref[4 * j + 1]
        acc_b = acc_b + a * w2b_ref[4 * j + 2]
        acc_s = acc_s + a * w2b_ref[4 * j + 3]
    cr = acc_r + w2b_ref[4 * H + 0]
    cg = acc_g + w2b_ref[4 * H + 1]
    cb = acc_b + w2b_ref[4 * H + 2]
    sig = jnp.maximum(acc_s + w2b_ref[4 * H + 3], 0.0)                   # relu(sigma)

    # ---- volume rendering on the in-VMEM (T, K) tiles ----
    alphas = 1.0 - jnp.exp(-delta_ref[...] * sig)
    log_1m = jnp.log(1.0 - alphas + 1e-10)
    # strict upper-triangular ones generated in-kernel (no (K,K) DMA per step):
    rowi = lax.broadcasted_iota(jnp.int32, (K, K), 0)
    coli = lax.broadcasted_iota(jnp.int32, (K, K), 1)
    tri = jnp.where(rowi < coli, 1.0, 0.0).astype(jnp.float32)
    # exclusive cumprod: T_k = exp(sum_{i<k} log(1-alpha_i))  (MXU matmul)
    log_T = jnp.dot(log_1m, tri, preferred_element_type=jnp.float32)
    w = alphas * jnp.exp(log_T)

    w_ref[...] = w
    # packed per-ray stats: [r, g, b, depth, sum(w), 0, 0, 0] -> one DMA stream
    stats_ref[:, 0:1] = jnp.sum(w * cr, axis=-1, keepdims=True)
    stats_ref[:, 1:2] = jnp.sum(w * cg, axis=-1, keepdims=True)
    stats_ref[:, 2:3] = jnp.sum(w * cb, axis=-1, keepdims=True)
    stats_ref[:, 3:4] = jnp.sum(w * z, axis=-1, keepdims=True)
    stats_ref[:, 4:5] = jnp.sum(w, axis=-1, keepdims=True)
    stats_ref[:, 5:8] = jnp.zeros((T, 3), jnp.float32)


def fused_nerf_render(rays_flat, lat_per_ray, z, deltas, w1, b1, w2b, *,
                      tile_r=512):
    NB, K = z.shape
    F, H = w1.shape
    L = lat_per_ray.shape[1]

    T = min(tile_r, _round_up(NB, 8))     # rays per grid step (sublane aligned)
    NBp = _round_up(NB, T)
    pad = NBp - NB
    if pad:
        rays_flat = jnp.pad(rays_flat, ((0, pad), (0, 0)))
        lat_per_ray = jnp.pad(lat_per_ray, ((0, pad), (0, 0)))
        z = jnp.pad(z, ((0, pad), (0, 0)))
        deltas = jnp.pad(deltas, ((0, pad), (0, 0)))

    row_k = pl.BlockSpec((T, K), lambda i: (i, 0))
    weights_p, stats_p = pl.pallas_call(
        _fused_render_kernel,
        out_shape=(jax.ShapeDtypeStruct((NBp, K), jnp.float32),
                   jax.ShapeDtypeStruct((NBp, 8), jnp.float32)),
        grid=(NBp // T,),
        in_specs=[
            pl.BlockSpec((T, 8), lambda i: (i, 0)),        # rays
            pl.BlockSpec((T, L), lambda i: (i, 0)),        # per-ray latent
            row_k,                                         # z samples
            row_k,                                         # deltas
            pl.BlockSpec((F, H), lambda i: (0, 0)),        # W1 (VMEM resident)
            pl.BlockSpec((1, H), lambda i: (0, 0)),        # b1 (VMEM resident)
            pl.BlockSpec(memory_space=pltpu.MemorySpace.SMEM),  # W2|b2 scalars
        ],
        out_specs=(row_k, pl.BlockSpec((T, 8), lambda i: (i, 0))),
        compiler_params=pltpu.CompilerParams(
            dimension_semantics=("parallel",),
            vmem_limit_bytes=32 * 1024 * 1024),
    )(rays_flat, lat_per_ray, z, deltas, w1, b1, w2b)
    return weights_p[:NB], stats_p[:NB]


# ------------------------- NeRFRenderer.forward ----------------------------

def nerf_renderer_forward(rays, latent, params, noise_key, *,
                          n_coarse=N_COARSE, white_bkgd=False, tile_r=512):
    """JAX/Pallas equivalent of NeRFRenderer.forward (eval mode, noise_std=0)."""
    N, B, _ = rays.shape
    rays_flat = rays.reshape(-1, 8)                     # (NB, 8)
    NB = N * B
    K = n_coarse

    # --- sample_from_ray: stratified sampling (randomness via jax.random) ---
    near, far = rays_flat[:, -2:-1], rays_flat[:, -1:]
    step = 1.0 / K
    z_steps = jnp.linspace(0.0, 1.0 - step, K, dtype=jnp.float32)[None, :]
    z_steps = z_steps + jax.random.uniform(noise_key, (NB, K), jnp.float32) * step
    z = near * (1.0 - z_steps) + far * z_steps          # (NB, K)
    deltas = jnp.concatenate(
        [z[:, 1:] - z[:, :-1], jnp.zeros((NB, 1), z.dtype)], axis=-1)

    # torch's view/permute/reshape pairs ray r with latent[r % B]
    lat_per_ray = jnp.tile(latent, (N, 1))              # (NB, L)  (per-ray, not per-sample)
    w2b = jnp.concatenate([params["w2"].reshape(-1), params["b2"].reshape(-1)])

    # TODO(synk): training-time gaussian sigma noise (noise_std > 0) omitted (eval semantics).
    weights, stats = fused_nerf_render(rays_flat, lat_per_ray, z, deltas,
                                       params["w1"], params["b1"], w2b,
                                       tile_r=tile_r)
    rgb = stats[:, 0:3]
    depth = stats[:, 3]
    if white_bkgd:
        rgb = rgb + 1.0 - stats[:, 4:5]                 # reuses in-kernel sum(w)

    intersect = z[:, 0] != -1.0                          # matches torch spec
    return {
        "rgb": rgb.reshape(N, B, 3),
        "depth": depth.reshape(N, B),
        "weights": weights.reshape(N, B, K),
        "intersect": intersect.reshape(N, B),
    }


# -------------------------- pure-JAX reference -----------------------------

def _ref_forward(rays, latent, params, noise_key, *, n_coarse=N_COARSE,
                 white_bkgd=False):
    N, B, _ = rays.shape
    rays_flat = rays.reshape(-1, 8)
    NB = N * B
    K = n_coarse
    near, far = rays_flat[:, -2:-1], rays_flat[:, -1:]
    step = 1.0 / K
    z_steps = jnp.linspace(0.0, 1.0 - step, K, dtype=jnp.float32)[None, :]
    z_steps = z_steps + jax.random.uniform(noise_key, (NB, K), jnp.float32) * step
    z = near * (1.0 - z_steps) + far * z_steps

    origins = rays_flat[:, None, :3]
    dirs = rays_flat[:, None, 3:6]
    points = origins + z[:, :, None] * dirs
    viewdirs = jnp.broadcast_to(dirs, (NB, K, 3))
    L = latent.shape[-1]
    lat_per_point = jnp.broadcast_to(jnp.tile(latent, (N, 1))[:, None, :], (NB, K, L))
    x = jnp.concatenate([points, viewdirs, lat_per_point], axis=-1).reshape(NB * K, -1)

    hp = jax.lax.Precision.HIGHEST
    h = jnp.maximum(jnp.dot(x, params["w1"], precision=hp) + params["b1"], 0.0)
    out = (jnp.dot(h, params["w2"], precision=hp) + params["b2"]).reshape(NB, K, 4)
    rgbs, sigmas = out[..., :3], out[..., 3]

    deltas = jnp.concatenate([z[:, 1:] - z[:, :-1], jnp.zeros((NB, 1), z.dtype)], -1)
    alphas = 1.0 - jnp.exp(-deltas * jax.nn.relu(sigmas))
    alphas_shifted = jnp.concatenate(
        [jnp.ones_like(alphas[:, :1]), 1.0 - alphas + 1e-10], -1)
    T = jnp.cumprod(alphas_shifted, -1)
    weights = alphas * T[:, :-1]
    rgb = jnp.sum(weights[..., None] * rgbs, -2)
    depth = jnp.sum(weights * z, -1)
    if white_bkgd:
        rgb = rgb + 1.0 - jnp.sum(weights, axis=1, keepdims=True)
    return {
        "rgb": rgb.reshape(N, B, 3),
        "depth": depth.reshape(N, B),
        "weights": weights.reshape(N, B, K),
        "intersect": (z[:, 0] != -1.0).reshape(N, B),
    }


if __name__ == "__main__":
    key = jax.random.PRNGKey(0)
    N, B, L, H = 2, 4, 8, 32          # rays-per-object rows, #latents, latent dim, MLP hidden
    K = N_COARSE
    k_o, k_d, k_lat, k_w1, k_w2, k_noise = jax.random.split(key, 6)

    origins = jax.random.normal(k_o, (N, B, 3), jnp.float32)
    dirs = jax.random.normal(k_d, (N, B, 3), jnp.float32)
    dirs = dirs / jnp.linalg.norm(dirs, axis=-1, keepdims=True)
    near = jnp.full((N, B, 1), 2.0, jnp.float32)
    far = jnp.full((N, B, 1), 6.0, jnp.float32)
    rays = jnp.concatenate([origins, dirs, near, far], axis=-1)   # (N, B, 8)
    latent = jax.random.normal(k_lat, (B, L), jnp.float32)

    F = 3 + 3 + L
    params = {
        "w1": 0.2 * jax.random.normal(k_w1, (F, H), jnp.float32),
        "b1": jnp.zeros((1, H), jnp.float32),
        "w2": 0.2 * jax.random.normal(k_w2, (H, 4), jnp.float32),
        "b2": jnp.zeros((1, 4), jnp.float32),
    }

    out = nerf_renderer_forward(rays, latent, params, k_noise)
    out = jax.block_until_ready(out)
    ref = _ref_forward(rays, latent, params, k_noise)

    assert out["rgb"].shape == (N, B, 3)
    assert out["depth"].shape == (N, B)
    assert out["weights"].shape == (N, B, K)
    assert out["intersect"].shape == (N, B)
    for name in ("rgb", "depth", "weights"):
        np.testing.assert_allclose(np.asarray(out[name]), np.asarray(ref[name]),
                                   rtol=2e-2, atol=2e-2)
    np.testing.assert_array_equal(np.asarray(out["intersect"]),
                                  np.asarray(ref["intersect"]))
    print("KERNEL_OK")
</pallas_src>

<mosaic_0001>
module attributes {stable_mosaic.version = 11 : i64} {
  func.func @_fused_render_kernel(%arg0: i32, %arg1: memref<8x8xf32, #tpu.memory_space<vmem>>, %arg2: memref<8x8xf32, #tpu.memory_space<vmem>>, %arg3: memref<8x64xf32, #tpu.memory_space<vmem>>, %arg4: memref<8x64xf32, #tpu.memory_space<vmem>>, %arg5: memref<14x32xf32, #tpu.memory_space<vmem>>, %arg6: memref<1x32xf32, #tpu.memory_space<vmem>>, %arg7: memref<132xf32, #tpu.memory_space<smem>>, %arg8: memref<8x64xf32, #tpu.memory_space<vmem>>, %arg9: memref<8x8xf32, #tpu.memory_space<vmem>>) attributes {dimension_semantics = [#tpu.dimension_semantics<parallel>], iteration_bounds = array<i64: 1>, scalar_prefetch = 0 : i64, scratch_operands = 0 : i64, tpu.core_type = #tpu.core_type<tc>, window_params = [{transform_indices = @transform_0, window_bounds = array<i64: 8, 8>}, {transform_indices = @transform_1, window_bounds = array<i64: 8, 8>}, {transform_indices = @transform_2, window_bounds = array<i64: 8, 64>}, {transform_indices = @transform_3, window_bounds = array<i64: 8, 64>}, {pipeline_mode = #tpu.pipeline_mode<synchronous>, transform_indices = @transform_4, window_bounds = array<i64: 14, 32>}, {pipeline_mode = #tpu.pipeline_mode<synchronous>, transform_indices = @transform_5, window_bounds = array<i64: 1, 32>}, {transform_indices = @transform_6, window_bounds = array<i64: 132>}, {transform_indices = @transform_7, window_bounds = array<i64: 8, 64>}, {transform_indices = @transform_8, window_bounds = array<i64: 8, 8>}]} {
    %c0 = arith.constant 0 : index
    %c0_0 = arith.constant 0 : index
    %0 = vector.load %arg1[%c0, %c0_0] : memref<8x8xf32, #tpu.memory_space<vmem>>, vector<8x8xf32>
    %c0_1 = arith.constant 0 : index
    %c0_2 = arith.constant 0 : index
    %1 = vector.load %arg2[%c0_1, %c0_2] : memref<8x8xf32, #tpu.memory_space<vmem>>, vector<8x8xf32>
    %c0_3 = arith.constant 0 : index
    %c0_4 = arith.constant 0 : index
    %2 = vector.load %arg3[%c0_3, %c0_4] : memref<8x64xf32, #tpu.memory_space<vmem>>, vector<8x64xf32>
    %c0_5 = arith.constant 0 : index
    %c0_6 = arith.constant 0 : index
    %3 = vector.load %arg5[%c0_5, %c0_6] : memref<14x32xf32, #tpu.memory_space<vmem>>, vector<14x32xf32>
    %4 = vector.extract_strided_slice %0 {offsets = [0, 0], sizes = [8, 1], strides = [1, 1]} : vector<8x8xf32> to vector<8x1xf32>
    %5 = vector.extract_strided_slice %0 {offsets = [0, 1], sizes = [8, 1], strides = [1, 1]} : vector<8x8xf32> to vector<8x1xf32>
    %6 = vector.extract_strided_slice %0 {offsets = [0, 2], sizes = [8, 1], strides = [1, 1]} : vector<8x8xf32> to vector<8x1xf32>
    %7 = vector.extract_strided_slice %0 {offsets = [0, 3], sizes = [8, 1], strides = [1, 1]} : vector<8x8xf32> to vector<8x1xf32>
    %8 = vector.extract_strided_slice %0 {offsets = [0, 4], sizes = [8, 1], strides = [1, 1]} : vector<8x8xf32> to vector<8x1xf32>
    %9 = vector.extract_strided_slice %0 {offsets = [0, 5], sizes = [8, 1], strides = [1, 1]} : vector<8x8xf32> to vector<8x1xf32>
    %10 = vector.extract_strided_slice %3 {offsets = [0, 0], sizes = [1, 32], strides = [1, 1]} : vector<14x32xf32> to vector<1x32xf32>
    %11 = vector.broadcast %7 : vector<8x1xf32> to vector<8x32xf32>
    %12 = vector.broadcast %10 : vector<1x32xf32> to vector<8x32xf32>
    %13 = arith.mulf %11, %12 : vector<8x32xf32>
    %14 = vector.extract_strided_slice %3 {offsets = [1, 0], sizes = [1, 32], strides = [1, 1]} : vector<14x32xf32> to vector<1x32xf32>
    %15 = vector.broadcast %8 : vector<8x1xf32> to vector<8x32xf32>
    %16 = vector.broadcast %14 : vector<1x32xf32> to vector<8x32xf32>
    %17 = arith.mulf %15, %16 : vector<8x32xf32>
    %18 = arith.addf %13, %17 : vector<8x32xf32>
    %19 = vector.extract_strided_slice %3 {offsets = [2, 0], sizes = [1, 32], strides = [1, 1]} : vector<14x32xf32> to vector<1x32xf32>
    %20 = vector.broadcast %9 : vector<8x1xf32> to vector<8x32xf32>
    %21 = vector.broadcast %19 : vector<1x32xf32> to vector<8x32xf32>
    %22 = arith.mulf %20, %21 : vector<8x32xf32>
    %23 = arith.addf %18, %22 : vector<8x32xf32>
    %c0_7 = arith.constant 0 : index
    %c0_8 = arith.constant 0 : index
    %24 = vector.load %arg6[%c0_7, %c0_8] : memref<1x32xf32, #tpu.memory_space<vmem>>, vector<1x32xf32>
    %25 = vector.extract_strided_slice %3 {offsets = [0, 0], sizes = [1, 32], strides = [1, 1]} : vector<14x32xf32> to vector<1x32xf32>
    %26 = vector.broadcast %4 : vector<8x1xf32> to vector<8x32xf32>
    %27 = vector.broadcast %25 : vector<1x32xf32> to vector<8x32xf32>
    %28 = arith.mulf %26, %27 : vector<8x32xf32>
    %29 = vector.broadcast %24 : vector<1x32xf32> to vector<8x32xf32>
    %30 = arith.addf %29, %28 : vector<8x32xf32>
    %31 = vector.extract_strided_slice %3 {offsets = [1, 0], sizes = [1, 32], strides = [1, 1]} : vector<14x32xf32> to vector<1x32xf32>
    %32 = vector.broadcast %5 : vector<8x1xf32> to vector<8x32xf32>
    %33 = vector.broadcast %31 : vector<1x32xf32> to vector<8x32xf32>
    %34 = arith.mulf %32, %33 : vector<8x32xf32>
    %35 = arith.addf %30, %34 : vector<8x32xf32>
    %36 = vector.extract_strided_slice %3 {offsets = [2, 0], sizes = [1, 32], strides = [1, 1]} : vector<14x32xf32> to vector<1x32xf32>
    %37 = vector.broadcast %6 : vector<8x1xf32> to vector<8x32xf32>
    %38 = vector.broadcast %36 : vector<1x32xf32> to vector<8x32xf32>
    %39 = arith.mulf %37, %38 : vector<8x32xf32>
    %40 = arith.addf %35, %39 : vector<8x32xf32>
    %41 = vector.extract_strided_slice %3 {offsets = [3, 0], sizes = [1, 32], strides = [1, 1]} : vector<14x32xf32> to vector<1x32xf32>
    %42 = vector.broadcast %7 : vector<8x1xf32> to vector<8x32xf32>
    %43 = vector.broadcast %41 : vector<1x32xf32> to vector<8x32xf32>
    %44 = arith.mulf %42, %43 : vector<8x32xf32>
    %45 = arith.addf %40, %44 : vector<8x32xf32>
    %46 = vector.extract_strided_slice %3 {offsets = [4, 0], sizes = [1, 32], strides = [1, 1]} : vector<14x32xf32> to vector<1x32xf32>
    %47 = vector.broadcast %8 : vector<8x1xf32> to vector<8x32xf32>
    %48 = vector.broadcast %46 : vector<1x32xf32> to vector<8x32xf32>
    %49 = arith.mulf %47, %48 : vector<8x32xf32>
    %50 = arith.addf %45, %49 : vector<8x32xf32>
    %51 = vector.extract_strided_slice %3 {offsets = [5, 0], sizes = [1, 32], strides = [1, 1]} : vector<14x32xf32> to vector<1x32xf32>
    %52 = vector.broadcast %9 : vector<8x1xf32> to vector<8x32xf32>
    %53 = vector.broadcast %51 : vector<1x32xf32> to vector<8x32xf32>
    %54 = arith.mulf %52, %53 : vector<8x32xf32>
    %55 = arith.addf %50, %54 : vector<8x32xf32>
    %56 = vector.extract_strided_slice %1 {offsets = [0, 0], sizes = [8, 1], strides = [1, 1]} : vector<8x8xf32> to vector<8x1xf32>
    %57 = vector.extract_strided_slice %3 {offsets = [6, 0], sizes = [1, 32], strides = [1, 1]} : vector<14x32xf32> to vector<1x32xf32>
    %58 = vector.broadcast %56 : vector<8x1xf32> to vector<8x32xf32>
    %59 = vector.broadcast %57 : vector<1x32xf32> to vector<8x32xf32>
    %60 = arith.mulf %58, %59 : vector<8x32xf32>
    %61 = arith.addf %55, %60 : vector<8x32xf32>
    %62 = vector.extract_strided_slice %1 {offsets = [0, 1], sizes = [8, 1], strides = [1, 1]} : vector<8x8xf32> to vector<8x1xf32>
    %63 = vector.extract_strided_slice %3 {offsets = [7, 0], sizes = [1, 32], strides = [1, 1]} : vector<14x32xf32> to vector<1x32xf32>
    %64 = vector.broadcast %62 : vector<8x1xf32> to vector<8x32xf32>
    %65 = vector.broadcast %63 : vector<1x32xf32> to vector<8x32xf32>
    %66 = arith.mulf %64, %65 : vector<8x32xf32>
    %67 = arith.addf %61, %66 : vector<8x32xf32>
    %68 = vector.extract_strided_slice %1 {offsets = [0, 2], sizes = [8, 1], strides = [1, 1]} : vector<8x8xf32> to vector<8x1xf32>
    %69 = vector.extract_strided_slice %3 {offsets = [8, 0], sizes = [1, 32], strides = [1, 1]} : vector<14x32xf32> to vector<1x32xf32>
    %70 = vector.broadcast %68 : vector<8x1xf32> to vector<8x32xf32>
    %71 = vector.broadcast %69 : vector<1x32xf32> to vector<8x32xf32>
    %72 = arith.mulf %70, %71 : vector<8x32xf32>
    %73 = arith.addf %67, %72 : vector<8x32xf32>
    %74 = vector.extract_strided_slice %1 {offsets = [0, 3], sizes = [8, 1], strides = [1, 1]} : vector<8x8xf32> to vector<8x1xf32>
    %75 = vector.extract_strided_slice %3 {offsets = [9, 0], sizes = [1, 32], strides = [1, 1]} : vector<14x32xf32> to vector<1x32xf32>
    %76 = vector.broadcast %74 : vector<8x1xf32> to vector<8x32xf32>
    %77 = vector.broadcast %75 : vector<1x32xf32> to vector<8x32xf32>
    %78 = arith.mulf %76, %77 : vector<8x32xf32>
    %79 = arith.addf %73, %78 : vector<8x32xf32>
    %80 = vector.extract_strided_slice %1 {offsets = [0, 4], sizes = [8, 1], strides = [1, 1]} : vector<8x8xf32> to vector<8x1xf32>
    %81 = vector.extract_strided_slice %3 {offsets = [10, 0], sizes = [1, 32], strides = [1, 1]} : vector<14x32xf32> to vector<1x32xf32>
    %82 = vector.broadcast %80 : vector<8x1xf32> to vector<8x32xf32>
    %83 = vector.broadcast %81 : vector<1x32xf32> to vector<8x32xf32>
    %84 = arith.mulf %82, %83 : vector<8x32xf32>
    %85 = arith.addf %79, %84 : vector<8x32xf32>
    %86 = vector.extract_strided_slice %1 {offsets = [0, 5], sizes = [8, 1], strides = [1, 1]} : vector<8x8xf32> to vector<8x1xf32>
    %87 = vector.extract_strided_slice %3 {offsets = [11, 0], sizes = [1, 32], strides = [1, 1]} : vector<14x32xf32> to vector<1x32xf32>
    %88 = vector.broadcast %86 : vector<8x1xf32> to vector<8x32xf32>
    %89 = vector.broadcast %87 : vector<1x32xf32> to vector<8x32xf32>
    %90 = arith.mulf %88, %89 : vector<8x32xf32>
    %91 = arith.addf %85, %90 : vector<8x32xf32>
    %92 = vector.extract_strided_slice %1 {offsets = [0, 6], sizes = [8, 1], strides = [1, 1]} : vector<8x8xf32> to vector<8x1xf32>
    %93 = vector.extract_strided_slice %3 {offsets = [12, 0], sizes = [1, 32], strides = [1, 1]} : vector<14x32xf32> to vector<1x32xf32>
    %94 = vector.broadcast %92 : vector<8x1xf32> to vector<8x32xf32>
    %95 = vector.broadcast %93 : vector<1x32xf32> to vector<8x32xf32>
    %96 = arith.mulf %94, %95 : vector<8x32xf32>
    %97 = arith.addf %91, %96 : vector<8x32xf32>
    %98 = vector.extract_strided_slice %1 {offsets = [0, 7], sizes = [8, 1], strides = [1, 1]} : vector<8x8xf32> to vector<8x1xf32>
    %99 = vector.extract_strided_slice %3 {offsets = [13, 0], sizes = [1, 32], strides = [1, 1]} : vector<14x32xf32> to vector<1x32xf32>
    %100 = vector.broadcast %98 : vector<8x1xf32> to vector<8x32xf32>
    %101 = vector.broadcast %99 : vector<1x32xf32> to vector<8x32xf32>
    %102 = arith.mulf %100, %101 : vector<8x32xf32>
    %103 = arith.addf %97, %102 : vector<8x32xf32>
    %cst = arith.constant 0.000000e+00 : f32
    %104 = vector.broadcast %cst : f32 to vector<8x64xf32>
    %cst_9 = arith.constant 0.000000e+00 : f32
    %105 = vector.broadcast %cst_9 : f32 to vector<8x64xf32>
    %cst_10 = arith.constant 0.000000e+00 : f32
    %106 = vector.broadcast %cst_10 : f32 to vector<8x64xf32>
    %cst_11 = arith.constant 0.000000e+00 : f32
    %107 = vector.broadcast %cst_11 : f32 to vector<8x64xf32>
    %108 = vector.extract_strided_slice %23 {offsets = [0, 0], sizes = [8, 1], strides = [1, 1]} : vector<8x32xf32> to vector<8x1xf32>
    %109 = vector.broadcast %108 : vector<8x1xf32> to vector<8x64xf32>
    %110 = arith.mulf %2, %109 : vector<8x64xf32>
    %111 = vector.extract_strided_slice %103 {offsets = [0, 0], sizes = [8, 1], strides = [1, 1]} : vector<8x32xf32> to vector<8x1xf32>
    %112 = vector.broadcast %111 : vector<8x1xf32> to vector<8x64xf32>
    %113 = arith.addf %110, %112 : vector<8x64xf32>
    %cst_12 = arith.constant 0.000000e+00 : f32
    %114 = vector.broadcast %cst_12 : f32 to vector<8x64xf32>
    %115 = arith.maximumf %113, %114 : vector<8x64xf32>
    %c0_13 = arith.constant 0 : index
    %116 = memref.load %arg7[%c0_13] : memref<132xf32, #tpu.memory_space<smem>>
    %117 = vector.broadcast %116 : f32 to vector<8x64xf32>
    %118 = arith.mulf %115, %117 : vector<8x64xf32>
    %119 = arith.addf %104, %118 : vector<8x64xf32>
    %c1 = arith.constant 1 : index
    %120 = memref.load %arg7[%c1] : memref<132xf32, #tpu.memory_space<smem>>
    %121 = vector.broadcast %120 : f32 to vector<8x64xf32>
    %122 = arith.mulf %115, %121 : vector<8x64xf32>
    %123 = arith.addf %105, %122 : vector<8x64xf32>
    %c2 = arith.constant 2 : index
    %124 = memref.load %arg7[%c2] : memref<132xf32, #tpu.memory_space<smem>>
    %125 = vector.broadcast %124 : f32 to vector<8x64xf32>
    %126 = arith.mulf %115, %125 : vector<8x64xf32>
    %127 = arith.addf %106, %126 : vector<8x64xf32>
    %c3 = arith.constant 3 : index
    %128 = memref.load %arg7[%c3] : memref<132xf32, #tpu.memory_space<smem>>
    %129 = vector.broadcast %128 : f32 to vector<8x64xf32>
    %130 = arith.mulf %115, %129 : vector<8x64xf32>
    %131 = arith.addf %107, %130 : vector<8x64xf32>
    %132 = vector.extract_strided_slice %23 {offsets = [0, 1], sizes = [8, 1], strides = [1, 1]} : vector<8x32xf32> to vector<8x1xf32>
    %133 = vector.broadcast %132 : vector<8x1xf32> to vector<8x64xf32>
    %134 = arith.mulf %2, %133 : vector<8x64xf32>
    %135 = vector.extract_strided_slice %103 {offsets = [0, 1], sizes = [8, 1], strides = [1, 1]} : vector<8x32xf32> to vector<8x1xf32>
    %136 = vector.broadcast %135 : vector<8x1xf32> to vector<8x64xf32>
    %137 = arith.addf %134, %136 : vector<8x64xf32>
    %cst_14 = arith.constant 0.000000e+00 : f32
    %138 = vector.broadcast %cst_14 : f32 to vector<8x64xf32>
    %139 = arith.maximumf %137, %138 : vector<8x64xf32>
    %c4 = arith.constant 4 : index
    %140 = memref.load %arg7[%c4] : memref<132xf32, #tpu.memory_space<smem>>
    %141 = vector.broadcast %140 : f32 to vector<8x64xf32>
    %142 = arith.mulf %139, %141 : vector<8x64xf32>
    %143 = arith.addf %119, %142 : vector<8x64xf32>
    %c5 = arith.constant 5 : index
    %144 = memref.load %arg7[%c5] : memref<132xf32, #tpu.memory_space<smem>>
    %145 = vector.broadcast %144 : f32 to vector<8x64xf32>
    %146 = arith.mulf %139, %145 : vector<8x64xf32>
    %147 = arith.addf %123, %146 : vector<8x64xf32>
    %c6 = arith.constant 6 : index
    %148 = memref.load %arg7[%c6] : memref<132xf32, #tpu.memory_space<smem>>
    %149 = vector.broadcast %148 : f32 to vector<8x64xf32>
    %150 = arith.mulf %139, %149 : vector<8x64xf32>
    %151 = arith.addf %127, %150 : vector<8x64xf32>
    %c7 = arith.constant 7 : index
    %152 = memref.load %arg7[%c7] : memref<132xf32, #tpu.memory_space<smem>>
    %153 = vector.broadcast %152 : f32 to vector<8x64xf32>
    %154 = arith.mulf %139, %153 : vector<8x64xf32>
    %155 = arith.addf %131, %154 : vector<8x64xf32>
    %156 = vector.extract_strided_slice %23 {offsets = [0, 2], sizes = [8, 1], strides = [1, 1]} : vector<8x32xf32> to vector<8x1xf32>
    %157 = vector.broadcast %156 : vector<8x1xf32> to vector<8x64xf32>
    %158 = arith.mulf %2, %157 : vector<8x64xf32>
    %159 = vector.extract_strided_slice %103 {offsets = [0, 2], sizes = [8, 1], strides = [1, 1]} : vector<8x32xf32> to vector<8x1xf32>
    %160 = vector.broadcast %159 : vector<8x1xf32> to vector<8x64xf32>
    %161 = arith.addf %158, %160 : vector<8x64xf32>
    %cst_15 = arith.constant 0.000000e+00 : f32
    %162 = vector.broadcast %cst_15 : f32 to vector<8x64xf32>
    %163 = arith.maximumf %161, %162 : vector<8x64xf32>
    %c8 = arith.constant 8 : index
    %164 = memref.load %arg7[%c8] : memref<132xf32, #tpu.memory_space<smem>>
    %165 = vector.broadcast %164 : f32 to vector<8x64xf32>
    %166 = arith.mulf %163, %165 : vector<8x64xf32>
    %167 = arith.addf %143, %166 : vector<8x64xf32>
    %c9 = arith.constant 9 : index
    %168 = memref.load %arg7[%c9] : memref<132xf32, #tpu.memory_space<smem>>
    %169 = vector.broadcast %168 : f32 to vector<8x64xf32>
    %170 = arith.mulf %163, %169 : vector<8x64xf32>
    %171 = arith.addf %147, %170 : vector<8x64xf32>
    %c10 = arith.constant 10 : index
    %172 = memref.load %arg7[%c10] : memref<132xf32, #tpu.memory_space<smem>>
    %173 = vector.broadcast %172 : f32 to vector<8x64xf32>
    %174 = arith.mulf %163, %173 : vector<8x64xf32>
    %175 = arith.addf %151, %174 : vector<8x64xf32>
    %c11 = arith.constant 11 : index
    %176 = memref.load %arg7[%c11] : memref<132xf32, #tpu.memory_space<smem>>
    %177 = vector.broadcast %176 : f32 to vector<8x64xf32>
    %178 = arith.mulf %163, %177 : vector<8x64xf32>
    %179 = arith.addf %155, %178 : vector<8x64xf32>
    %180 = vector.extract_strided_slice %23 {offsets = [0, 3], sizes = [8, 1], strides = [1, 1]} : vector<8x32xf32> to vector<8x1xf32>
    %181 = vector.broadcast %180 : vector<8x1xf32> to vector<8x64xf32>
    %182 = arith.mulf %2, %181 : vector<8x64xf32>
    %183 = vector.extract_strided_slice %103 {offsets = [0, 3], sizes = [8, 1], strides = [1, 1]} : vector<8x32xf32> to vector<8x1xf32>
    %184 = vector.broadcast %183 : vector<8x1xf32> to vector<8x64xf32>
    %185 = arith.addf %182, %184 : vector<8x64xf32>
    %cst_16 = arith.constant 0.000000e+00 : f32
    %186 = vector.broadcast %cst_16 : f32 to vector<8x64xf32>
    %187 = arith.maximumf %185, %186 : vector<8x64xf32>
    %c12 = arith.constant 12 : index
    %188 = memref.load %arg7[%c12] : memref<132xf32, #tpu.memory_space<smem>>
    %189 = vector.broadcast %188 : f32 to vector<8x64xf32>
    %190 = arith.mulf %187, %189 : vector<8x64xf32>
    %191 = arith.addf %167, %190 : vector<8x64xf32>
    %c13 = arith.constant 13 : index
    %192 = memref.load %arg7[%c13] : memref<132xf32, #tpu.memory_space<smem>>
    %193 = vector.broadcast %192 : f32 to vector<8x64xf32>
    %194 = arith.mulf %187, %193 : vector<8x64xf32>
    %195 = arith.addf %171, %194 : vector<8x64xf32>
    %c14 = arith.constant 14 : index
    %196 = memref.load %arg7[%c14] : memref<132xf32, #tpu.memory_space<smem>>
    %197 = vector.broadcast %196 : f32 to vector<8x64xf32>
    %198 = arith.mulf %187, %197 : vector<8x64xf32>
    %199 = arith.addf %175, %198 : vector<8x64xf32>
    %c15 = arith.constant 15 : index
    %200 = memref.load %arg7[%c15] : memref<132xf32, #tpu.memory_space<smem>>
    %201 = vector.broadcast %200 : f32 to vector<8x64xf32>
    %202 = arith.mulf %187, %201 : vector<8x64xf32>
    %203 = arith.addf %179, %202 : vector<8x64xf32>
    %204 = vector.extract_strided_slice %23 {offsets = [0, 4], sizes = [8, 1], strides = [1, 1]} : vector<8x32xf32> to vector<8x1xf32>
    %205 = vector.broadcast %204 : vector<8x1xf32> to vector<8x64xf32>
    %206 = arith.mulf %2, %205 : vector<8x64xf32>
    %207 = vector.extract_strided_slice %103 {offsets = [0, 4], sizes = [8, 1], strides = [1, 1]} : vector<8x32xf32> to vector<8x1xf32>
    %208 = vector.broadcast %207 : vector<8x1xf32> to vector<8x64xf32>
    %209 = arith.addf %206, %208 : vector<8x64xf32>
    %cst_17 = arith.constant 0.000000e+00 : f32
    %210 = vector.broadcast %cst_17 : f32 to vector<8x64xf32>
    %211 = arith.maximumf %209, %210 : vector<8x64xf32>
    %c16 = arith.constant 16 : index
    %212 = memref.load %arg7[%c16] : memref<132xf32, #tpu.memory_space<smem>>
    %213 = vector.broadcast %212 : f32 to vector<8x64xf32>
    %214 = arith.mulf %211, %213 : vector<8x64xf32>
    %215 = arith.addf %191, %214 : vector<8x64xf32>
    %c17 = arith.constant 17 : index
    %216 = memref.load %arg7[%c17] : memref<132xf32, #tpu.memory_space<smem>>
    %217 = vector.broadcast %216 : f32 to vector<8x64xf32>
    %218 = arith.mulf %211, %217 : vector<8x64xf32>
    %219 = arith.addf %195, %218 : vector<8x64xf32>
    %c18 = arith.constant 18 : index
    %220 = memref.load %arg7[%c18] : memref<132xf32, #tpu.memory_space<smem>>
    %221 = vector.broadcast %220 : f32 to vector<8x64xf32>
    %222 = arith.mulf %211, %221 : vector<8x64xf32>
    %223 = arith.addf %199, %222 : vector<8x64xf32>
    %c19 = arith.constant 19 : index
    %224 = memref.load %arg7[%c19] : memref<132xf32, #tpu.memory_space<smem>>
    %225 = vector.broadcast %224 : f32 to vector<8x64xf32>
    %226 = arith.mulf %211, %225 : vector<8x64xf32>
    %227 = arith.addf %203, %226 : vector<8x64xf32>
    %228 = vector.extract_strided_slice %23 {offsets = [0, 5], sizes = [8, 1], strides = [1, 1]} : vector<8x32xf32> to vector<8x1xf32>
    %229 = vector.broadcast %228 : vector<8x1xf32> to vector<8x64xf32>
    %230 = arith.mulf %2, %229 : vector<8x64xf32>
    %231 = vector.extract_strided_slice %103 {offsets = [0, 5], sizes = [8, 1], strides = [1, 1]} : vector<8x32xf32> to vector<8x1xf32>
    %232 = vector.broadcast %231 : vector<8x1xf32> to vector<8x64xf32>
    %233 = arith.addf %230, %232 : vector<8x64xf32>
    %cst_18 = arith.constant 0.000000e+00 : f32
    %234 = vector.broadcast %cst_18 : f32 to vector<8x64xf32>
    %235 = arith.maximumf %233, %234 : vector<8x64xf32>
    %c20 = arith.constant 20 : index
    %236 = memref.load %arg7[%c20] : memref<132xf32, #tpu.memory_space<smem>>
    %237 = vector.broadcast %236 : f32 to vector<8x64xf32>
    %238 = arith.mulf %235, %237 : vector<8x64xf32>
    %239 = arith.addf %215, %238 : vector<8x64xf32>
    %c21 = arith.constant 21 : index
    %240 = memref.load %arg7[%c21] : memref<132xf32, #tpu.memory_space<smem>>
    %241 = vector.broadcast %240 : f32 to vector<8x64xf32>
    %242 = arith.mulf %235, %241 : vector<8x64xf32>
    %243 = arith.addf %219, %242 : vector<8x64xf32>
    %c22 = arith.constant 22 : index
    %244 = memref.load %arg7[%c22] : memref<132xf32, #tpu.memory_space<smem>>
    %245 = vector.broadcast %244 : f32 to vector<8x64xf32>
    %246 = arith.mulf %235, %245 : vector<8x64xf32>
    %247 = arith.addf %223, %246 : vector<8x64xf32>
    %c23 = arith.constant 23 : index
    %248 = memref.load %arg7[%c23] : memref<132xf32, #tpu.memory_space<smem>>
    %249 = vector.broadcast %248 : f32 to vector<8x64xf32>
    %250 = arith.mulf %235, %249 : vector<8x64xf32>
    %251 = arith.addf %227, %250 : vector<8x64xf32>
    %252 = vector.extract_strided_slice %23 {offsets = [0, 6], sizes = [8, 1], strides = [1, 1]} : vector<8x32xf32> to vector<8x1xf32>
    %253 = vector.broadcast %252 : vector<8x1xf32> to vector<8x64xf32>
    %254 = arith.mulf %2, %253 : vector<8x64xf32>
    %255 = vector.extract_strided_slice %103 {offsets = [0, 6], sizes = [8, 1], strides = [1, 1]} : vector<8x32xf32> to vector<8x1xf32>
    %256 = vector.broadcast %255 : vector<8x1xf32> to vector<8x64xf32>
    %257 = arith.addf %254, %256 : vector<8x64xf32>
    %cst_19 = arith.constant 0.000000e+00 : f32
    %258 = vector.broadcast %cst_19 : f32 to vector<8x64xf32>
    %259 = arith.maximumf %257, %258 : vector<8x64xf32>
    %c24 = arith.constant 24 : index
    %260 = memref.load %arg7[%c24] : memref<132xf32, #tpu.memory_space<smem>>
    %261 = vector.broadcast %260 : f32 to vector<8x64xf32>
    %262 = arith.mulf %259, %261 : vector<8x64xf32>
    %263 = arith.addf %239, %262 : vector<8x64xf32>
    %c25 = arith.constant 25 : index
    %264 = memref.load %arg7[%c25] : memref<132xf32, #tpu.memory_space<smem>>
    %265 = vector.broadcast %264 : f32 to vector<8x64xf32>
    %266 = arith.mulf %259, %265 : vector<8x64xf32>
    %267 = arith.addf %243, %266 : vector<8x64xf32>
    %c26 = arith.constant 26 : index
    %268 = memref.load %arg7[%c26] : memref<132xf32, #tpu.memory_space<smem>>
    %269 = vector.broadcast %268 : f32 to vector<8x64xf32>
    %270 = arith.mulf %259, %269 : vector<8x64xf32>
    %271 = arith.addf %247, %270 : vector<8x64xf32>
    %c27 = arith.constant 27 : index
    %272 = memref.load %arg7[%c27] : memref<132xf32, #tpu.memory_space<smem>>
    %273 = vector.broadcast %272 : f32 to vector<8x64xf32>
    %274 = arith.mulf %259, %273 : vector<8x64xf32>
    %275 = arith.addf %251, %274 : vector<8x64xf32>
    %276 = vector.extract_strided_slice %23 {offsets = [0, 7], sizes = [8, 1], strides = [1, 1]} : vector<8x32xf32> to vector<8x1xf32>
    %277 = vector.broadcast %276 : vector<8x1xf32> to vector<8x64xf32>
    %278 = arith.mulf %2, %277 : vector<8x64xf32>
    %279 = vector.extract_strided_slice %103 {offsets = [0, 7], sizes = [8, 1], strides = [1, 1]} : vector<8x32xf32> to vector<8x1xf32>
    %280 = vector.broadcast %279 : vector<8x1xf32> to vector<8x64xf32>
    %281 = arith.addf %278, %280 : vector<8x64xf32>
    %cst_20 = arith.constant 0.000000e+00 : f32
    %282 = vector.broadcast %cst_20 : f32 to vector<8x64xf32>
    %283 = arith.maximumf %281, %282 : vector<8x64xf32>
    %c28 = arith.constant 28 : index
    %284 = memref.load %arg7[%c28] : memref<132xf32, #tpu.memory_space<smem>>
    %285 = vector.broadcast %284 : f32 to vector<8x64xf32>
    %286 = arith.mulf %283, %285 : vector<8x64xf32>
    %287 = arith.addf %263, %286 : vector<8x64xf32>
    %c29 = arith.constant 29 : index
    %288 = memref.load %arg7[%c29] : memref<132xf32, #tpu.memory_space<smem>>
    %289 = vector.broadcast %288 : f32 to vector<8x64xf32>
    %290 = arith.mulf %283, %289 : vector<8x64xf32>
    %291 = arith.addf %267, %290 : vector<8x64xf32>
    %c30 = arith.constant 30 : index
    %292 = memref.load %arg7[%c30] : memref<132xf32, #tpu.memory_space<smem>>
    %293 = vector.broadcast %292 : f32 to vector<8x64xf32>
    %294 = arith.mulf %283, %293 : vector<8x64xf32>
    %295 = arith.addf %271, %294 : vector<8x64xf32>
    %c31 = arith.constant 31 : index
    %296 = memref.load %arg7[%c31] : memref<132xf32, #tpu.memory_space<smem>>
    %297 = vector.broadcast %296 : f32 to vector<8x64xf32>
    %298 = arith.mulf %283, %297 : vector<8x64xf32>
    %299 = arith.addf %275, %298 : vector<8x64xf32>
    %300 = vector.extract_strided_slice %23 {offsets = [0, 8], sizes = [8, 1], strides = [1, 1]} : vector<8x32xf32> to vector<8x1xf32>
    %301 = vector.broadcast %300 : vector<8x1xf32> to vector<8x64xf32>
    %302 = arith.mulf %2, %301 : vector<8x64xf32>
    %303 = vector.extract_strided_slice %103 {offsets = [0, 8], sizes = [8, 1], strides = [1, 1]} : vector<8x32xf32> to vector<8x1xf32>
    %304 = vector.broadcast %303 : vector<8x1xf32> to vector<8x64xf32>
    %305 = arith.addf %302, %304 : vector<8x64xf32>
    %cst_21 = arith.constant 0.000000e+00 : f32
    %306 = vector.broadcast %cst_21 : f32 to vector<8x64xf32>
    %307 = arith.maximumf %305, %306 : vector<8x64xf32>
    %c32 = arith.constant 32 : index
    %308 = memref.load %arg7[%c32] : memref<132xf32, #tpu.memory_space<smem>>
    %309 = vector.broadcast %308 : f32 to vector<8x64xf32>
    %310 = arith.mulf %307, %309 : vector<8x64xf32>
    %311 = arith.addf %287, %310 : vector<8x64xf32>
    %c33 = arith.constant 33 : index
    %312 = memref.load %arg7[%c33] : memref<132xf32, #tpu.memory_space<smem>>
    %313 = vector.broadcast %312 : f32 to vector<8x64xf32>
    %314 = arith.mulf %307, %313 : vector<8x64xf32>
    %315 = arith.addf %291, %314 : vector<8x64xf32>
    %c34 = arith.constant 34 : index
    %316 = memref.load %arg7[%c34] : memref<132xf32, #tpu.memory_space<smem>>
    %317 = vector.broadcast %316 : f32 to vector<8x64xf32>
    %318 = arith.mulf %307, %317 : vector<8x64xf32>
    %319 = arith.addf %295, %318 : vector<8x64xf32>
    %c35 = arith.constant 35 : index
    %320 = memref.load %arg7[%c35] : memref<132xf32, #tpu.memory_space<smem>>
    %321 = vector.broadcast %320 : f32 to vector<8x64xf32>
    %322 = arith.mulf %307, %321 : vector<8x64xf32>
    %323 = arith.addf %299, %322 : vector<8x64xf32>
    %324 = vector.extract_strided_slice %23 {offsets = [0, 9], sizes = [8, 1], strides = [1, 1]} : vector<8x32xf32> to vector<8x1xf32>
    %325 = vector.broadcast %324 : vector<8x1xf32> to vector<8x64xf32>
    %326 = arith.mulf %2, %325 : vector<8x64xf32>
    %327 = vector.extract_strided_slice %103 {offsets = [0, 9], sizes = [8, 1], strides = [1, 1]} : vector<8x32xf32> to vector<8x1xf32>
    %328 = vector.broadcast %327 : vector<8x1xf32> to vector<8x64xf32>
    %329 = arith.addf %326, %328 : vector<8x64xf32>
    %cst_22 = arith.constant 0.000000e+00 : f32
    %330 = vector.broadcast %cst_22 : f32 to vector<8x64xf32>
    %331 = arith.maximumf %329, %330 : vector<8x64xf32>
    %c36 = arith.constant 36 : index
    %332 = memref.load %arg7[%c36] : memref<132xf32, #tpu.memory_space<smem>>
    %333 = vector.broadcast %332 : f32 to vector<8x64xf32>
    %334 = arith.mulf %331, %333 : vector<8x64xf32>
    %335 = arith.addf %311, %334 : vector<8x64xf32>
    %c37 = arith.constant 37 : index
    %336 = memref.load %arg7[%c37] : memref<132xf32, #tpu.memory_space<smem>>
    %337 = vector.broadcast %336 : f32 to vector<8x64xf32>
    %338 = arith.mulf %331, %337 : vector<8x64xf32>
    %339 = arith.addf %315, %338 : vector<8x64xf32>
    %c38 = arith.constant 38 : index
    %340 = memref.load %arg7[%c38] : memref<132xf32, #tpu.memory_space<smem>>
    %341 = vector.broadcast %340 : f32 to vector<8x64xf32>
    %342 = arith.mulf %331, %341 : vector<8x64xf32>
    %343 = arith.addf %319, %342 : vector<8x64xf32>
    %c39 = arith.constant 39 : index
    %344 = memref.load %arg7[%c39] : memref<132xf32, #tpu.memory_space<smem>>
    %345 = vector.broadcast %344 : f32 to vector<8x64xf32>
    %346 = arith.mulf %331, %345 : vector<8x64xf32>
    %347 = arith.addf %323, %346 : vector<8x64xf32>
    %348 = vector.extract_strided_slice %23 {offsets = [0, 10], sizes = [8, 1], strides = [1, 1]} : vector<8x32xf32> to vector<8x1xf32>
    %349 = vector.broadcast %348 : vector<8x1xf32> to vector<8x64xf32>
    %350 = arith.mulf %2, %349 : vector<8x64xf32>
    %351 = vector.extract_strided_slice %103 {offsets = [0, 10], sizes = [8, 1], strides = [1, 1]} : vector<8x32xf32> to vector<8x1xf32>
    %352 = vector.broadcast %351 : vector<8x1xf32> to vector<8x64xf32>
    %353 = arith.addf %350, %352 : vector<8x64xf32>
    %cst_23 = arith.constant 0.000000e+00 : f32
    %354 = vector.broadcast %cst_23 : f32 to vector<8x64xf32>
    %355 = arith.maximumf %353, %354 : vector<8x64xf32>
    %c40 = arith.constant 40 : index
    %356 = memref.load %arg7[%c40] : memref<132xf32, #tpu.memory_space<smem>>
    %357 = vector.broadcast %356 : f32 to vector<8x64xf32>
    %358 = arith.mulf %355, %357 : vector<8x64xf32>
    %359 = arith.addf %335, %358 : vector<8x64xf32>
    %c41 = arith.constant 41 : index
    %360 = memref.load %arg7[%c41] : memref<132xf32, #tpu.memory_space<smem>>
    %361 = vector.broadcast %360 : f32 to vector<8x64xf32>
    %362 = arith.mulf %355, %361 : vector<8x64xf32>
    %363 = arith.addf %339, %362 : vector<8x64xf32>
    %c42 = arith.constant 42 : index
    %364 = memref.load %arg7[%c42] : memref<132xf32, #tpu.memory_space<smem>>
    %365 = vector.broadcast %364 : f32 to vector<8x64xf32>
    %366 = arith.mulf %355, %365 : vector<8x64xf32>
    %367 = arith.addf %343, %366 : vector<8x64xf32>
    %c43 = arith.constant 43 : index
    %368 = memref.load %arg7[%c43] : memref<132xf32, #tpu.memory_space<smem>>
    %369 = vector.broadcast %368 : f32 to vector<8x64xf32>
    %370 = arith.mulf %355, %369 : vector<8x64xf32>
    %371 = arith.addf %347, %370 : vector<8x64xf32>
    %372 = vector.extract_strided_slice %23 {offsets = [0, 11], sizes = [8, 1], strides = [1, 1]} : vector<8x32xf32> to vector<8x1xf32>
    %373 = vector.broadcast %372 : vector<8x1xf32> to vector<8x64xf32>
    %374 = arith.mulf %2, %373 : vector<8x64xf32>
    %375 = vector.extract_strided_slice %103 {offsets = [0, 11], sizes = [8, 1], strides = [1, 1]} : vector<8x32xf32> to vector<8x1xf32>
    %376 = vector.broadcast %375 : vector<8x1xf32> to vector<8x64xf32>
    %377 = arith.addf %374, %376 : vector<8x64xf32>
    %cst_24 = arith.constant 0.000000e+00 : f32
    %378 = vector.broadcast %cst_24 : f32 to vector<8x64xf32>
    %379 = arith.maximumf %377, %378 : vector<8x64xf32>
    %c44 = arith.constant 44 : index
    %380 = memref.load %arg7[%c44] : memref<132xf32, #tpu.memory_space<smem>>
    %381 = vector.broadcast %380 : f32 to vector<8x64xf32>
    %382 = arith.mulf %379, %381 : vector<8x64xf32>
    %383 = arith.addf %359, %382 : vector<8x64xf32>
    %c45 = arith.constant 45 : index
    %384 = memref.load %arg7[%c45] : memref<132xf32, #tpu.memory_space<smem>>
    %385 = vector.broadcast %384 : f32 to vector<8x64xf32>
    %386 = arith.mulf %379, %385 : vector<8x64xf32>
    %387 = arith.addf %363, %386 : vector<8x64xf32>
    %c46 = arith.constant 46 : index
    %388 = memref.load %arg7[%c46] : memref<132xf32, #tpu.memory_space<smem>>
    %389 = vector.broadcast %388 : f32 to vector<8x64xf32>
    %390 = arith.mulf %379, %389 : vector<8x64xf32>
    %391 = arith.addf %367, %390 : vector<8x64xf32>
    %c47 = arith.constant 47 : index
    %392 = memref.load %arg7[%c47] : memref<132xf32, #tpu.memory_space<smem>>
    %393 = vector.broadcast %392 : f32 to vector<8x64xf32>
    %394 = arith.mulf %379, %393 : vector<8x64xf32>
    %395 = arith.addf %371, %394 : vector<8x64xf32>
    %396 = vector.extract_strided_slice %23 {offsets = [0, 12], sizes = [8, 1], strides = [1, 1]} : vector<8x32xf32> to vector<8x1xf32>
    %397 = vector.broadcast %396 : vector<8x1xf32> to vector<8x64xf32>
    %398 = arith.mulf %2, %397 : vector<8x64xf32>
    %399 = vector.extract_strided_slice %103 {offsets = [0, 12], sizes = [8, 1], strides = [1, 1]} : vector<8x32xf32> to vector<8x1xf32>
    %400 = vector.broadcast %399 : vector<8x1xf32> to vector<8x64xf32>
    %401 = arith.addf %398, %400 : vector<8x64xf32>
    %cst_25 = arith.constant 0.000000e+00 : f32
    %402 = vector.broadcast %cst_25 : f32 to vector<8x64xf32>
    %403 = arith.maximumf %401, %402 : vector<8x64xf32>
    %c48 = arith.constant 48 : index
    %404 = memref.load %arg7[%c48] : memref<132xf32, #tpu.memory_space<smem>>
    %405 = vector.broadcast %404 : f32 to vector<8x64xf32>
    %406 = arith.mulf %403, %405 : vector<8x64xf32>
    %407 = arith.addf %383, %406 : vector<8x64xf32>
    %c49 = arith.constant 49 : index
    %408 = memref.load %arg7[%c49] : memref<132xf32, #tpu.memory_space<smem>>
    %409 = vector.broadcast %408 : f32 to vector<8x64xf32>
    %410 = arith.mulf %403, %409 : vector<8x64xf32>
    %411 = arith.addf %387, %410 : vector<8x64xf32>
    %c50 = arith.constant 50 : index
    %412 = memref.load %arg7[%c50] : memref<132xf32, #tpu.memory_space<smem>>
    %413 = vector.broadcast %412 : f32 to vector<8x64xf32>
    %414 = arith.mulf %403, %413 : vector<8x64xf32>
    %415 = arith.addf %391, %414 : vector<8x64xf32>
    %c51 = arith.constant 51 : index
    %416 = memref.load %arg7[%c51] : memref<132xf32, #tpu.memory_space<smem>>
    %417 = vector.broadcast %416 : f32 to vector<8x64xf32>
    %418 = arith.mulf %403, %417 : vector<8x64xf32>
    %419 = arith.addf %395, %418 : vector<8x64xf32>
    %420 = vector.extract_strided_slice %23 {offsets = [0, 13], sizes = [8, 1], strides = [1, 1]} : vector<8x32xf32> to vector<8x1xf32>
    %421 = vector.broadcast %420 : vector<8x1xf32> to vector<8x64xf32>
    %422 = arith.mulf %2, %421 : vector<8x64xf32>
    %423 = vector.extract_strided_slice %103 {offsets = [0, 13], sizes = [8, 1], strides = [1, 1]} : vector<8x32xf32> to vector<8x1xf32>
    %424 = vector.broadcast %423 : vector<8x1xf32> to vector<8x64xf32>
    %425 = arith.addf %422, %424 : vector<8x64xf32>
    %cst_26 = arith.constant 0.000000e+00 : f32
    %426 = vector.broadcast %cst_26 : f32 to vector<8x64xf32>
    %427 = arith.maximumf %425, %426 : vector<8x64xf32>
    %c52 = arith.constant 52 : index
    %428 = memref.load %arg7[%c52] : memref<132xf32, #tpu.memory_space<smem>>
    %429 = vector.broadcast %428 : f32 to vector<8x64xf32>
    %430 = arith.mulf %427, %429 : vector<8x64xf32>
    %431 = arith.addf %407, %430 : vector<8x64xf32>
    %c53 = arith.constant 53 : index
    %432 = memref.load %arg7[%c53] : memref<132xf32, #tpu.memory_space<smem>>
    %433 = vector.broadcast %432 : f32 to vector<8x64xf32>
    %434 = arith.mulf %427, %433 : vector<8x64xf32>
    %435 = arith.addf %411, %434 : vector<8x64xf32>
    %c54 = arith.constant 54 : index
    %436 = memref.load %arg7[%c54] : memref<132xf32, #tpu.memory_space<smem>>
    %437 = vector.broadcast %436 : f32 to vector<8x64xf32>
    %438 = arith.mulf %427, %437 : vector<8x64xf32>
    %439 = arith.addf %415, %438 : vector<8x64xf32>
    %c55 = arith.constant 55 : index
    %440 = memref.load %arg7[%c55] : memref<132xf32, #tpu.memory_space<smem>>
    %441 = vector.broadcast %440 : f32 to vector<8x64xf32>
    %442 = arith.mulf %427, %441 : vector<8x64xf32>
    %443 = arith.addf %419, %442 : vector<8x64xf32>
    %444 = vector.extract_strided_slice %23 {offsets = [0, 14], sizes = [8, 1], strides = [1, 1]} : vector<8x32xf32> to vector<8x1xf32>
    %445 = vector.broadcast %444 : vector<8x1xf32> to vector<8x64xf32>
    %446 = arith.mulf %2, %445 : vector<8x64xf32>
    %447 = vector.extract_strided_slice %103 {offsets = [0, 14], sizes = [8, 1], strides = [1, 1]} : vector<8x32xf32> to vector<8x1xf32>
    %448 = vector.broadcast %447 : vector<8x1xf32> to vector<8x64xf32>
    %449 = arith.addf %446, %448 : vector<8x64xf32>
    %cst_27 = arith.constant 0.000000e+00 : f32
    %450 = vector.broadcast %cst_27 : f32 to vector<8x64xf32>
    %451 = arith.maximumf %449, %450 : vector<8x64xf32>
    %c56 = arith.constant 56 : index
    %452 = memref.load %arg7[%c56] : memref<132xf32, #tpu.memory_space<smem>>
    %453 = vector.broadcast %452 : f32 to vector<8x64xf32>
    %454 = arith.mulf %451, %453 : vector<8x64xf32>
    %455 = arith.addf %431, %454 : vector<8x64xf32>
    %c57 = arith.constant 57 : index
    %456 = memref.load %arg7[%c57] : memref<132xf32, #tpu.memory_space<smem>>
    %457 = vector.broadcast %456 : f32 to vector<8x64xf32>
    %458 = arith.mulf %451, %457 : vector<8x64xf32>
    %459 = arith.addf %435, %458 : vector<8x64xf32>
    %c58 = arith.constant 58 : index
    %460 = memref.load %arg7[%c58] : memref<132xf32, #tpu.memory_space<smem>>
    %461 = vector.broadcast %460 : f32 to vector<8x64xf32>
    %462 = arith.mulf %451, %461 : vector<8x64xf32>
    %463 = arith.addf %439, %462 : vector<8x64xf32>
    %c59 = arith.constant 59 : index
    %464 = memref.load %arg7[%c59] : memref<132xf32, #tpu.memory_space<smem>>
    %465 = vector.broadcast %464 : f32 to vector<8x64xf32>
    %466 = arith.mulf %451, %465 : vector<8x64xf32>
    %467 = arith.addf %443, %466 : vector<8x64xf32>
    %468 = vector.extract_strided_slice %23 {offsets = [0, 15], sizes = [8, 1], strides = [1, 1]} : vector<8x32xf32> to vector<8x1xf32>
    %469 = vector.broadcast %468 : vector<8x1xf32> to vector<8x64xf32>
    %470 = arith.mulf %2, %469 : vector<8x64xf32>
    %471 = vector.extract_strided_slice %103 {offsets = [0, 15], sizes = [8, 1], strides = [1, 1]} : vector<8x32xf32> to vector<8x1xf32>
    %472 = vector.broadcast %471 : vector<8x1xf32> to vector<8x64xf32>
    %473 = arith.addf %470, %472 : vector<8x64xf32>
    %cst_28 = arith.constant 0.000000e+00 : f32
    %474 = vector.broadcast %cst_28 : f32 to vector<8x64xf32>
    %475 = arith.maximumf %473, %474 : vector<8x64xf32>
    %c60 = arith.constant 60 : index
    %476 = memref.load %arg7[%c60] : memref<132xf32, #tpu.memory_space<smem>>
    %477 = vector.broadcast %476 : f32 to vector<8x64xf32>
    %478 = arith.mulf %475, %477 : vector<8x64xf32>
    %479 = arith.addf %455, %478 : vector<8x64xf32>
    %c61 = arith.constant 61 : index
    %480 = memref.load %arg7[%c61] : memref<132xf32, #tpu.memory_space<smem>>
    %481 = vector.broadcast %480 : f32 to vector<8x64xf32>
    %482 = arith.mulf %475, %481 : vector<8x64xf32>
    %483 = arith.addf %459, %482 : vector<8x64xf32>
    %c62 = arith.constant 62 : index
    %484 = memref.load %arg7[%c62] : memref<132xf32, #tpu.memory_space<smem>>
    %485 = vector.broadcast %484 : f32 to vector<8x64xf32>
    %486 = arith.mulf %475, %485 : vector<8x64xf32>
    %487 = arith.addf %463, %486 : vector<8x64xf32>
    %c63 = arith.constant 63 : index
    %488 = memref.load %arg7[%c63] : memref<132xf32, #tpu.memory_space<smem>>
    %489 = vector.broadcast %488 : f32 to vector<8x64xf32>
    %490 = arith.mulf %475, %489 : vector<8x64xf32>
    %491 = arith.addf %467, %490 : vector<8x64xf32>
    %492 = vector.extract_strided_slice %23 {offsets = [0, 16], sizes = [8, 1], strides = [1, 1]} : vector<8x32xf32> to vector<8x1xf32>
    %493 = vector.broadcast %492 : vector<8x1xf32> to vector<8x64xf32>
    %494 = arith.mulf %2, %493 : vector<8x64xf32>
    %495 = vector.extract_strided_slice %103 {offsets = [0, 16], sizes = [8, 1], strides = [1, 1]} : vector<8x32xf32> to vector<8x1xf32>
    %496 = vector.broadcast %495 : vector<8x1xf32> to vector<8x64xf32>
    %497 = arith.addf %494, %496 : vector<8x64xf32>
    %cst_29 = arith.constant 0.000000e+00 : f32
    %498 = vector.broadcast %cst_29 : f32 to vector<8x64xf32>
    %499 = arith.maximumf %497, %498 : vector<8x64xf32>
    %c64 = arith.constant 64 : index
    %500 = memref.load %arg7[%c64] : memref<132xf32, #tpu.memory_space<smem>>
    %501 = vector.broadcast %500 : f32 to vector<8x64xf32>
    %502 = arith.mulf %499, %501 : vector<8x64xf32>
    %503 = arith.addf %479, %502 : vector<8x64xf32>
    %c65 = arith.constant 65 : index
    %504 = memref.load %arg7[%c65] : memref<132xf32, #tpu.memory_space<smem>>
    %505 = vector.broadcast %504 : f32 to vector<8x64xf32>
    %506 = arith.mulf %499, %505 : vector<8x64xf32>
    %507 = arith.addf %483, %506 : vector<8x64xf32>
    %c66 = arith.constant 66 : index
    %508 = memref.load %arg7[%c66] : memref<132xf32, #tpu.memory_space<smem>>
    %509 = vector.broadcast %508 : f32 to vector<8x64xf32>
    %510 = arith.mulf %499, %509 : vector<8x64xf32>
    %511 = arith.addf %487, %510 : vector<8x64xf32>
    %c67 = arith.constant 67 : index
    %512 = memref.load %arg7[%c67] : memref<132xf32, #tpu.memory_space<smem>>
    %513 = vector.broadcast %512 : f32 to vector<8x64xf32>
    %514 = arith.mulf %499, %513 : vector<8x64xf32>
    %515 = arith.addf %491, %514 : vector<8x64xf32>
    %516 = vector.extract_strided_slice %23 {offsets = [0, 17], sizes = [8, 1], strides = [1, 1]} : vector<8x32xf32> to vector<8x1xf32>
    %517 = vector.broadcast %516 : vector<8x1xf32> to vector<8x64xf32>
    %518 = arith.mulf %2, %517 : vector<8x64xf32>
    %519 = vector.extract_strided_slice %103 {offsets = [0, 17], sizes = [8, 1], strides = [1, 1]} : vector<8x32xf32> to vector<8x1xf32>
    %520 = vector.broadcast %519 : vector<8x1xf32> to vector<8x64xf32>
    %521 = arith.addf %518, %520 : vector<8x64xf32>
    %cst_30 = arith.constant 0.000000e+00 : f32
    %522 = vector.broadcast %cst_30 : f32 to vector<8x64xf32>
    %523 = arith.maximumf %521, %522 : vector<8x64xf32>
    %c68 = arith.constant 68 : index
    %524 = memref.load %arg7[%c68] : memref<132xf32, #tpu.memory_space<smem>>
    %525 = vector.broadcast %524 : f32 to vector<8x64xf32>
    %526 = arith.mulf %523, %525 : vector<8x64xf32>
    %527 = arith.addf %503, %526 : vector<8x64xf32>
    %c69 = arith.constant 69 : index
    %528 = memref.load %arg7[%c69] : memref<132xf32, #tpu.memory_space<smem>>
    %529 = vector.broadcast %528 : f32 to vector<8x64xf32>
    %530 = arith.mulf %523, %529 : vector<8x64xf32>
    %531 = arith.addf %507, %530 : vector<8x64xf32>
    %c70 = arith.constant 70 : index
    %532 = memref.load %arg7[%c70] : memref<132xf32, #tpu.memory_space<smem>>
    %533 = vector.broadcast %532 : f32 to vector<8x64xf32>
    %534 = arith.mulf %523, %533 : vector<8x64xf32>
    %535 = arith.addf %511, %534 : vector<8x64xf32>
    %c71 = arith.constant 71 : index
    %536 = memref.load %arg7[%c71] : memref<132xf32, #tpu.memory_space<smem>>
    %537 = vector.broadcast %536 : f32 to vector<8x64xf32>
    %538 = arith.mulf %523, %537 : vector<8x64xf32>
    %539 = arith.addf %515, %538 : vector<8x64xf32>
    %540 = vector.extract_strided_slice %23 {offsets = [0, 18], sizes = [8, 1], strides = [1, 1]} : vector<8x32xf32> to vector<8x1xf32>
    %541 = vector.broadcast %540 : vector<8x1xf32> to vector<8x64xf32>
    %542 = arith.mulf %2, %541 : vector<8x64xf32>
    %543 = vector.extract_strided_slice %103 {offsets = [0, 18], sizes = [8, 1], strides = [1, 1]} : vector<8x32xf32> to vector<8x1xf32>
    %544 = vector.broadcast %543 : vector<8x1xf32> to vector<8x64xf32>
    %545 = arith.addf %542, %544 : vector<8x64xf32>
    %cst_31 = arith.constant 0.000000e+00 : f32
    %546 = vector.broadcast %cst_31 : f32 to vector<8x64xf32>
    %547 = arith.maximumf %545, %546 : vector<8x64xf32>
    %c72 = arith.constant 72 : index
    %548 = memref.load %arg7[%c72] : memref<132xf32, #tpu.memory_space<smem>>
    %549 = vector.broadcast %548 : f32 to vector<8x64xf32>
    %550 = arith.mulf %547, %549 : vector<8x64xf32>
    %551 = arith.addf %527, %550 : vector<8x64xf32>
    %c73 = arith.constant 73 : index
    %552 = memref.load %arg7[%c73] : memref<132xf32, #tpu.memory_space<smem>>
    %553 = vector.broadcast %552 : f32 to vector<8x64xf32>
    %554 = arith.mulf %547, %553 : vector<8x64xf32>
    %555 = arith.addf %531, %554 : vector<8x64xf32>
    %c74 = arith.constant 74 : index
    %556 = memref.load %arg7[%c74] : memref<132xf32, #tpu.memory_space<smem>>
    %557 = vector.broadcast %556 : f32 to vector<8x64xf32>
    %558 = arith.mulf %547, %557 : vector<8x64xf32>
    %559 = arith.addf %535, %558 : vector<8x64xf32>
    %c75 = arith.constant 75 : index
    %560 = memref.load %arg7[%c75] : memref<132xf32, #tpu.memory_space<smem>>
    %561 = vector.broadcast %560 : f32 to vector<8x64xf32>
    %562 = arith.mulf %547, %561 : vector<8x64xf32>
    %563 = arith.addf %539, %562 : vector<8x64xf32>
    %564 = vector.extract_strided_slice %23 {offsets = [0, 19], sizes = [8, 1], strides = [1, 1]} : vector<8x32xf32> to vector<8x1xf32>
    %565 = vector.broadcast %564 : vector<8x1xf32> to vector<8x64xf32>
    %566 = arith.mulf %2, %565 : vector<8x64xf32>
    %567 = vector.extract_strided_slice %103 {offsets = [0, 19], sizes = [8, 1], strides = [1, 1]} : vector<8x32xf32> to vector<8x1xf32>
    %568 = vector.broadcast %567 : vector<8x1xf32> to vector<8x64xf32>
    %569 = arith.addf %566, %568 : vector<8x64xf32>
    %cst_32 = arith.constant 0.000000e+00 : f32
    %570 = vector.broadcast %cst_32 : f32 to vector<8x64xf32>
    %571 = arith.maximumf %569, %570 : vector<8x64xf32>
    %c76 = arith.constant 76 : index
    %572 = memref.load %arg7[%c76] : memref<132xf32, #tpu.memory_space<smem>>
    %573 = vector.broadcast %572 : f32 to vector<8x64xf32>
    %574 = arith.mulf %571, %573 : vector<8x64xf32>
    %575 = arith.addf %551, %574 : vector<8x64xf32>
    %c77 = arith.constant 77 : index
    %576 = memref.load %arg7[%c77] : memref<132xf32, #tpu.memory_space<smem>>
    %577 = vector.broadcast %576 : f32 to vector<8x64xf32>
    %578 = arith.mulf %571, %577 : vector<8x64xf32>
    %579 = arith.addf %555, %578 : vector<8x64xf32>
    %c78 = arith.constant 78 : index
    %580 = memref.load %arg7[%c78] : memref<132xf32, #tpu.memory_space<smem>>
    %581 = vector.broadcast %580 : f32 to vector<8x64xf32>
    %582 = arith.mulf %571, %581 : vector<8x64xf32>
    %583 = arith.addf %559, %582 : vector<8x64xf32>
    %c79 = arith.constant 79 : index
    %584 = memref.load %arg7[%c79] : memref<132xf32, #tpu.memory_space<smem>>
    %585 = vector.broadcast %584 : f32 to vector<8x64xf32>
    %586 = arith.mulf %571, %585 : vector<8x64xf32>
    %587 = arith.addf %563, %586 : vector<8x64xf32>
    %588 = vector.extract_strided_slice %23 {offsets = [0, 20], sizes = [8, 1], strides = [1, 1]} : vector<8x32xf32> to vector<8x1xf32>
    %589 = vector.broadcast %588 : vector<8x1xf32> to vector<8x64xf32>
    %590 = arith.mulf %2, %589 : vector<8x64xf32>
    %591 = vector.extract_strided_slice %103 {offsets = [0, 20], sizes = [8, 1], strides = [1, 1]} : vector<8x32xf32> to vector<8x1xf32>
    %592 = vector.broadcast %591 : vector<8x1xf32> to vector<8x64xf32>
    %593 = arith.addf %590, %592 : vector<8x64xf32>
    %cst_33 = arith.constant 0.000000e+00 : f32
    %594 = vector.broadcast %cst_33 : f32 to vector<8x64xf32>
    %595 = arith.maximumf %593, %594 : vector<8x64xf32>
    %c80 = arith.constant 80 : index
    %596 = memref.load %arg7[%c80] : memref<132xf32, #tpu.memory_space<smem>>
    %597 = vector.broadcast %596 : f32 to vector<8x64xf32>
    %598 = arith.mulf %595, %597 : vector<8x64xf32>
    %599 = arith.addf %575, %598 : vector<8x64xf32>
    %c81 = arith.constant 81 : index
    %600 = memref.load %arg7[%c81] : memref<132xf32, #tpu.memory_space<smem>>
    %601 = vector.broadcast %600 : f32 to vector<8x64xf32>
    %602 = arith.mulf %595, %601 : vector<8x64xf32>
    %603 = arith.addf %579, %602 : vector<8x64xf32>
    %c82 = arith.constant 82 : index
    %604 = memref.load %arg7[%c82] : memref<132xf32, #tpu.memory_space<smem>>
    %605 = vector.broadcast %604 : f32 to vector<8x64xf32>
    %606 = arith.mulf %595, %605 : vector<8x64xf32>
    %607 = arith.addf %583, %606 : vector<8x64xf32>
    %c83 = arith.constant 83 : index
    %608 = memref.load %arg7[%c83] : memref<132xf32, #tpu.memory_space<smem>>
    %609 = vector.broadcast %608 : f32 to vector<8x64xf32>
    %610 = arith.mulf %595, %609 : vector<8x64xf32>
    %611 = arith.addf %587, %610 : vector<8x64xf32>
    %612 = vector.extract_strided_slice %23 {offsets = [0, 21], sizes = [8, 1], strides = [1, 1]} : vector<8x32xf32> to vector<8x1xf32>
    %613 = vector.broadcast %612 : vector<8x1xf32> to vector<8x64xf32>
    %614 = arith.mulf %2, %613 : vector<8x64xf32>
    %615 = vector.extract_strided_slice %103 {offsets = [0, 21], sizes = [8, 1], strides = [1, 1]} : vector<8x32xf32> to vector<8x1xf32>
    %616 = vector.broadcast %615 : vector<8x1xf32> to vector<8x64xf32>
    %617 = arith.addf %614, %616 : vector<8x64xf32>
    %cst_34 = arith.constant 0.000000e+00 : f32
    %618 = vector.broadcast %cst_34 : f32 to vector<8x64xf32>
    %619 = arith.maximumf %617, %618 : vector<8x64xf32>
    %c84 = arith.constant 84 : index
    %620 = memref.load %arg7[%c84] : memref<132xf32, #tpu.memory_space<smem>>
    %621 = vector.broadcast %620 : f32 to vector<8x64xf32>
    %622 = arith.mulf %619, %621 : vector<8x64xf32>
    %623 = arith.addf %599, %622 : vector<8x64xf32>
    %c85 = arith.constant 85 : index
    %624 = memref.load %arg7[%c85] : memref<132xf32, #tpu.memory_space<smem>>
    %625 = vector.broadcast %624 : f32 to vector<8x64xf32>
    %626 = arith.mulf %619, %625 : vector<8x64xf32>
    %627 = arith.addf %603, %626 : vector<8x64xf32>
    %c86 = arith.constant 86 : index
    %628 = memref.load %arg7[%c86] : memref<132xf32, #tpu.memory_space<smem>>
    %629 = vector.broadcast %628 : f32 to vector<8x64xf32>
    %630 = arith.mulf %619, %629 : vector<8x64xf32>
    %631 = arith.addf %607, %630 : vector<8x64xf32>
    %c87 = arith.constant 87 : index
    %632 = memref.load %arg7[%c87] : memref<132xf32, #tpu.memory_space<smem>>
    %633 = vector.broadcast %632 : f32 to vector<8x64xf32>
    %634 = arith.mulf %619, %633 : vector<8x64xf32>
    %635 = arith.addf %611, %634 : vector<8x64xf32>
    %636 = vector.extract_strided_slice %23 {offsets = [0, 22], sizes = [8, 1], strides = [1, 1]} : vector<8x32xf32> to vector<8x1xf32>
    %637 = vector.broadcast %636 : vector<8x1xf32> to vector<8x64xf32>
    %638 = arith.mulf %2, %637 : vector<8x64xf32>
    %639 = vector.extract_strided_slice %103 {offsets = [0, 22], sizes = [8, 1], strides = [1, 1]} : vector<8x32xf32> to vector<8x1xf32>
    %640 = vector.broadcast %639 : vector<8x1xf32> to vector<8x64xf32>
    %641 = arith.addf %638, %640 : vector<8x64xf32>
    %cst_35 = arith.constant 0.000000e+00 : f32
    %642 = vector.broadcast %cst_35 : f32 to vector<8x64xf32>
    %643 = arith.maximumf %641, %642 : vector<8x64xf32>
    %c88 = arith.constant 88 : index
    %644 = memref.load %arg7[%c88] : memref<132xf32, #tpu.memory_space<smem>>
    %645 = vector.broadcast %644 : f32 to vector<8x64xf32>
    %646 = arith.mulf %643, %645 : vector<8x64xf32>
    %647 = arith.addf %623, %646 : vector<8x64xf32>
    %c89 = arith.constant 89 : index
    %648 = memref.load %arg7[%c89] : memref<132xf32, #tpu.memory_space<smem>>
    %649 = vector.broadcast %648 : f32 to vector<8x64xf32>
    %650 = arith.mulf %643, %649 : vector<8x64xf32>
    %651 = arith.addf %627, %650 : vector<8x64xf32>
    %c90 = arith.constant 90 : index
    %652 = memref.load %arg7[%c90] : memref<132xf32, #tpu.memory_space<smem>>
    %653 = vector.broadcast %652 : f32 to vector<8x64xf32>
    %654 = arith.mulf %643, %653 : vector<8x64xf32>
    %655 = arith.addf %631, %654 : vector<8x64xf32>
    %c91 = arith.constant 91 : index
    %656 = memref.load %arg7[%c91] : memref<132xf32, #tpu.memory_space<smem>>
    %657 = vector.broadcast %656 : f32 to vector<8x64xf32>
    %658 = arith.mulf %643, %657 : vector<8x64xf32>
    %659 = arith.addf %635, %658 : vector<8x64xf32>
    %660 = vector.extract_strided_slice %23 {offsets = [0, 23], sizes = [8, 1], strides = [1, 1]} : vector<8x32xf32> to vector<8x1xf32>
    %661 = vector.broadcast %660 : vector<8x1xf32> to vector<8x64xf32>
    %662 = arith.mulf %2, %661 : vector<8x64xf32>
    %663 = vector.extract_strided_slice %103 {offsets = [0, 23], sizes = [8, 1], strides = [1, 1]} : vector<8x32xf32> to vector<8x1xf32>
    %664 = vector.broadcast %663 : vector<8x1xf32> to vector<8x64xf32>
    %665 = arith.addf %662, %664 : vector<8x64xf32>
    %cst_36 = arith.constant 0.000000e+00 : f32
    %666 = vector.broadcast %cst_36 : f32 to vector<8x64xf32>
    %667 = arith.maximumf %665, %666 : vector<8x64xf32>
    %c92 = arith.constant 92 : index
    %668 = memref.load %arg7[%c92] : memref<132xf32, #tpu.memory_space<smem>>
    %669 = vector.broadcast %668 : f32 to vector<8x64xf32>
    %670 = arith.mulf %667, %669 : vector<8x64xf32>
    %671 = arith.addf %647, %670 : vector<8x64xf32>
    %c93 = arith.constant 93 : index
    %672 = memref.load %arg7[%c93] : memref<132xf32, #tpu.memory_space<smem>>
    %673 = vector.broadcast %672 : f32 to vector<8x64xf32>
    %674 = arith.mulf %667, %673 : vector<8x64xf32>
    %675 = arith.addf %651, %674 : vector<8x64xf32>
    %c94 = arith.constant 94 : index
    %676 = memref.load %arg7[%c94] : memref<132xf32, #tpu.memory_space<smem>>
    %677 = vector.broadcast %676 : f32 to vector<8x64xf32>
    %678 = arith.mulf %667, %677 : vector<8x64xf32>
    %679 = arith.addf %655, %678 : vector<8x64xf32>
    %c95 = arith.constant 95 : index
    %680 = memref.load %arg7[%c95] : memref<132xf32, #tpu.memory_space<smem>>
    %681 = vector.broadcast %680 : f32 to vector<8x64xf32>
    %682 = arith.mulf %667, %681 : vector<8x64xf32>
    %683 = arith.addf %659, %682 : vector<8x64xf32>
    %684 = vector.extract_strided_slice %23 {offsets = [0, 24], sizes = [8, 1], strides = [1, 1]} : vector<8x32xf32> to vector<8x1xf32>
    %685 = vector.broadcast %684 : vector<8x1xf32> to vector<8x64xf32>
    %686 = arith.mulf %2, %685 : vector<8x64xf32>
    %687 = vector.extract_strided_slice %103 {offsets = [0, 24], sizes = [8, 1], strides = [1, 1]} : vector<8x32xf32> to vector<8x1xf32>
    %688 = vector.broadcast %687 : vector<8x1xf32> to vector<8x64xf32>
    %689 = arith.addf %686, %688 : vector<8x64xf32>
    %cst_37 = arith.constant 0.000000e+00 : f32
    %690 = vector.broadcast %cst_37 : f32 to vector<8x64xf32>
    %691 = arith.maximumf %689, %690 : vector<8x64xf32>
    %c96 = arith.constant 96 : index
    %692 = memref.load %arg7[%c96] : memref<132xf32, #tpu.memory_space<smem>>
    %693 = vector.broadcast %692 : f32 to vector<8x64xf32>
    %694 = arith.mulf %691, %693 : vector<8x64xf32>
    %695 = arith.addf %671, %694 : vector<8x64xf32>
    %c97 = arith.constant 97 : index
    %696 = memref.load %arg7[%c97] : memref<132xf32, #tpu.memory_space<smem>>
    %697 = vector.broadcast %696 : f32 to vector<8x64xf32>
    %698 = arith.mulf %691, %697 : vector<8x64xf32>
    %699 = arith.addf %675, %698 : vector<8x64xf32>
    %c98 = arith.constant 98 : index
    %700 = memref.load %arg7[%c98] : memref<132xf32, #tpu.memory_space<smem>>
    %701 = vector.broadcast %700 : f32 to vector<8x64xf32>
    %702 = arith.mulf %691, %701 : vector<8x64xf32>
    %703 = arith.addf %679, %702 : vector<8x64xf32>
    %c99 = arith.constant 99 : index
    %704 = memref.load %arg7[%c99] : memref<132xf32, #tpu.memory_space<smem>>
    %705 = vector.broadcast %704 : f32 to vector<8x64xf32>
    %706 = arith.mulf %691, %705 : vector<8x64xf32>
    %707 = arith.addf %683, %706 : vector<8x64xf32>
    %708 = vector.extract_strided_slice %23 {offsets = [0, 25], sizes = [8, 1], strides = [1, 1]} : vector<8x32xf32> to vector<8x1xf32>
    %709 = vector.broadcast %708 : vector<8x1xf32> to vector<8x64xf32>
    %710 = arith.mulf %2, %709 : vector<8x64xf32>
    %711 = vector.extract_strided_slice %103 {offsets = [0, 25], sizes = [8, 1], strides = [1, 1]} : vector<8x32xf32> to vector<8x1xf32>
    %712 = vector.broadcast %711 : vector<8x1xf32> to vector<8x64xf32>
    %713 = arith.addf %710, %712 : vector<8x64xf32>
    %cst_38 = arith.constant 0.000000e+00 : f32
    %714 = vector.broadcast %cst_38 : f32 to vector<8x64xf32>
    %715 = arith.maximumf %713, %714 : vector<8x64xf32>
    %c100 = arith.constant 100 : index
    %716 = memref.load %arg7[%c100] : memref<132xf32, #tpu.memory_space<smem>>
    %717 = vector.broadcast %716 : f32 to vector<8x64xf32>
    %718 = arith.mulf %715, %717 : vector<8x64xf32>
    %719 = arith.addf %695, %718 : vector<8x64xf32>
    %c101 = arith.constant 101 : index
    %720 = memref.load %arg7[%c101] : memref<132xf32, #tpu.memory_space<smem>>
    %721 = vector.broadcast %720 : f32 to vector<8x64xf32>
    %722 = arith.mulf %715, %721 : vector<8x64xf32>
    %723 = arith.addf %699, %722 : vector<8x64xf32>
    %c102 = arith.constant 102 : index
    %724 = memref.load %arg7[%c102] : memref<132xf32, #tpu.memory_space<smem>>
    %725 = vector.broadcast %724 : f32 to vector<8x64xf32>
    %726 = arith.mulf %715, %725 : vector<8x64xf32>
    %727 = arith.addf %703, %726 : vector<8x64xf32>
    %c103 = arith.constant 103 : index
    %728 = memref.load %arg7[%c103] : memref<132xf32, #tpu.memory_space<smem>>
    %729 = vector.broadcast %728 : f32 to vector<8x64xf32>
    %730 = arith.mulf %715, %729 : vector<8x64xf32>
    %731 = arith.addf %707, %730 : vector<8x64xf32>
    %732 = vector.extract_strided_slice %23 {offsets = [0, 26], sizes = [8, 1], strides = [1, 1]} : vector<8x32xf32> to vector<8x1xf32>
    %733 = vector.broadcast %732 : vector<8x1xf32> to vector<8x64xf32>
    %734 = arith.mulf %2, %733 : vector<8x64xf32>
    %735 = vector.extract_strided_slice %103 {offsets = [0, 26], sizes = [8, 1], strides = [1, 1]} : vector<8x32xf32> to vector<8x1xf32>
    %736 = vector.broadcast %735 : vector<8x1xf32> to vector<8x64xf32>
    %737 = arith.addf %734, %736 : vector<8x64xf32>
    %cst_39 = arith.constant 0.000000e+00 : f32
    %738 = vector.broadcast %cst_39 : f32 to vector<8x64xf32>
    %739 = arith.maximumf %737, %738 : vector<8x64xf32>
    %c104 = arith.constant 104 : index
    %740 = memref.load %arg7[%c104] : memref<132xf32, #tpu.memory_space<smem>>
    %741 = vector.broadcast %740 : f32 to vector<8x64xf32>
    %742 = arith.mulf %739, %741 : vector<8x64xf32>
    %743 = arith.addf %719, %742 : vector<8x64xf32>
    %c105 = arith.constant 105 : index
    %744 = memref.load %arg7[%c105] : memref<132xf32, #tpu.memory_space<smem>>
    %745 = vector.broadcast %744 : f32 to vector<8x64xf32>
    %746 = arith.mulf %739, %745 : vector<8x64xf32>
    %747 = arith.addf %723, %746 : vector<8x64xf32>
    %c106 = arith.constant 106 : index
    %748 = memref.load %arg7[%c106] : memref<132xf32, #tpu.memory_space<smem>>
    %749 = vector.broadcast %748 : f32 to vector<8x64xf32>
    %750 = arith.mulf %739, %749 : vector<8x64xf32>
    %751 = arith.addf %727, %750 : vector<8x64xf32>
    %c107 = arith.constant 107 : index
    %752 = memref.load %arg7[%c107] : memref<132xf32, #tpu.memory_space<smem>>
    %753 = vector.broadcast %752 : f32 to vector<8x64xf32>
    %754 = arith.mulf %739, %753 : vector<8x64xf32>
    %755 = arith.addf %731, %754 : vector<8x64xf32>
    %756 = vector.extract_strided_slice %23 {offsets = [0, 27], sizes = [8, 1], strides = [1, 1]} : vector<8x32xf32> to vector<8x1xf32>
    %757 = vector.broadcast %756 : vector<8x1xf32> to vector<8x64xf32>
    %758 = arith.mulf %2, %757 : vector<8x64xf32>
    %759 = vector.extract_strided_slice %103 {offsets = [0, 27], sizes = [8, 1], strides = [1, 1]} : vector<8x32xf32> to vector<8x1xf32>
    %760 = vector.broadcast %759 : vector<8x1xf32> to vector<8x64xf32>
    %761 = arith.addf %758, %760 : vector<8x64xf32>
    %cst_40 = arith.constant 0.000000e+00 : f32
    %762 = vector.broadcast %cst_40 : f32 to vector<8x64xf32>
    %763 = arith.maximumf %761, %762 : vector<8x64xf32>
    %c108 = arith.constant 108 : index
    %764 = memref.load %arg7[%c108] : memref<132xf32, #tpu.memory_space<smem>>
    %765 = vector.broadcast %764 : f32 to vector<8x64xf32>
    %766 = arith.mulf %763, %765 : vector<8x64xf32>
    %767 = arith.addf %743, %766 : vector<8x64xf32>
    %c109 = arith.constant 109 : index
    %768 = memref.load %arg7[%c109] : memref<132xf32, #tpu.memory_space<smem>>
    %769 = vector.broadcast %768 : f32 to vector<8x64xf32>
    %770 = arith.mulf %763, %769 : vector<8x64xf32>
    %771 = arith.addf %747, %770 : vector<8x64xf32>
    %c110 = arith.constant 110 : index
    %772 = memref.load %arg7[%c110] : memref<132xf32, #tpu.memory_space<smem>>
    %773 = vector.broadcast %772 : f32 to vector<8x64xf32>
    %774 = arith.mulf %763, %773 : vector<8x64xf32>
    %775 = arith.addf %751, %774 : vector<8x64xf32>
    %c111 = arith.constant 111 : index
    %776 = memref.load %arg7[%c111] : memref<132xf32, #tpu.memory_space<smem>>
    %777 = vector.broadcast %776 : f32 to vector<8x64xf32>
    %778 = arith.mulf %763, %777 : vector<8x64xf32>
    %779 = arith.addf %755, %778 : vector<8x64xf32>
    %780 = vector.extract_strided_slice %23 {offsets = [0, 28], sizes = [8, 1], strides = [1, 1]} : vector<8x32xf32> to vector<8x1xf32>
    %781 = vector.broadcast %780 : vector<8x1xf32> to vector<8x64xf32>
    %782 = arith.mulf %2, %781 : vector<8x64xf32>
    %783 = vector.extract_strided_slice %103 {offsets = [0, 28], sizes = [8, 1], strides = [1, 1]} : vector<8x32xf32> to vector<8x1xf32>
    %784 = vector.broadcast %783 : vector<8x1xf32> to vector<8x64xf32>
    %785 = arith.addf %782, %784 : vector<8x64xf32>
    %cst_41 = arith.constant 0.000000e+00 : f32
    %786 = vector.broadcast %cst_41 : f32 to vector<8x64xf32>
    %787 = arith.maximumf %785, %786 : vector<8x64xf32>
    %c112 = arith.constant 112 : index
    %788 = memref.load %arg7[%c112] : memref<132xf32, #tpu.memory_space<smem>>
    %789 = vector.broadcast %788 : f32 to vector<8x64xf32>
    %790 = arith.mulf %787, %789 : vector<8x64xf32>
    %791 = arith.addf %767, %790 : vector<8x64xf32>
    %c113 = arith.constant 113 : index
    %792 = memref.load %arg7[%c113] : memref<132xf32, #tpu.memory_space<smem>>
    %793 = vector.broadcast %792 : f32 to vector<8x64xf32>
    %794 = arith.mulf %787, %793 : vector<8x64xf32>
    %795 = arith.addf %771, %794 : vector<8x64xf32>
    %c114 = arith.constant 114 : index
    %796 = memref.load %arg7[%c114] : memref<132xf32, #tpu.memory_space<smem>>
    %797 = vector.broadcast %796 : f32 to vector<8x64xf32>
    %798 = arith.mulf %787, %797 : vector<8x64xf32>
    %799 = arith.addf %775, %798 : vector<8x64xf32>
    %c115 = arith.constant 115 : index
    %800 = memref.load %arg7[%c115] : memref<132xf32, #tpu.memory_space<smem>>
    %801 = vector.broadcast %800 : f32 to vector<8x64xf32>
    %802 = arith.mulf %787, %801 : vector<8x64xf32>
    %803 = arith.addf %779, %802 : vector<8x64xf32>
    %804 = vector.extract_strided_slice %23 {offsets = [0, 29], sizes = [8, 1], strides = [1, 1]} : vector<8x32xf32> to vector<8x1xf32>
    %805 = vector.broadcast %804 : vector<8x1xf32> to vector<8x64xf32>
    %806 = arith.mulf %2, %805 : vector<8x64xf32>
    %807 = vector.extract_strided_slice %103 {offsets = [0, 29], sizes = [8, 1], strides = [1, 1]} : vector<8x32xf32> to vector<8x1xf32>
    %808 = vector.broadcast %807 : vector<8x1xf32> to vector<8x64xf32>
    %809 = arith.addf %806, %808 : vector<8x64xf32>
    %cst_42 = arith.constant 0.000000e+00 : f32
    %810 = vector.broadcast %cst_42 : f32 to vector<8x64xf32>
    %811 = arith.maximumf %809, %810 : vector<8x64xf32>
    %c116 = arith.constant 116 : index
    %812 = memref.load %arg7[%c116] : memref<132xf32, #tpu.memory_space<smem>>
    %813 = vector.broadcast %812 : f32 to vector<8x64xf32>
    %814 = arith.mulf %811, %813 : vector<8x64xf32>
    %815 = arith.addf %791, %814 : vector<8x64xf32>
    %c117 = arith.constant 117 : index
    %816 = memref.load %arg7[%c117] : memref<132xf32, #tpu.memory_space<smem>>
    %817 = vector.broadcast %816 : f32 to vector<8x64xf32>
    %818 = arith.mulf %811, %817 : vector<8x64xf32>
    %819 = arith.addf %795, %818 : vector<8x64xf32>
    %c118 = arith.constant 118 : index
    %820 = memref.load %arg7[%c118] : memref<132xf32, #tpu.memory_space<smem>>
    %821 = vector.broadcast %820 : f32 to vector<8x64xf32>
    %822 = arith.mulf %811, %821 : vector<8x64xf32>
    %823 = arith.addf %799, %822 : vector<8x64xf32>
    %c119 = arith.constant 119 : index
    %824 = memref.load %arg7[%c119] : memref<132xf32, #tpu.memory_space<smem>>
    %825 = vector.broadcast %824 : f32 to vector<8x64xf32>
    %826 = arith.mulf %811, %825 : vector<8x64xf32>
    %827 = arith.addf %803, %826 : vector<8x64xf32>
    %828 = vector.extract_strided_slice %23 {offsets = [0, 30], sizes = [8, 1], strides = [1, 1]} : vector<8x32xf32> to vector<8x1xf32>
    %829 = vector.broadcast %828 : vector<8x1xf32> to vector<8x64xf32>
    %830 = arith.mulf %2, %829 : vector<8x64xf32>
    %831 = vector.extract_strided_slice %103 {offsets = [0, 30], sizes = [8, 1], strides = [1, 1]} : vector<8x32xf32> to vector<8x1xf32>
    %832 = vector.broadcast %831 : vector<8x1xf32> to vector<8x64xf32>
    %833 = arith.addf %830, %832 : vector<8x64xf32>
    %cst_43 = arith.constant 0.000000e+00 : f32
    %834 = vector.broadcast %cst_43 : f32 to vector<8x64xf32>
    %835 = arith.maximumf %833, %834 : vector<8x64xf32>
    %c120 = arith.constant 120 : index
    %836 = memref.load %arg7[%c120] : memref<132xf32, #tpu.memory_space<smem>>
    %837 = vector.broadcast %836 : f32 to vector<8x64xf32>
    %838 = arith.mulf %835, %837 : vector<8x64xf32>
    %839 = arith.addf %815, %838 : vector<8x64xf32>
    %c121 = arith.constant 121 : index
    %840 = memref.load %arg7[%c121] : memref<132xf32, #tpu.memory_space<smem>>
    %841 = vector.broadcast %840 : f32 to vector<8x64xf32>
    %842 = arith.mulf %835, %841 : vector<8x64xf32>
    %843 = arith.addf %819, %842 : vector<8x64xf32>
    %c122 = arith.constant 122 : index
    %844 = memref.load %arg7[%c122] : memref<132xf32, #tpu.memory_space<smem>>
    %845 = vector.broadcast %844 : f32 to vector<8x64xf32>
    %846 = arith.mulf %835, %845 : vector<8x64xf32>
    %847 = arith.addf %823, %846 : vector<8x64xf32>
    %c123 = arith.constant 123 : index
    %848 = memref.load %arg7[%c123] : memref<132xf32, #tpu.memory_space<smem>>
    %849 = vector.broadcast %848 : f32 to vector<8x64xf32>
    %850 = arith.mulf %835, %849 : vector<8x64xf32>
    %851 = arith.addf %827, %850 : vector<8x64xf32>
    %852 = vector.extract_strided_slice %23 {offsets = [0, 31], sizes = [8, 1], strides = [1, 1]} : vector<8x32xf32> to vector<8x1xf32>
    %853 = vector.broadcast %852 : vector<8x1xf32> to vector<8x64xf32>
    %854 = arith.mulf %2, %853 : vector<8x64xf32>
    %855 = vector.extract_strided_slice %103 {offsets = [0, 31], sizes = [8, 1], strides = [1, 1]} : vector<8x32xf32> to vector<8x1xf32>
    %856 = vector.broadcast %855 : vector<8x1xf32> to vector<8x64xf32>
    %857 = arith.addf %854, %856 : vector<8x64xf32>
    %cst_44 = arith.constant 0.000000e+00 : f32
    %858 = vector.broadcast %cst_44 : f32 to vector<8x64xf32>
    %859 = arith.maximumf %857, %858 : vector<8x64xf32>
    %c124 = arith.constant 124 : index
    %860 = memref.load %arg7[%c124] : memref<132xf32, #tpu.memory_space<smem>>
    %861 = vector.broadcast %860 : f32 to vector<8x64xf32>
    %862 = arith.mulf %859, %861 : vector<8x64xf32>
    %863 = arith.addf %839, %862 : vector<8x64xf32>
    %c125 = arith.constant 125 : index
    %864 = memref.load %arg7[%c125] : memref<132xf32, #tpu.memory_space<smem>>
    %865 = vector.broadcast %864 : f32 to vector<8x64xf32>
    %866 = arith.mulf %859, %865 : vector<8x64xf32>
    %867 = arith.addf %843, %866 : vector<8x64xf32>
    %c126 = arith.constant 126 : index
    %868 = memref.load %arg7[%c126] : memref<132xf32, #tpu.memory_space<smem>>
    %869 = vector.broadcast %868 : f32 to vector<8x64xf32>
    %870 = arith.mulf %859, %869 : vector<8x64xf32>
    %871 = arith.addf %847, %870 : vector<8x64xf32>
    %c127 = arith.constant 127 : index
    %872 = memref.load %arg7[%c127] : memref<132xf32, #tpu.memory_space<smem>>
    %873 = vector.broadcast %872 : f32 to vector<8x64xf32>
    %874 = arith.mulf %859, %873 : vector<8x64xf32>
    %875 = arith.addf %851, %874 : vector<8x64xf32>
    %c128 = arith.constant 128 : index
    %876 = memref.load %arg7[%c128] : memref<132xf32, #tpu.memory_space<smem>>
    %877 = vector.broadcast %876 : f32 to vector<8x64xf32>
    %878 = arith.addf %863, %877 : vector<8x64xf32>
    %c129 = arith.constant 129 : index
    %879 = memref.load %arg7[%c129] : memref<132xf32, #tpu.memory_space<smem>>
    %880 = vector.broadcast %879 : f32 to vector<8x64xf32>
    %881 = arith.addf %867, %880 : vector<8x64xf32>
    %c130 = arith.constant 130 : index
    %882 = memref.load %arg7[%c130] : memref<132xf32, #tpu.memory_space<smem>>
    %883 = vector.broadcast %882 : f32 to vector<8x64xf32>
    %884 = arith.addf %871, %883 : vector<8x64xf32>
    %c131 = arith.constant 131 : index
    %885 = memref.load %arg7[%c131] : memref<132xf32, #tpu.memory_space<smem>>
    %886 = vector.broadcast %885 : f32 to vector<8x64xf32>
    %887 = arith.addf %875, %886 : vector<8x64xf32>
    %cst_45 = arith.constant 0.000000e+00 : f32
    %888 = vector.broadcast %cst_45 : f32 to vector<8x64xf32>
    %889 = arith.maximumf %887, %888 : vector<8x64xf32>
    %c0_46 = arith.constant 0 : index
    %c0_47 = arith.constant 0 : index
    %890 = vector.load %arg4[%c0_46, %c0_47] : memref<8x64xf32, #tpu.memory_space<vmem>>, vector<8x64xf32>
    %cst_48 = arith.constant 0.000000e+00 : f32
    %891 = vector.broadcast %cst_48 : f32 to vector<8x64xf32>
    %892 = arith.subf %891, %890 : vector<8x64xf32>
    %893 = arith.mulf %892, %889 : vector<8x64xf32>
    %894 = math.exp %893 : vector<8x64xf32>
    %cst_49 = arith.constant 1.000000e+00 : f32
    %895 = vector.broadcast %cst_49 : f32 to vector<8x64xf32>
    %896 = arith.subf %895, %894 : vector<8x64xf32>
    %cst_50 = arith.constant 1.000000e+00 : f32
    %897 = vector.broadcast %cst_50 : f32 to vector<8x64xf32>
    %898 = arith.subf %897, %896 : vector<8x64xf32>
    %cst_51 = arith.constant 1.000000e-10 : f32
    %899 = vector.broadcast %cst_51 : f32 to vector<8x64xf32>
    %900 = arith.addf %898, %899 : vector<8x64xf32>
    %901 = math.log %900 : vector<8x64xf32>
    %902 = tpu.iota {dimensions = array<i32: 0>} : vector<64x64xi32>
    %903 = tpu.iota {dimensions = array<i32: 1>} : vector<64x64xi32>
    %904 = arith.cmpi slt, %902, %903 : vector<64x64xi32>
    %cst_52 = arith.constant 1.000000e+00 : f32
    %cst_53 = arith.constant 0.000000e+00 : f32
    %905 = vector.broadcast %cst_52 : f32 to vector<64x64xf32>
    %906 = vector.broadcast %cst_53 : f32 to vector<64x64xf32>
    %907 = arith.select %904, %905, %906 : vector<64x64xi1>, vector<64x64xf32>
    %cst_54 = arith.constant dense<0.000000e+00> : vector<8x64xf32>
    %908 = tpu.matmul %901, %907, %cst_54 {dimension_numbers = #tpu.dot_dimension_numbers<[1], [0], [0], [1], [0, 0, 1, 1], [], []>} : vector<8x64xf32>, vector<64x64xf32>, vector<8x64xf32> -> vector<8x64xf32>
    %909 = math.exp %908 : vector<8x64xf32>
    %910 = arith.mulf %896, %909 : vector<8x64xf32>
    %c0_55 = arith.constant 0 : index
    %c0_56 = arith.constant 0 : index
    %911 = vector.load %arg8[%c0_55, %c0_56] : memref<8x64xf32, #tpu.memory_space<vmem>>, vector<8x64xf32>
    tpu.vector_store %arg8[%c0_55, %c0_56], %910 {strides = array<i32>} : memref<8x64xf32, #tpu.memory_space<vmem>>, vector<8x64xf32>,
    %912 = arith.mulf %910, %878 : vector<8x64xf32>
    %cst_57 = arith.constant dense<0.000000e+00> : vector<8xf32>
    %913 = vector.multi_reduction <add>, %912, %cst_57 [1] : vector<8x64xf32> to vector<8xf32>
    %914 = vector.shape_cast %913 : vector<8xf32> to vector<8x1xf32>
    %c0_58 = arith.constant 0 : index
    %c0_59 = arith.constant 0 : index
    %915 = vector.load %arg9[%c0_58, %c0_59] : memref<8x8xf32, #tpu.memory_space<vmem>>, vector<8x1xf32>
    tpu.vector_store %arg9[%c0_58, %c0_59], %914 {strides = array<i32>} : memref<8x8xf32, #tpu.memory_space<vmem>>, vector<8x1xf32>,
    %916 = arith.mulf %910, %881 : vector<8x64xf32>
    %cst_60 = arith.constant dense<0.000000e+00> : vector<8xf32>
    %917 = vector.multi_reduction <add>, %916, %cst_60 [1] : vector<8x64xf32> to vector<8xf32>
    %918 = vector.shape_cast %917 : vector<8xf32> to vector<8x1xf32>
    %c0_61 = arith.constant 0 : index
    %c1_62 = arith.constant 1 : index
    %919 = vector.load %arg9[%c0_61, %c1_62] : memref<8x8xf32, #tpu.memory_space<vmem>>, vector<8x1xf32>
    tpu.vector_store %arg9[%c0_61, %c1_62], %918 {strides = array<i32>} : memref<8x8xf32, #tpu.memory_space<vmem>>, vector<8x1xf32>,
    %920 = arith.mulf %910, %884 : vector<8x64xf32>
    %cst_63 = arith.constant dense<0.000000e+00> : vector<8xf32>
    %921 = vector.multi_reduction <add>, %920, %cst_63 [1] : vector<8x64xf32> to vector<8xf32>
    %922 = vector.shape_cast %921 : vector<8xf32> to vector<8x1xf32>
    %c0_64 = arith.constant 0 : index
    %c2_65 = arith.constant 2 : index
    %923 = vector.load %arg9[%c0_64, %c2_65] : memref<8x8xf32, #tpu.memory_space<vmem>>, vector<8x1xf32>
    tpu.vector_store %arg9[%c0_64, %c2_65], %922 {strides = array<i32>} : memref<8x8xf32, #tpu.memory_space<vmem>>, vector<8x1xf32>,
    %924 = arith.mulf %910, %2 : vector<8x64xf32>
    %cst_66 = arith.constant dense<0.000000e+00> : vector<8xf32>
    %925 = vector.multi_reduction <add>, %924, %cst_66 [1] : vector<8x64xf32> to vector<8xf32>
    %926 = vector.shape_cast %925 : vector<8xf32> to vector<8x1xf32>
    %c0_67 = arith.constant 0 : index
    %c3_68 = arith.constant 3 : index
    %927 = vector.load %arg9[%c0_67, %c3_68] : memref<8x8xf32, #tpu.memory_space<vmem>>, vector<8x1xf32>
    tpu.vector_store %arg9[%c0_67, %c3_68], %926 {strides = array<i32>} : memref<8x8xf32, #tpu.memory_space<vmem>>, vector<8x1xf32>,
    %cst_69 = arith.constant dense<0.000000e+00> : vector<8xf32>
    %928 = vector.multi_reduction <add>, %910, %cst_69 [1] : vector<8x64xf32> to vector<8xf32>
    %929 = vector.shape_cast %928 : vector<8xf32> to vector<8x1xf32>
    %c0_70 = arith.constant 0 : index
    %c4_71 = arith.constant 4 : index
    %930 = vector.load %arg9[%c0_70, %c4_71] : memref<8x8xf32, #tpu.memory_space<vmem>>, vector<8x1xf32>
    tpu.vector_store %arg9[%c0_70, %c4_71], %929 {strides = array<i32>} : memref<8x8xf32, #tpu.memory_space<vmem>>, vector<8x1xf32>,
    %cst_72 = arith.constant 0.000000e+00 : f32
    %931 = vector.broadcast %cst_72 : f32 to vector<8x3xf32>
    %c0_73 = arith.constant 0 : index
    %c5_74 = arith.constant 5 : index
    %932 = vector.load %arg9[%c0_73, %c5_74] : memref<8x8xf32, #tpu.memory_space<vmem>>, vector<8x3xf32>
    tpu.vector_store %arg9[%c0_73, %c5_74], %931 {strides = array<i32>} : memref<8x8xf32, #tpu.memory_space<vmem>>, vector<8x3xf32>,
    return
  }
  func.func @transform_0(%arg0: i32) -> (i32, i32) {
    %c0_i32 = arith.constant 0 : i32
    %c0_i32_0 = arith.constant 0 : i32
    return %arg0, %c0_i32 : i32, i32
  }
  func.func @transform_1(%arg0: i32) -> (i32, i32) {
    %c0_i32 = arith.constant 0 : i32
    %c0_i32_0 = arith.constant 0 : i32
    return %arg0, %c0_i32 : i32, i32
  }
  func.func @transform_2(%arg0: i32) -> (i32, i32) {
    %c0_i32 = arith.constant 0 : i32
    %c0_i32_0 = arith.constant 0 : i32
    return %arg0, %c0_i32 : i32, i32
  }
  func.func @transform_3(%arg0: i32) -> (i32, i32) {
    %c0_i32 = arith.constant 0 : i32
    %c0_i32_0 = arith.constant 0 : i32
    return %arg0, %c0_i32 : i32, i32
  }
  func.func @transform_4(%arg0: i32) -> (i32, i32) {
    %c0_i32 = arith.constant 0 : i32
    %c0_i32_0 = arith.constant 0 : i32
    %c0_i32_1 = arith.constant 0 : i32
    return %c0_i32, %c0_i32_0 : i32, i32
  }
  func.func @transform_5(%arg0: i32) -> (i32, i32) {
    %c0_i32 = arith.constant 0 : i32
    %c0_i32_0 = arith.constant 0 : i32
    %c0_i32_1 = arith.constant 0 : i32
    return %c0_i32, %c0_i32_0 : i32, i32
  }
  func.func @transform_6(%arg0: i32) -> i32 {
    %c0_i32 = arith.constant 0 : i32
    %c0_i32_0 = arith.constant 0 : i32
    return %c0_i32 : i32
  }
  func.func @transform_7(%arg0: i32) -> (i32, i32) {
    %c0_i32 = arith.constant 0 : i32
    %c0_i32_0 = arith.constant 0 : i32
    return %arg0, %c0_i32 : i32, i32
  }
  func.func @transform_8(%arg0: i32) -> (i32, i32) {
    %c0_i32 = arith.constant 0 : i32
    %c0_i32_0 = arith.constant 0 : i32
    return %arg0, %c0_i32 : i32, i32
  }
}

</mosaic_0001>

<bundles_post_ra>
// kernel: tpu_custom_call.1
= control target key start
LH: loop header
LB: loop body
LE: loop exit
PB: predicated region body
PF: predicated region fallthrough
CT: control target
= control target key end

     0   :  { %s2758_s0 = inlined_call_operand.hbm [shape: f32[8,8], index: 0, kind: input, shape index: {}]   ;;  %s2759_s1 = inlined_call_operand.hbm [shape: f32[8,8], index: 1, kind: input, shape index: {}]   ;;  %s2760_s2 = inlined_call_operand.hbm [shape: f32[8,64], index: 2, kind: input, shape index: {}]   ;;  %s2761_s3 = inlined_call_operand.vmem [shape: f32[8,64], index: 3, kind: input, shape index: {}]   ;;  %s2762_s4 = inlined_call_operand.hbm [shape: f32[14,32], index: 4, kind: input, shape index: {}]   ;;  %s2763_s5 = inlined_call_operand.vmem [shape: f32[1,32], index: 5, kind: input, shape index: {}]   ;;  %s2764_s6 = inlined_call_operand.vmem [shape: f32[132], index: 6, kind: input, shape index: {}]   ;;  %s2765_s7 = inlined_call_operand.hbm [shape: f32[8,64], index: 7, kind: output, shape index: {0}]   ;;  %s2766_s8 = inlined_call_operand.hbm [shape: f32[8,8], index: 8, kind: output, shape index: {1}]  }
   0x1   :  { %2797 = sst [smem:[#allocation54_spill]] %s2761_s3 }
   0x2   :  { %2798 = sst [smem:[#allocation55_spill]] %s2765_s7 }
   0x3   :  { %2799 = sst [smem:[#allocation56_spill]] %s2766_s8 }
   0x4   :  { %14 = vsyncpa [#allocation3], 0 }
   0x5   :  { %15 = vsyncpa [#allocation7], 0 }
   0x6   :  { %16 = vsyncpa [#allocation10], 0 }
   0x7   :  { %17 = vsyncpa [#allocation5], 0 }
   0x8   :  { %18 = vsyncpa [#allocation4], 0 }
   0x9   :  { %19 = vsyncpa [#allocation14], 0  ;;  %s1771_s27 = smov [#allocation6]   ;;  %s1772_s29 = smov [#allocation2]  }
   0xa   :  { %s36_s28 = sshll.u32 %s1771_s27, 4  ;;  %s26_s30 = sshll.u32 %s1772_s29, 4  ;;  %s37_s28 = int_to_ptr.vmem [resolvable:$true] %s36_s28  ;;  %s27_s30 = int_to_ptr.vmem [resolvable:$true] %s26_s30 }
   0xb   :  { %s1615_s11 = scalar_lea.hbm %s2759_s1, 128 }
   0xc   :  { %p1616_p0 = scmp.ne.s32.totalorder %s2759_s1, %s1615_s11  ;;  %p1619_p1 = scmp.lt.u32.totalorder %s1615_s11, %s2759_s1 }
   0xe   :  { %p1621_p2 = pnand %p1619_p1, %p1616_p0 }
  0x10   :  { %1624 = shalt.err (!%p1621_p2)
}
  0x11   :  { %s1625_s16 = scalar_lea.vmem %s37_s28, 128  ;;  %p1630_p4 = scmp.lt.s32.totalorder %s37_s28, %s37_s28 }
  0x12   :  { %p1626_p3 = scmp.ne.s32.totalorder %s37_s28, %s1625_s16  ;;  %p1631_p5 = scmp.lt.s32.totalorder %s1625_s16, %s1625_s16 }
  0x14   :  { %p1632_p6 = por %p1631_p5, %p1630_p4 }
  0x16   :  { %p1633_p7 = pnand %p1632_p6, %p1626_p3 }
  0x18   :  { %1636 = shalt.err (!%p1633_p7)
}
  0x19   :  { %39 = dma.hbm_to_vmem [thread:$0]  %s2759_s1, 128, %s37_s28, [#allocation7]  }
  0x1a   :  { %s1637_s21 = scalar_lea.hbm %s2758_s0, 128 }
  0x1b   :  { %p1638_p8 = scmp.ne.s32.totalorder %s2758_s0, %s1637_s21  ;;  %p1641_p9 = scmp.lt.u32.totalorder %s1637_s21, %s2758_s0 }
  0x1d   :  { %p1643_p10 = pnand %p1641_p9, %p1638_p8 }
  0x1f   :  { %1646 = shalt.err (!%p1643_p10)
}
  0x20   :  { %s1647_s26 = scalar_lea.vmem %s27_s30, 128  ;;  %p1652_p12 = scmp.lt.s32.totalorder %s27_s30, %s27_s30 }
  0x21   :  { %p1648_p11 = scmp.ne.s32.totalorder %s27_s30, %s1647_s26  ;;  %p1653_p13 = scmp.lt.s32.totalorder %s1647_s26, %s1647_s26 }
  0x23   :  { %p1654_p0 = por %p1653_p13, %p1652_p12 }
  0x25   :  { %p1655_p1 = pnand %p1654_p0, %p1648_p11 }
  0x27   :  { %1658 = shalt.err (!%p1655_p1)
}
  0x28   :  { %29 = dma.hbm_to_vmem [thread:$0]  %s2758_s0, 128, %s27_s30, [#allocation3]  }
  0x29   :  { %s1773_s28 = smov [#allocation8]   ;;  %s1774_s9 = smov [#allocation9]  }
  0x2a   :  { %s46_s29 = sshll.u32 %s1773_s28, 4  ;;  %s57_s10 = sshll.u32 %s1774_s9, 4  ;;  %s47_s29 = int_to_ptr.vmem [resolvable:$true] %s46_s29  ;;  %s1885_s10 = int_to_ptr.vmem [resolvable:$true] %s57_s10 }
  0x2b   :  { %s1659_s13 = scalar_lea.hbm %s2760_s2, 128 }
  0x2c   :  { %p1660_p2 = scmp.ne.s32.totalorder %s2760_s2, %s1659_s13  ;;  %p1663_p3 = scmp.lt.u32.totalorder %s1659_s13, %s2760_s2 }
  0x2e   :  { %p1665_p4 = pnand %p1663_p3, %p1660_p2 }
  0x30   :  { %1668 = shalt.err (!%p1665_p4)
}
  0x31   :  { %s1669_s0 = scalar_lea.vmem %s47_s29, 128  ;;  %p1674_p6 = scmp.lt.s32.totalorder %s47_s29, %s47_s29 }
  0x32   :  { %p1670_p5 = scmp.ne.s32.totalorder %s47_s29, %s1669_s0  ;;  %p1675_p7 = scmp.lt.s32.totalorder %s1669_s0, %s1669_s0 }
  0x34   :  { %p1676_p8 = por %p1675_p7, %p1674_p6 }
  0x36   :  { %p1677_p9 = pnand %p1676_p8, %p1670_p5 }
  0x38   :  { %1680 = shalt.err (!%p1677_p9)
}
  0x39   :  { %49 = dma.hbm_to_vmem [thread:$0]  %s2760_s2, 128, %s47_s29, [#allocation7]  }
  0x3a   :  { %s1681_s21 = scalar_lea.hbm %s2762_s4, 256 }
  0x3b   :  { %p1682_p10 = scmp.ne.s32.totalorder %s2762_s4, %s1681_s21  ;;  %p1685_p11 = scmp.lt.u32.totalorder %s1681_s21, %s2762_s4 }
  0x3d   :  { %p1687_p12 = pnand %p1685_p11, %p1682_p10 }
  0x3f   :  { %1690 = shalt.err (!%p1687_p12)
}
  0x40   :  { %s1691_s26 = scalar_lea.vmem %s1885_s10, 256  ;;  %p1696_p0 = scmp.lt.s32.totalorder %s1885_s10, %s1885_s10 }
  0x41   :  { %p1692_p13 = scmp.ne.s32.totalorder %s1885_s10, %s1691_s26  ;;  %p1697_p1 = scmp.lt.s32.totalorder %s1691_s26, %s1691_s26 }
  0x43   :  { %p1698_p2 = por %p1697_p1, %p1696_p0 }
  0x45   :  { %p1699_p3 = pnand %p1698_p2, %p1692_p13 }
  0x47   :  { %1702 = shalt.err (!%p1699_p3)
}
  0x48   :  { %s1775_s2 = smov 128   ;;  %s1776_s1 = smov 8  }
  0x49   :  { %63 = dma.hbm_to_vmem [thread:$0]  %s2762_s4, 256, %s1885_s10, [#allocation10], %s1775_s2, %s1775_s2, %s1776_s1  }
  0x4a   :  { %s72_s11 = sshll.u32 %s2764_s6, 4  ;;  %s73_s11 = int_to_ptr.vmem [resolvable:$true] %s72_s11 }
  0x4b   :  { %s1703_s12 = scalar_lea.vmem %s73_s11, 32  ;;  %p1708_p5 = scmp.lt.s32.totalorder %s73_s11, %s73_s11 }
  0x4c   :  { %p1704_p4 = scmp.ne.s32.totalorder %s73_s11, %s1703_s12  ;;  %p1709_p6 = scmp.lt.s32.totalorder %s1703_s12, %s1703_s12 }
  0x4e   :  { %p1710_p7 = por %p1709_p6, %p1708_p5 }
  0x50   :  { %p1711_p8 = pnand %p1710_p7, %p1704_p4 }
  0x52   :  { %1714 = shalt.err (!%p1711_p8)
}
  0x53   :  { %s1777_s13 = smov [#allocation11]  }
  0x54   :  { %75 = dma.vmem_to_smem %s73_s11, 32, %s1777_s13, [#allocation5]  }
  0x55   :  { %1759 = dma.done.wait [#allocation3], 128  }
  0x56   :  { %1760 = vsyncadd [#allocation3], 4294967168 }
  0x57   :  { %1761 = dma.done.wait [#allocation7], 256  }
  0x58   :  { %1762 = vsyncadd [#allocation7], 4294967040 }
  0x59   :  { %1763 = dma.done.wait [#allocation10], 256  }
  0x5a   :  { %1764 = vsyncadd [#allocation10], 4294967040 }
  0x5b   :  { %1765 = dma.done.wait [#allocation5], 32  }
  0x5c   :  { %1766 = vsyncadd [#allocation5], 4294967264 }
  0x5d   :  { %91 = sfence }
  0x5e   :  { %v92_v0 = vld [vmem:[#allocation2] sm:$0xff]  ;;  %v1778_v1 = vmov 2   ;;  %v1779_v2 = vmov 1   ;;  %v93_v3 = vld [vmem:[#allocation6] sm:$0xff]  ;;  %v1780_v4 = vmov 3   ;;  %v1781_v5 = vmov 4  }
  0x5f   :  { %1535 = vset.pattern.permute.xlu1 %v1778_v1  ;;  %1534 = vset.pattern.permute.xlu0 %v1779_v2  ;;  %v1782_v6 = vmov 5   ;;  %v1783_v7 = vmov 0   ;;  %v1784_v8 = vmov 6   ;;  %v1785_v9 = vmov 7   ;;  %v95_v19 = vld [vmem:[#allocation9] sm:$0xff]  ;;  %s2092_s10 = sld [smem:[#allocation11 + $0x5]] }
  0x60   :  { %147 = vperm.xlu1 %1535, %v92_v0   ;;  %141 = vperm.xlu0 %1534, %v92_v0   ;;  %v102_v10 = vlaneseq  ;;  %v1308_v33 = vld [vmem:[%s2763_s5] ss:$0 sm:$0xff]  ;;  %v1786_v60 = vmov 9   ;;  %s2090_s5 = sld [smem:[#allocation11 + $0x4]]  ;;  %s2094_s14 = sld [smem:[#allocation11 + $0x6]]  ;;  %vm1812_vm11 = vmmov 0  }
  0x61   :  { %v96_v51 = vld [vmem:[#allocation9 + $0x8] sm:$0x3f]  ;;  %s2096_s15 = sld [smem:[#allocation11 + $0x7]]  ;;  %s2098_s16 = sld [smem:[#allocation11 + $0x10]]  ;;  %vm1167_vm13 = vcmask 523264  }
  0x62   :  { %v1934_v13 = vshrl.u32 %v102_v10, 7  ;;  %s2100_s17 = sld [smem:[#allocation11 + $0x11]]  ;;  %s2106_s0 = sld [smem:[#allocation11 + $0x12]] }
  0x63   :  { %s2108_s30 = sld [smem:[#allocation11 + $0x13]]  ;;  %s2111_s18 = sld [smem:[#allocation11 + $0x1c]] }
  0x64   :  { %1536 = vset.pattern.permute.xlu1 %v1780_v4  ;;  %1540 = vset.pattern.permute.xlu0 %v1778_v1  ;;  %v104_v14 = vsub.s32 0, %v1934_v13  ;;  %v123_v15 = vsub.s32 2, %v1934_v13  ;;  %v113_v16 = vsub.s32 1, %v1934_v13  ;;  %v154_v31 = vsub.s32 3, %v1934_v13  ;;  %s2113_s19 = sld [smem:[#allocation11 + $0x1d]]  ;;  %s2116_s20 = sld [smem:[#allocation11 + $0x1e]] }
  0x65   :  { %99 = vperm.xlu1 %1536, %v92_v0   ;;  %192 = vperm.xlu0 %1540, %v93_v3   ;;  %v160_v35 = vsub.s32 4, %v1934_v13  ;;  %v166_v37 = vsub.s32 5, %v1934_v13  ;;  %v177_v41 = vsub.s32 6, %v1934_v13  ;;  %v187_v45 = vsub.s32 7, %v1934_v13  ;;  %2800 = sst [smem:[#allocation21_spill]] %s2092_s10  ;;  %s2118_s21 = sld [smem:[#allocation11 + $0x1f]] }
  0x66   :  { %v105_v20 = vrot.slane %v95_v19, %v104_v14  ;;  %v124_v21 = vrot.slane %v95_v19, %v123_v15  ;;  %v114_v22 = vrot.slane %v95_v19, %v113_v16  ;;  %v155_v39 = vrot.slane %v95_v19, %v154_v31  ;;  %2801 = sst [smem:[#allocation22_spill]] %s2094_s14  ;;  %s2120_s22 = sld [smem:[#allocation11 + $0x28]] }
  0x67   :  { %v161_v43 = vrot.slane %v95_v19, %v160_v35  ;;  %v167_v47 = vrot.slane %v95_v19, %v166_v37  ;;  %v178_v50 = vrot.slane %v95_v19, %v177_v41  ;;  %v188_v54 = vrot.slane %v95_v19, %v187_v45  ;;  %2802 = sst [smem:[#allocation23_spill]] %s2096_s15  ;;  %s2122_s23 = sld [smem:[#allocation11 + $0x29]] }
  0x68   :  { %v198_v59 = vrot.slane %v96_v51, %v104_v14  ;;  %v208_v63 = vrot.slane %v96_v51, %v113_v16  ;;  %v1787_v14 = vmov 12   ;;  %v1796_v41 = vmov 16   ;;  %2803 = sst [smem:[#allocation24_spill]] %s2098_s16  ;;  %s2126_s24 = sld [smem:[#allocation11 + $0x2a]] }
  0x69   :  { %1537 = vset.pattern.permute.xlu1 %v1781_v5  ;;  %1541 = vset.pattern.permute.xlu0 %v1782_v6  ;;  %v1803_v45 = vmov 25   ;;  %2804 = sst [smem:[#allocation25_spill]] %s2100_s17  ;;  %s2128_s25 = sld [smem:[#allocation11 + $0x2b]] }
  0x6a   :  { %108 = vperm.xlu1 %1537, %v92_v0   ;;  %118 = vperm.xlu0 %1541, %v92_v0   ;;  %2805 = sst [smem:[#allocation26_spill]] %s2106_s0  ;;  %s2131_s26 = sld [smem:[#allocation11 + $0x34]] }
  0x6b   :  { %2806 = sst [smem:[#allocation27_spill]] %s2108_s30  ;;  %s2133_s2 = sld [smem:[#allocation11 + $0x35]] }
  0x6c   :  { %2807 = sst [smem:[#allocation28_spill]] %s2111_s18  ;;  %s2138_s1 = sld [smem:[#allocation11 + $0x36]] }
  0x6d   :  { %2808 = sst [smem:[#allocation29_spill]] %s2113_s19  ;;  %s2140_s27 = sld [smem:[#allocation11 + $0x37]] }
  0x6e   :  { %222 = vperm.xlu0 %1541, %v93_v3   ;;  %1538 = vset.pattern.permute.xlu1 %v1783_v7  ;;  %2809 = sst [smem:[#allocation30_spill]] %s2116_s20  ;;  %s2142_s28 = sld [smem:[#allocation11 + $0x40]] }
  0x6f   :  { %172 = vperm.xlu1 %1538, %v93_v3   ;;  %2810 = sst [smem:[#allocation31_spill]] %s2118_s21  ;;  %s2144_s29 = sld [smem:[#allocation11 + $0x41]] }
  0x70   :  { %2811 = sst [smem:[#allocation32_spill]] %s2120_s22  ;;  %s2146_s9 = sld [smem:[#allocation11 + $0x42]] }
  0x71   :  { %2812 = sst [smem:[#allocation33_spill]] %s2122_s23  ;;  %s2148_s11 = sld [smem:[#allocation11 + $0x43]] }
  0x72   :  { %1544 = vset.pattern.permute.xlu0 %v1783_v7  ;;  %2813 = sst [smem:[#allocation34_spill]] %s2126_s24  ;;  %s2152_s12 = sld [smem:[#allocation11 + $0x4c]] }
  0x73   :  { %129 = vperm.xlu0 %1544, %v92_v0   ;;  %1539 = vset.pattern.permute.xlu1 %v1779_v2  ;;  %2814 = sst [smem:[#allocation35_spill]] %s2128_s25  ;;  %s2154_s13 = sld [smem:[#allocation11 + $0x4d]] }
  0x74   :  { %182 = vperm.xlu1 %1539, %v93_v3   ;;  %2815 = sst [smem:[#allocation36_spill]] %s2131_s26  ;;  %s2156_s4 = sld [smem:[#allocation11 + $0x4e]] }
  0x75   :  { %2816 = sst [smem:[#allocation37_spill]] %s2133_s2  ;;  %s2158_s6 = sld [smem:[#allocation11 + $0x4f]] }
  0x76   :  { %2817 = sst [smem:[#allocation38_spill]] %s2138_s1  ;;  %s2161_s8 = sld [smem:[#allocation11 + $0x58]] }
  0x77   :  { %2818 = sst [smem:[#allocation39_spill]] %s2142_s28  ;;  %s2163_s7 = sld [smem:[#allocation11 + $0x59]] }
  0x78   :  { %1542 = vset.pattern.permute.xlu1 %v1780_v4  ;;  %2819 = sst [smem:[#allocation40_spill]] %s2144_s29  ;;  %s2167_s3 = sld [smem:[#allocation11 + $0x5a]] }
  0x79   :  { %202 = vperm.xlu1 %1542, %v93_v3   ;;  %2820 = sst [smem:[#allocation41_spill]] %s2146_s9  ;;  %s2216_s18 = sld [smem:[#allocation11 + $0x15]] }
  0x7a   :  { %2821 = sst [smem:[#allocation42_spill]] %s2148_s11  ;;  %s2218_s20 = sld [smem:[#allocation11 + $0x16]] }
  0x7b   :  { %2822 = sst [smem:[#allocation43_spill]] %s2152_s12  ;;  %s2177_s12 = sld [smem:[#allocation11 + $0x3]] }
  0x7c   :  { %2823 = sst [smem:[#allocation44_spill]] %s2154_s13  ;;  %s2169_s13 = sld [smem:[#allocation11]] }
  0x7d   :  { %1543 = vset.pattern.permute.xlu1 %v1781_v5  ;;  %2824 = sst [smem:[#allocation45_spill]] %s2156_s4  ;;  %s2171_s4 = sld [smem:[#allocation11 + $0x1]] }
  0x7e   :  { %212 = vperm.xlu1 %1543, %v93_v3   ;;  %2825 = sst [smem:[#allocation46_spill]] %s2158_s6  ;;  %s2173_s6 = sld [smem:[#allocation11 + $0x2]] }
  0x7f   :  { %2826 = sst [smem:[#allocation47_spill]] %s2161_s8  ;;  %s2179_s8 = sld [smem:[#allocation11 + $0x8]] }
  0x80   :  { %2827 = sst [smem:[#allocation48_spill]] %s2167_s3  ;;  %s2182_s3 = sld [smem:[#allocation11 + $0x9]] }
  0x81   :  { %2830 = sst [smem:[#allocation51_spill]] %s2177_s12  ;;  %s2191_s12 = sld [smem:[#allocation11 + $0xc]] }
  0x82   :  { %1545 = vset.pattern.permute.xlu1 %v1784_v8  ;;  %2828 = sst [smem:[#allocation49_spill]] %s2169_s13  ;;  %s2184_s13 = sld [smem:[#allocation11 + $0xa]] }
  0x83   :  { %232 = vperm.xlu1 %1545, %v93_v3   ;;  %s2833_s19 = sld [smem:[#allocation43_spill]]  ;;  %s2834_s21 = sld [smem:[#allocation44_spill]] }
  0x84   :  { %2829 = sst [smem:[#allocation50_spill]] %s2173_s6  ;;  %s2189_s6 = sld [smem:[#allocation11 + $0xb]] }
  0x85   :  { %2831 = sst [smem:[#allocation52_spill]] %s2179_s8  ;;  %s2199_s8 = sld [smem:[#allocation11 + $0xe]] }
  0x86   :  { %2832 = sst [smem:[#allocation53_spill]] %s2182_s3  ;;  %s2197_s3 = sld [smem:[#allocation11 + $0xd]] }
  0x87   :  { %1546 = vset.pattern.permute.xlu1 %v1785_v9  ;;  %s2835_s22 = sld [smem:[#allocation45_spill]]  ;;  %s2836_s24 = sld [smem:[#allocation46_spill]] }
  0x88   :  { %242 = vperm.xlu1 %1546, %v93_v3   ;;  %v218_v3 = vrot.slane %v96_v51, %v123_v15  ;;  %v1789_v15 = vmov 15   ;;  %s2227_s23 = sld [smem:[#allocation11 + $0x17]]  ;;  %s2838_s25 = sld [smem:[#allocation48_spill]] }
  0x89   :  { %s2839_s2 = sld [smem:[#allocation49_spill]]  ;;  %s2840_s1 = sld [smem:[#allocation50_spill]] }
  0x8a   :  { %s2243_s26 = sld [smem:[#allocation11 + $0x1b]]  ;;  %s2841_s29 = sld [smem:[#allocation51_spill]] }
  0x8b   :  { %s2842_s9 = sld [smem:[#allocation52_spill]]  ;;  %s2843_s28 = sld [smem:[#allocation53_spill]] }
  0x8c   :  { %1547 = vset.pattern.permute.xlu1 %v1779_v2  ;;  %s2252_s11 = sld [smem:[#allocation11 + $0x21]] }
  0xdf   :  { %v148_v11 = vpop.permute.xlu1 %147  ;;  %v142_v12 = vpop.permute.xlu0 %141 }
  0xe0   :  { %v144_v38 = vmul.f32 %v142_v12, %v114_v22  ;;  %v150_v42 = vmul.f32 %v148_v11, %v124_v21 }
  0xe4   :  { %v100_v17 = vpop.permute.xlu1 %99  ;;  %v193_v18 = vpop.permute.xlu0 %192 }
  0xe5   :  { %v106_v25 = vmul.f32 %v105_v20, %v100_v17  ;;  %v156_v48 = vmul.f32 %v155_v39, %v100_v17  ;;  %v199_v11 = vmul.f32 %v198_v59, %v193_v18 }
  0xe9   :  { %v109_v23 = vpop.permute.xlu1 %108  ;;  %v119_v24 = vpop.permute.xlu0 %118 }
  0xea   :  { %v115_v26 = vmul.f32 %v114_v22, %v109_v23  ;;  %v125_v27 = vmul.f32 %v124_v21, %v119_v24  ;;  %v162_v52 = vmul.f32 %v161_v43, %v109_v23  ;;  %v168_v55 = vmul.f32 %v167_v47, %v119_v24 }
  0xeb   :  { %v228_v22 = vrot.slane %v96_v51, %v154_v31  ;;  %v1788_v23 = vmov 8   ;;  %v1801_v43 = vmov 23  }
  0xec   :  { %v116_v28 = vadd.f32 %v115_v26, %v106_v25  ;;  %v238_v25 = vrot.slane %v96_v51, %v160_v35  ;;  %v1792_v35 = vmov 11  }
  0xed   :  { %v1941_v29 = vpop.permute.xlu0 %222 }
  0xee   :  { %v1943_v30 = vadd.f32 %v125_v27, %v116_v28  ;;  %v173_v32 = vpop.permute.xlu1 %172  ;;  %v229_v26 = vmul.f32 %v228_v22, %v1941_v29  ;;  %v1790_v27 = vmov 10   ;;  %v1791_v28 = vmov 18  }
  0xef   :  { %v179_v57 = vmul.f32 %v178_v50, %v173_v32  ;;  %v1793_v29 = vmov 21   ;;  %v377_v22 = vstv %s2100_s17  ;;  %s2235_s17 = sld [smem:[#allocation11 + $0x19]] }
  0xf0   :  { %281 = vperm.xlu1 %1547, %v1943_v30   ;;  %253 = vperm.xlu0 %1544, %v1943_v30  }
  0xf2   :  { %v130_v34 = vpop.permute.xlu0 %129 }
  0xf3   :  { %v132_v36 = vmul.f32 %v130_v34, %v105_v20  ;;  %v183_v46 = vpop.permute.xlu1 %182 }
  0xf4   :  { %1548 = vset.pattern.permute.xlu1 %v1778_v1  ;;  %1549 = vset.pattern.permute.xlu0 %v1780_v4  ;;  %v189_v62 = vmul.f32 %v188_v54, %v183_v46  ;;  %v1804_v46 = vmov 27  }
  0xf5   :  { %v139_v40 = vadd.f32 %v1308_v33, %v132_v36  ;;  %308 = vperm.xlu1 %1548, %v1943_v30   ;;  %335 = vperm.xlu0 %1549, %v1943_v30   ;;  %v248_v33 = vrot.slane %v96_v51, %v166_v37  ;;  %v1794_v37 = vmov 13  }
  0xf7   :  { %v145_v44 = vadd.f32 %v144_v38, %v139_v40  ;;  %v1795_v40 = vmov 14  }
  0xf8   :  { %v203_v58 = vpop.permute.xlu1 %202 }
  0xf9   :  { %v151_v49 = vadd.f32 %v150_v42, %v145_v44  ;;  %1550 = vset.pattern.permute.xlu1 %v1781_v5  ;;  %1552 = vset.pattern.permute.xlu0 %v1784_v8  ;;  %v209_v17 = vmul.f32 %v208_v63, %v203_v58  ;;  %v1800_v42 = vmov 22   ;;  %v1802_v44 = vmov 24  }
  0xfa   :  { %362 = vperm.xlu1 %1550, %v1943_v30   ;;  %416 = vperm.xlu0 %1552, %v1943_v30   ;;  %v1808_v58 = vmov 26  }
  0xfb   :  { %v157_v53 = vadd.f32 %v156_v48, %v151_v49 }
  0xfd   :  { %v163_v56 = vadd.f32 %v162_v52, %v157_v53  ;;  %v213_v19 = vpop.permute.xlu1 %212 }
  0xfe   :  { %1551 = vset.pattern.permute.xlu1 %v1782_v6  ;;  %1555 = vset.pattern.permute.xlu0 %v1786_v60  ;;  %v219_v21 = vmul.f32 %v218_v3, %v213_v19  ;;  %v296_v19 = vstv %s2092_s10  ;;  %s2245_s10 = sld [smem:[#allocation11 + $0x20]] }
  0xff   :  { %v169_v61 = vadd.f32 %v168_v55, %v163_v56  ;;  %389 = vperm.xlu1 %1551, %v1943_v30   ;;  %497 = vperm.xlu0 %1555, %v1943_v30  }
 0x101   :  { %v180_v0 = vadd.f32 %v179_v57, %v169_v61 }
 0x102   :  { %v233_v18 = vpop.permute.xlu1 %232 }
 0x103   :  { %v190_v12 = vadd.f32 %v189_v62, %v180_v0  ;;  %1553 = vset.pattern.permute.xlu1 %v1785_v9  ;;  %1558 = vset.pattern.permute.xlu0 %v1787_v14  ;;  %v239_v32 = vmul.f32 %v238_v25, %v233_v18  ;;  %v385_v18 = vstv %s2108_s30  ;;  %s2837_s30 = sld [smem:[#allocation47_spill]] }
 0x104   :  { %443 = vperm.xlu1 %1553, %v1943_v30   ;;  %578 = vperm.xlu0 %1558, %v1943_v30  }
 0x105   :  { %v200_v20 = vadd.f32 %v199_v11, %v190_v12  ;;  %v1809_v11 = vmov 29  }
 0x107   :  { %v210_v16 = vadd.f32 %v209_v17, %v200_v20  ;;  %v243_v34 = vpop.permute.xlu1 %242  ;;  %v300_v20 = vstv %s2094_s14  ;;  %s2205_s14 = sld [smem:[#allocation11 + $0xf]] }
 0x108   :  { %1554 = vset.pattern.permute.xlu1 %v1788_v23  ;;  %1561 = vset.pattern.permute.xlu0 %v1789_v15  ;;  %v249_v38 = vmul.f32 %v248_v33, %v243_v34  ;;  %v2220_v34 = vld [vmem:[#allocation8] sm:$0xff] }
 0x109   :  { %470 = vperm.xlu1 %1554, %v1943_v30   ;;  %659 = vperm.xlu0 %1561, %v1943_v30   ;;  %v220_v24 = vadd.f32 %v219_v21, %v210_v16  ;;  %v304_v21 = vstv %s2096_s15  ;;  %v373_v16 = vstv %s2098_s16  ;;  %s2207_s15 = sld [smem:[#allocation11 + $0x14]]  ;;  %s2237_s16 = sld [smem:[#allocation11 + $0x1a]] }
 0x10b   :  { %v230_v31 = vadd.f32 %v229_v26, %v220_v24 }
 0x10d   :  { %1556 = vset.pattern.permute.xlu1 %v1790_v27  ;;  %1564 = vset.pattern.permute.xlu0 %v1791_v28  ;;  %v240_v36 = vadd.f32 %v239_v32, %v230_v31 }
 0x10e   :  { %524 = vperm.xlu1 %1556, %v1943_v30   ;;  %740 = vperm.xlu0 %1564, %v1943_v30  }
 0x10f   :  { %v1993_v39 = vadd.f32 %v249_v38, %v240_v36 }
 0x112   :  { %1557 = vset.pattern.permute.xlu1 %v1792_v35  ;;  %1567 = vset.pattern.permute.xlu0 %v1793_v29 }
 0x113   :  { %551 = vperm.xlu1 %1557, %v1943_v30   ;;  %821 = vperm.xlu0 %1567, %v1943_v30  }
 0x117   :  { %1559 = vset.pattern.permute.xlu1 %v1794_v37  ;;  %1571 = vset.pattern.permute.xlu0 %v1779_v2  ;;  %v1797_v2 = vmov 17  }
 0x118   :  { %605 = vperm.xlu1 %1559, %v1943_v30   ;;  %286 = vperm.xlu0 %1571, %v1993_v39  }
 0x11c   :  { %1560 = vset.pattern.permute.xlu1 %v1795_v40  ;;  %1574 = vset.pattern.permute.xlu0 %v1781_v5  ;;  %v1798_v5 = vmov 19  }
 0x11d   :  { %632 = vperm.xlu1 %1560, %v1943_v30   ;;  %367 = vperm.xlu0 %1574, %v1993_v39  }
 0x121   :  { %1562 = vset.pattern.permute.xlu1 %v1796_v41  ;;  %1577 = vset.pattern.permute.xlu0 %v1785_v9  ;;  %v1799_v9 = vmov 20  }
 0x122   :  { %686 = vperm.xlu1 %1562, %v1943_v30   ;;  %448 = vperm.xlu0 %1577, %v1993_v39  }
 0x126   :  { %1563 = vset.pattern.permute.xlu1 %v1797_v2  ;;  %1580 = vset.pattern.permute.xlu0 %v1790_v27 }
 0x127   :  { %713 = vperm.xlu1 %1563, %v1943_v30   ;;  %529 = vperm.xlu0 %1580, %v1993_v39  }
 0x12b   :  { %1565 = vset.pattern.permute.xlu1 %v1798_v5  ;;  %1583 = vset.pattern.permute.xlu0 %v1794_v37  ;;  %v408_v37 = vstv %s2218_s20  ;;  %s2414_s20 = sld [smem:[#allocation11 + $0x2e]] }
 0x12c   :  { %767 = vperm.xlu1 %1565, %v1943_v30   ;;  %610 = vperm.xlu0 %1583, %v1993_v39  }
 0x130   :  { %1566 = vset.pattern.permute.xlu1 %v1799_v9  ;;  %1586 = vset.pattern.permute.xlu0 %v1796_v41  ;;  %v350_v41 = vstv %s2197_s3  ;;  %s2390_s3 = sld [smem:[#allocation11 + $0x2c]] }
 0x131   :  { %794 = vperm.xlu1 %1566, %v1943_v30   ;;  %691 = vperm.xlu0 %1586, %v1993_v39  }
 0x135   :  { %1568 = vset.pattern.permute.xlu1 %v1800_v42  ;;  %1589 = vset.pattern.permute.xlu0 %v1798_v5  ;;  %v346_v5 = vstv %s2191_s12  ;;  %s2421_s12 = sld [smem:[#allocation11 + $0x2f]] }
 0x136   :  { %848 = vperm.xlu1 %1568, %v1943_v30   ;;  %772 = vperm.xlu0 %1589, %v1993_v39  }
 0x13a   :  { %1569 = vset.pattern.permute.xlu1 %v1801_v43  ;;  %1592 = vset.pattern.permute.xlu0 %v1800_v42  ;;  %v277_v42 = vstv %s2841_s29  ;;  %s2363_s29 = sld [smem:[#allocation11 + $0x27]] }
 0x13b   :  { %875 = vperm.xlu1 %1569, %v1943_v30   ;;  %853 = vperm.xlu0 %1592, %v1993_v39  }
 0x13f   :  { %1570 = vset.pattern.permute.xlu1 %v1783_v7  ;;  %1593 = vset.pattern.permute.xlu0 %v1802_v44  ;;  %v1805_v7 = vmov 28  }
 0x140   :  { %902 = vperm.xlu0 %1593, %v1943_v30   ;;  %259 = vperm.xlu1 %1570, %v1993_v39  }
 0x144   :  { %1597 = vset.pattern.permute.xlu0 %v1803_v45  ;;  %1572 = vset.pattern.permute.xlu1 %v1778_v1  ;;  %v1806_v1 = vmov 30  }
 0x145   :  { %934 = vperm.xlu0 %1597, %v1993_v39   ;;  %313 = vperm.xlu1 %1572, %v1993_v39  }
 0x149   :  { %1599 = vset.pattern.permute.xlu0 %v1804_v46  ;;  %1573 = vset.pattern.permute.xlu1 %v1780_v4  ;;  %v1807_v4 = vmov 31  }
 0x14a   :  { %983 = vperm.xlu0 %1599, %v1943_v30   ;;  %340 = vperm.xlu1 %1573, %v1993_v39  }
 0x14e   :  { %1602 = vset.pattern.permute.xlu0 %v1805_v7  ;;  %1575 = vset.pattern.permute.xlu1 %v1782_v6 }
 0x14f   :  { %1015 = vperm.xlu0 %1602, %v1993_v39   ;;  %394 = vperm.xlu1 %1575, %v1993_v39  }
 0x153   :  { %1604 = vset.pattern.permute.xlu0 %v1806_v1  ;;  %1576 = vset.pattern.permute.xlu1 %v1784_v8 }
 0x154   :  { %1064 = vperm.xlu0 %1604, %v1943_v30   ;;  %421 = vperm.xlu1 %1576, %v1993_v39  }
 0x158   :  { %1607 = vset.pattern.permute.xlu0 %v1807_v4  ;;  %1578 = vset.pattern.permute.xlu1 %v1788_v23  ;;  %v381_v23 = vstv %s2106_s0  ;;  %s2229_s0 = sld [smem:[#allocation11 + $0x18]] }
 0x159   :  { %1096 = vperm.xlu0 %1607, %v1993_v39   ;;  %475 = vperm.xlu1 %1578, %v1993_v39  }
 0x15d   :  { %1579 = vset.pattern.permute.xlu1 %v1786_v60 }
 0x15e   :  { %502 = vperm.xlu1 %1579, %v1993_v39  }
 0x162   :  { %1581 = vset.pattern.permute.xlu1 %v1792_v35 }
 0x163   :  { %556 = vperm.xlu1 %1581, %v1993_v39  }
 0x167   :  { %1582 = vset.pattern.permute.xlu1 %v1787_v14  ;;  %v292_v14 = vstv %s2090_s5  ;;  %s2875_s5 = sld [smem:[#allocation35_spill]] }
 0x168   :  { %583 = vperm.xlu1 %1582, %v1993_v39  }
 0x16c   :  { %1584 = vset.pattern.permute.xlu1 %v1795_v40  ;;  %v354_v40 = vstv %s2199_s8  ;;  %s2856_s8 = sld [smem:[#allocation28_spill]] }
 0x16d   :  { %637 = vperm.xlu1 %1584, %v1993_v39  }
 0x16f   :  { %v2046_v6 = vpop.permute.xlu1 %281  ;;  %v2063_v50 = vpop.permute.xlu0 %253 }
 0x171   :  { %1585 = vset.pattern.permute.xlu1 %v1789_v15 }
 0x172   :  { %664 = vperm.xlu1 %1585, %v1993_v39  }
 0x174   :  { %v2050_v8 = vpop.permute.xlu1 %308  ;;  %v2069_v52 = vpop.permute.xlu0 %335 }
 0x175   :  { %v338_v27 = vmul.f32 %v2069_v52, %v2220_v34 }
 0x176   :  { %1587 = vset.pattern.permute.xlu1 %v1797_v2 }
 0x177   :  { %718 = vperm.xlu1 %1587, %v1993_v39  }
 0x179   :  { %v2054_v47 = vpop.permute.xlu1 %362  ;;  %v2074_v54 = vpop.permute.xlu0 %416 }
 0x17a   :  { %v2291_v25 = vmul.f32 %v2074_v54, %v2220_v34 }
 0x17b   :  { %1588 = vset.pattern.permute.xlu1 %v1791_v28 }
 0x17c   :  { %745 = vperm.xlu1 %1588, %v1993_v39  }
 0x17e   :  { %v2058_v48 = vpop.permute.xlu1 %389  ;;  %v2080_v56 = vpop.permute.xlu0 %497 }
 0x180   :  { %1590 = vset.pattern.permute.xlu1 %v1799_v9  ;;  %v319_v9 = vstv %s2842_s9  ;;  %s2431_s9 = sld [smem:[#allocation11 + $0x30]] }
 0x181   :  { %799 = vperm.xlu1 %1590, %v1993_v39  }
 0x183   :  { %v2061_v49 = vpop.permute.xlu1 %443  ;;  %v2085_v59 = vpop.permute.xlu0 %578 }
 0x185   :  { %1591 = vset.pattern.permute.xlu1 %v1793_v29 }
 0x186   :  { %826 = vperm.xlu1 %1591, %v1993_v39  }
 0x188   :  { %v2067_v51 = vpop.permute.xlu1 %470  ;;  %v2104_v62 = vpop.permute.xlu0 %659 }
 0x18a   :  { %1594 = vset.pattern.permute.xlu1 %v1801_v43  ;;  %v284_v43 = vmul.f32 %v2046_v6, %v2220_v34  ;;  %v265_v6 = vstv %s2839_s2  ;;  %s2340_s2 = sld [smem:[#allocation11 + $0x24]] }
 0x18b   :  { %880 = vperm.xlu1 %1594, %v1993_v39  }
 0x18d   :  { %v2072_v53 = vpop.permute.xlu1 %524  ;;  %v2135_v0 = vpop.permute.xlu0 %740 }
 0x18f   :  { %1595 = vset.pattern.permute.xlu1 %v1802_v44  ;;  %v273_v44 = vstv %s2840_s1  ;;  %s2358_s1 = sld [smem:[#allocation11 + $0x25]] }
 0x190   :  { %907 = vperm.xlu1 %1595, %v1993_v39  }
 0x192   :  { %v2077_v55 = vpop.permute.xlu1 %551  ;;  %v2165_v12 = vpop.permute.xlu0 %821 }
 0x194   :  { %1596 = vset.pattern.permute.xlu1 %v1803_v45 }
 0x195   :  { %929 = vperm.xlu1 %1596, %v1943_v30  }
 0x197   :  { %v2082_v57 = vpop.permute.xlu1 %605  ;;  %v287_v15 = vpop.permute.xlu0 %286 }
 0x198   :  { %v289_v45 = vadd.f32 %v287_v15, %v284_v43  ;;  %v256_v15 = vmul.f32 %v2063_v50, %v2220_v34  ;;  %v404_v43 = vstv %s2216_s18  ;;  %v311_v50 = vmul.f32 %v2050_v8, %v2220_v34  ;;  %s2860_s18 = sld [smem:[#allocation30_spill]] }
 0x199   :  { %1598 = vset.pattern.permute.xlu1 %v1808_v58  ;;  %v327_v58 = vstv %s2184_s13  ;;  %s2433_s13 = sld [smem:[#allocation11 + $0x31]] }
 0x19a   :  { %956 = vperm.xlu1 %1598, %v1943_v30   ;;  %v290_v29 = vmax.f32 %v289_v45, 0.0 }
 0x19c   :  { %v2087_v60 = vpop.permute.xlu1 %632  ;;  %v293_v28 = vmul.f32 %v292_v14, %v290_v29  ;;  %v297_v52 = vmul.f32 %v296_v19, %v290_v29  ;;  %v305_v26 = vmul.f32 %v304_v21, %v290_v29 }
 0x19e   :  { %961 = vperm.xlu1 %1598, %v1993_v39  }
 0x1a1   :  { %v2102_v61 = vpop.permute.xlu1 %686 }
 0x1a2   :  { %1600 = vset.pattern.permute.xlu1 %v1804_v46  ;;  %v365_v46 = vmul.f32 %v2054_v47, %v2220_v34  ;;  %v358_v47 = vstv %s2205_s14  ;;  %s2859_s14 = sld [smem:[#allocation29_spill]] }
 0x1a3   :  { %988 = vperm.xlu1 %1600, %v1993_v39  }
 0x1a6   :  { %v2124_v63 = vpop.permute.xlu1 %713 }
 0x1a7   :  { %1601 = vset.pattern.permute.xlu1 %v1805_v7  ;;  %v368_v7 = vpop.permute.xlu0 %367 }
 0x1a8   :  { %1010 = vperm.xlu1 %1601, %v1943_v30   ;;  %v370_v2 = vadd.f32 %v368_v7, %v365_v46 }
 0x1aa   :  { %v371_v45 = vmax.f32 %v370_v2, 0.0  ;;  %v301_v2 = vmul.f32 %v300_v20, %v290_v29 }
 0x1ab   :  { %v2150_v3 = vpop.permute.xlu1 %767  ;;  %v449_v21 = vpop.permute.xlu0 %448 }
 0x1ac   :  { %1603 = vset.pattern.permute.xlu1 %v1809_v11  ;;  %v269_v11 = vstv %s2171_s4  ;;  %v2313_v24 = vmul.f32 %v377_v22, %v371_v45  ;;  %v1143_v22 = vadd.s32 16, %v1934_v13  ;;  %s2330_s4 = sld [smem:[#allocation11 + $0x22]] }
 0x1ad   :  { %1037 = vperm.xlu1 %1603, %v1943_v30  }
 0x1b0   :  { %v2175_v17 = vpop.permute.xlu1 %794 }
 0x1b1   :  { %1042 = vperm.xlu1 %1603, %v1993_v39  }
 0x1b5   :  { %v2213_v33 = vpop.permute.xlu1 %848  ;;  %1605 = vset.pattern.permute.xlu1 %v1806_v1 }
 0x1b6   :  { %1069 = vperm.xlu1 %1605, %v1993_v39   ;;  %v331_v39 = vstv %s2189_s6  ;;  %s2332_s6 = sld [smem:[#allocation11 + $0x23]] }
 0x1ba   :  { %v2254_v1 = vpop.permute.xlu1 %875  ;;  %1606 = vset.pattern.permute.xlu1 %v1807_v4  ;;  %v323_v4 = vstv %s2843_s28  ;;  %s2360_s28 = sld [smem:[#allocation11 + $0x26]] }
 0x1bb   :  { %1091 = vperm.xlu1 %1606, %v1943_v30   ;;  %v400_v30 = vstv %s2207_s15  ;;  %s2412_s15 = sld [smem:[#allocation11 + $0x2d]] }
 0x1bf   :  { %v260_v35 = vpop.permute.xlu1 %259 }
 0x1c0   :  { %v262_v46 = vadd.f32 %v260_v35, %v256_v15  ;;  %v2295_v35 = vmul.f32 %v2058_v48, %v2220_v34  ;;  %v446_v15 = vmul.f32 %v2061_v49, %v2220_v34  ;;  %v2309_v48 = vmul.f32 %v373_v16, %v371_v45 }
 0x1c1   :  { %v2317_v49 = vmul.f32 %v381_v23, %v371_v45  ;;  %v1810_v16 = vmov 0.0|0.0   ;;  %v1144_v23 = vadd.s32 24, %v1934_v13 }
 0x1c2   :  { %v263_v8 = vmax.f32 %v262_v46, 0.0  ;;  %1477 = vmatprep.subr.bf16.mxu0 %v1810_v16 }
 0x1c4   :  { %v266_v31 = vmul.f32 %v265_v6, %v263_v8  ;;  %v270_v7 = vmul.f32 %v269_v11, %v263_v8  ;;  %v274_v54 = vmul.f32 %v273_v44, %v263_v8  ;;  %v278_v32 = vmul.f32 %v277_v42, %v263_v8  ;;  %v314_v36 = vpop.permute.xlu1 %313 }
 0x1c5   :  { %v316_v14 = vadd.f32 %v314_v36, %v311_v50  ;;  %v1142_v44 = vadd.s32 8, %v1934_v13  ;;  %v2321_v42 = vand.u32 127, %v102_v10  ;;  %v1145_v36 = vadd.s32 32, %v1934_v13 }
 0x1c6   :  { %v294_v19 = vadd.f32 %v293_v28, %v266_v31  ;;  %v298_v46 = vadd.f32 %v297_v52, %v270_v7  ;;  %v302_v20 = vadd.f32 %v301_v2, %v274_v54  ;;  %v306_v38 = vadd.f32 %v305_v26, %v278_v32 }
 0x1c7   :  { %v317_v29 = vmax.f32 %v316_v14, 0.0  ;;  %v451_v11 = vadd.f32 %v449_v21, %v446_v15  ;;  %vm1151_vm0 = vcmp.lt.s32.totalorder %v1934_v13, %v2321_v42  ;;  %vm1152_vm1 = vcmp.lt.s32.totalorder %v1142_v44, %v2321_v42 }
 0x1c8   :  { %vm1478_vm2 = vmpackc.low %vm1152_vm1, %vm1151_vm0  ;;  %vm1153_vm3 = vcmp.lt.s32.totalorder %v1143_v22, %v2321_v42  ;;  %vm1154_vm4 = vcmp.lt.s32.totalorder %v1144_v23, %v2321_v42  ;;  %vm1155_vm6 = vcmp.lt.s32.totalorder %v1145_v36, %v2321_v42  ;;  %v1813_v22 = vmov 0.0  }
 0x1c9   :  { %v320_v28 = vmul.f32 %v319_v9, %v317_v29  ;;  %v324_v31 = vmul.f32 %v323_v4, %v317_v29  ;;  %v328_v6 = vmul.f32 %v327_v58, %v317_v29  ;;  %v332_v26 = vmul.f32 %v331_v39, %v317_v29  ;;  %v341_v32 = vpop.permute.xlu1 %340  ;;  %vm2343_vm5 = vmpackc.low %vm1154_vm4, %vm1153_vm3  ;;  %1474 = vmatprep.mubr.msk.f32.mxu0 %vm1812_vm11, %v1813_v22 }
 0x1ca   :  { %v343_v7 = vadd.f32 %v341_v32, %v338_v27  ;;  %v1811_v27 = vmov 1.0|1.0   ;;  %v1146_v39 = vadd.s32 40, %v1934_v13  ;;  %v1147_v58 = vadd.s32 48, %v1934_v13 }
 0x1cb   :  { %v321_v10 = vadd.f32 %v320_v28, %v294_v19  ;;  %v325_v50 = vadd.f32 %v324_v31, %v298_v46  ;;  %v329_v8 = vadd.f32 %v328_v6, %v302_v20  ;;  %v333_v52 = vadd.f32 %v332_v26, %v306_v38  ;;  %1479 = vmatpush3.bf16.msk.msra.mxu0 %vm1478_vm2, %v1811_v27 }
 0x1cc   :  { %v344_v2 = vmax.f32 %v343_v7, 0.0  ;;  %v386_v38 = vmul.f32 %v385_v18, %v371_v45  ;;  %1480 = vmatprep.subr.bf16.mxu0 %v1810_v16  ;;  %v1148_v4 = vadd.s32 56, %v1934_v13  ;;  %v452_v19 = vmax.f32 %v451_v11, 0.0 }
 0x1cd   :  { %vm1156_vm7 = vcmp.lt.s32.totalorder %v1146_v39, %v2321_v42  ;;  %vm1157_vm9 = vcmp.lt.s32.totalorder %v1147_v58, %v2321_v42  ;;  %v2855_v31 = vstv %s2227_s23  ;;  %v489_v32 = vstv %s2330_s4  ;;  %s2861_s23 = sld [smem:[#allocation31_spill]]  ;;  %s2464_s4 = sld [smem:[#allocation11 + $0x39]] }
 0x1ce   :  { %v347_v15 = vmul.f32 %v346_v5, %v344_v2  ;;  %v351_v54 = vmul.f32 %v350_v41, %v344_v2  ;;  %v355_v18 = vmul.f32 %v354_v40, %v344_v2  ;;  %v359_v45 = vmul.f32 %v358_v47, %v344_v2  ;;  %v395_v14 = vpop.permute.xlu1 %394  ;;  %vm2372_vm8 = vmpackc.low %vm1156_vm7, %vm1155_vm6 }
 0x1cf   :  { %v397_v46 = vadd.f32 %v395_v14, %v2295_v35  ;;  %1482 = vmatpush3.bf16.msk.msra.mxu0 %vm2343_vm5, %v1811_v27  ;;  %vm1158_vm10 = vcmp.lt.s32.totalorder %v1148_v4, %v2321_v42  ;;  %v2862_v42 = vstv %s2856_s8  ;;  %v520_v39 = vstv %s2363_s29  ;;  %s2488_s29 = sld [smem:[#allocation11 + $0x3e]]  ;;  %s2881_s8 = sld [smem:[#allocation37_spill]] }
 0x1d0   :  { %v348_v13 = vadd.f32 %v347_v15, %v321_v10  ;;  %v352_v5 = vadd.f32 %v351_v54, %v325_v50  ;;  %v356_v41 = vadd.f32 %v355_v18, %v329_v8  ;;  %v360_v40 = vadd.f32 %v359_v45, %v333_v52  ;;  %1483 = vmatprep.subr.bf16.mxu0 %v1810_v16  ;;  %vm2405_vm12 = vmpackc.low %vm1158_vm10, %vm1157_vm9 }
 0x1d1   :  { %v398_v47 = vmax.f32 %v397_v46, 0.0  ;;  %v508_v10 = vstv %s2340_s2  ;;  %v512_v50 = vstv %s2358_s1  ;;  %v516_v8 = vstv %s2360_s28  ;;  %s2473_s2 = sld [smem:[#allocation11 + $0x3b]]  ;;  %s2475_s1 = sld [smem:[#allocation11 + $0x3c]] }
 0x1d2   :  { %v375_v20 = vadd.f32 %v2309_v48, %v348_v13  ;;  %v379_v21 = vadd.f32 %v2313_v24, %v352_v5  ;;  %v383_v29 = vadd.f32 %v2317_v49, %v356_v41  ;;  %v387_v44 = vadd.f32 %v386_v38, %v360_v40  ;;  %v530_v49 = vpop.permute.xlu0 %529  ;;  %s2483_s28 = sld [smem:[#allocation11 + $0x3d]] }
 0x1d3   :  { %v401_v23 = vmul.f32 %v400_v30, %v398_v47  ;;  %v405_v36 = vmul.f32 %v404_v43, %v398_v47  ;;  %v409_v28 = vmul.f32 %v408_v37, %v398_v47  ;;  %v413_v6 = vmul.f32 %v2855_v31, %v398_v47  ;;  %v422_v48 = vpop.permute.xlu1 %421  ;;  %1485 = vmatpush3.bf16.msk.msra.mxu0 %vm2372_vm8, %v1811_v27 }
 0x1d4   :  { %v527_v24 = vmul.f32 %v2072_v53, %v2220_v34  ;;  %v424_v26 = vadd.f32 %v422_v48, %v2291_v25  ;;  %v493_v30 = vstv %s2332_s6  ;;  %1486 = vmatprep.subr.bf16.mxu0 %v1810_v16  ;;  %v473_v16 = vmul.f32 %v2067_v51, %v2220_v34  ;;  %s2471_s6 = sld [smem:[#allocation11 + $0x3a]] }
 0x1d5   :  { %v402_v37 = vadd.f32 %v401_v23, %v375_v20  ;;  %v406_v43 = vadd.f32 %v405_v36, %v379_v21  ;;  %v410_v11 = vadd.f32 %v409_v28, %v383_v29  ;;  %v414_v7 = vadd.f32 %v413_v6, %v387_v44 }
 0x1d6   :  { %v425_v25 = vmax.f32 %v424_v26, 0.0  ;;  %v455_v52 = vmul.f32 %v2862_v42, %v452_v19  ;;  %v532_v2 = vadd.f32 %v530_v49, %v527_v24  ;;  %v2863_v38 = vstv %s2229_s0  ;;  %s2872_s0 = sld [smem:[#allocation32_spill]] }
 0x1d7   :  { %v2864_v58 = vstv %s2235_s17  ;;  %v2865_v15 = vstv %s2237_s16  ;;  %v2866_v18 = vstv %s2243_s26  ;;  %1488 = vmatpush3.bf16.msk.msra.mxu0 %vm2405_vm12, %v1811_v27  ;;  %v2867_v51 = vstv %s2859_s14  ;;  %s2444_s16 = sld [smem:[#allocation11 + $0x32]]  ;;  %s2453_s17 = sld [smem:[#allocation11 + $0x33]] }
 0x1d8   :  { %v428_v9 = vmul.f32 %v2863_v38, %v425_v25  ;;  %v432_v4 = vmul.f32 %v2864_v58, %v425_v25  ;;  %v436_v54 = vmul.f32 %v2865_v15, %v425_v25  ;;  %v440_v45 = vmul.f32 %v2866_v18, %v425_v25  ;;  %v476_v14 = vpop.permute.xlu1 %475  ;;  %s2874_s26 = sld [smem:[#allocation34_spill]]  ;;  %s2882_s14 = sld [smem:[#allocation38_spill]] }
 0x1d9   :  { %v459_v46 = vmul.f32 %v2867_v51, %v452_v19  ;;  %v2868_v13 = vstv %s2860_s18  ;;  %v2869_v41 = vstv %s2861_s23  ;;  %v478_v47 = vadd.f32 %v476_v14, %v473_v16  ;;  %s2499_s18 = sld [smem:[#allocation11 + $0x44]]  ;;  %s2508_s23 = sld [smem:[#allocation11 + $0x46]] }
 0x1da   :  { %v463_v5 = vmul.f32 %v2868_v13, %v452_v19  ;;  %v467_v40 = vmul.f32 %v2869_v41, %v452_v19  ;;  %v429_v35 = vadd.f32 %v428_v9, %v402_v37  ;;  %v433_v20 = vadd.f32 %v432_v4, %v406_v43 }
 0x1db   :  { %v437_v21 = vadd.f32 %v436_v54, %v410_v11  ;;  %v441_v29 = vadd.f32 %v440_v45, %v414_v7  ;;  %v500_v44 = vmul.f32 %v2080_v56, %v2220_v34  ;;  %v533_v23 = vmax.f32 %v532_v2, 0.0  ;;  %v611_v7 = vpop.permute.xlu0 %610 }
 0x1dc   :  { %v479_v27 = vmax.f32 %v478_v47, 0.0  ;;  %v562_v36 = vstv %s2390_s3  ;;  %v456_v28 = vadd.f32 %v455_v52, %v429_v35  ;;  %v460_v31 = vadd.f32 %v459_v46, %v433_v20  ;;  %s2880_s3 = sld [smem:[#allocation36_spill]] }
 0x1dd   :  { %v464_v6 = vadd.f32 %v463_v5, %v437_v21  ;;  %v468_v19 = vadd.f32 %v467_v40, %v441_v29  ;;  %v2870_v48 = vstv %s2245_s10  ;;  %v2871_v49 = vstv %s2252_s11  ;;  %v503_v11 = vpop.permute.xlu1 %502  ;;  %s2873_s10 = sld [smem:[#allocation33_spill]]  ;;  %s2462_s11 = sld [smem:[#allocation11 + $0x38]] }
 0x1de   :  { %v482_v24 = vmul.f32 %v2870_v48, %v479_v27  ;;  %v486_v26 = vmul.f32 %v2871_v49, %v479_v27  ;;  %v490_v37 = vmul.f32 %v489_v32, %v479_v27  ;;  %v494_v43 = vmul.f32 %v493_v30, %v479_v27 }
 0x1df   :  { %v608_v56 = vmul.f32 %v2082_v57, %v2220_v34  ;;  %v505_v53 = vadd.f32 %v503_v11, %v500_v44  ;;  %v566_v25 = vstv %s2412_s15  ;;  %v570_v16 = vstv %s2414_s20  ;;  %s2497_s15 = sld [smem:[#allocation11 + $0x3f]]  ;;  %s2506_s20 = sld [smem:[#allocation11 + $0x45]] }
 0x1e0   :  { %v483_v42 = vadd.f32 %v482_v24, %v456_v28  ;;  %v487_v52 = vadd.f32 %v486_v26, %v460_v31  ;;  %v491_v2 = vadd.f32 %v490_v37, %v464_v6  ;;  %v495_v38 = vadd.f32 %v494_v43, %v468_v19  ;;  %v692_v37 = vpop.permute.xlu0 %691 }
 0x1e1   :  { %v506_v9 = vmax.f32 %v505_v53, 0.0  ;;  %v574_v32 = vstv %s2421_s12  ;;  %v589_v58 = vstv %s2431_s9  ;;  %v593_v30 = vstv %s2433_s13  ;;  %s2510_s12 = sld [smem:[#allocation11 + $0x47]]  ;;  %s2518_s9 = sld [smem:[#allocation11 + $0x48]] }
 0x1e2   :  { %v554_v57 = vmul.f32 %v2077_v55, %v2220_v34  ;;  %v2876_v4 = vstv %s2872_s0  ;;  %v613_v54 = vadd.f32 %v611_v7, %v608_v56  ;;  %v597_v18 = vstv %s2444_s16  ;;  %v557_v13 = vpop.permute.xlu1 %556  ;;  %s2887_s13 = sld [smem:[#allocation39_spill]]  ;;  %s2888_s16 = sld [smem:[#allocation40_spill]] }
 0x1e3   :  { %v536_v15 = vmul.f32 %v2876_v4, %v533_v23  ;;  %v509_v45 = vmul.f32 %v508_v10, %v506_v9  ;;  %v513_v14 = vmul.f32 %v512_v50, %v506_v9  ;;  %v517_v51 = vmul.f32 %v516_v8, %v506_v9  ;;  %s2532_s0 = sld [smem:[#allocation11 + $0x4a]] }
 0x1e4   :  { %v521_v46 = vmul.f32 %v520_v39, %v506_v9  ;;  %v2877_v5 = vstv %s2873_s10  ;;  %v2878_v40 = vstv %s2874_s26  ;;  %v2879_v47 = vstv %s2875_s5  ;;  %s2890_s10 = sld [smem:[#allocation42_spill]]  ;;  %s2534_s26 = sld [smem:[#allocation11 + $0x4b]] }
 0x1e5   :  { %v540_v41 = vmul.f32 %v2877_v5, %v533_v23  ;;  %v544_v55 = vmul.f32 %v2878_v40, %v533_v23  ;;  %v548_v35 = vmul.f32 %v2879_v47, %v533_v23  ;;  %v559_v20 = vadd.f32 %v557_v13, %v554_v57  ;;  %s2543_s5 = sld [smem:[#allocation11 + $0x51]] }
 0x1e6   :  { %v510_v21 = vadd.f32 %v509_v45, %v483_v42  ;;  %v514_v10 = vadd.f32 %v513_v14, %v487_v52  ;;  %v518_v50 = vadd.f32 %v517_v51, %v491_v2  ;;  %v522_v8 = vadd.f32 %v521_v46, %v495_v38 }
 0x1e7   :  { %v581_v39 = vmul.f32 %v2085_v59, %v2220_v34  ;;  %v614_v29 = vmax.f32 %v613_v54, 0.0  ;;  %v560_v44 = vmax.f32 %v559_v20, 0.0  ;;  %v601_v27 = vstv %s2453_s17  ;;  %v584_v26 = vpop.permute.xlu1 %583  ;;  %s2889_s17 = sld [smem:[#allocation41_spill]] }
 0x1e8   :  { %v537_v28 = vadd.f32 %v536_v15, %v510_v21  ;;  %v541_v31 = vadd.f32 %v540_v41, %v514_v10  ;;  %v545_v6 = vadd.f32 %v544_v55, %v518_v50  ;;  %v549_v19 = vadd.f32 %v548_v35, %v522_v8 }
 0x1e9   :  { %v563_v23 = vmul.f32 %v562_v36, %v560_v44  ;;  %v567_v48 = vmul.f32 %v566_v25, %v560_v44  ;;  %v571_v24 = vmul.f32 %v570_v16, %v560_v44  ;;  %v575_v49 = vmul.f32 %v574_v32, %v560_v44 }
 0x1ea   :  { %v689_v59 = vmul.f32 %v2102_v61, %v2220_v34  ;;  %v586_v43 = vadd.f32 %v584_v26, %v581_v39  ;;  %v643_v11 = vstv %s2462_s11  ;;  %v647_v56 = vstv %s2464_s4  ;;  %s2541_s11 = sld [smem:[#allocation11 + $0x50]]  ;;  %s2545_s4 = sld [smem:[#allocation11 + $0x52]] }
 0x1eb   :  { %v564_v7 = vadd.f32 %v563_v23, %v537_v28  ;;  %v568_v36 = vadd.f32 %v567_v48, %v541_v31  ;;  %v572_v53 = vadd.f32 %v571_v24, %v545_v6  ;;  %v576_v25 = vadd.f32 %v575_v49, %v549_v19  ;;  %v773_v6 = vpop.permute.xlu0 %772 }
 0x1ec   :  { %v587_v42 = vmax.f32 %v586_v43, 0.0  ;;  %v651_v16 = vstv %s2471_s6  ;;  %v655_v52 = vstv %s2473_s2  ;;  %v670_v2 = vstv %s2475_s1  ;;  %v638_v14 = vpop.permute.xlu1 %637  ;;  %s2553_s6 = sld [smem:[#allocation11 + $0x53]]  ;;  %s2558_s2 = sld [smem:[#allocation11 + $0x54]] }
 0x1ed   :  { %v635_v61 = vmul.f32 %v2087_v60, %v2220_v34  ;;  %v2883_v38 = vstv %s2880_s3  ;;  %v694_v32 = vadd.f32 %v692_v37, %v689_v59  ;;  %v674_v57 = vstv %s2483_s28  ;;  %s2564_s1 = sld [smem:[#allocation11 + $0x55]]  ;;  %s2569_s28 = sld [smem:[#allocation11 + $0x56]] }
 0x1ee   :  { %v617_v9 = vmul.f32 %v2883_v38, %v614_v29  ;;  %v590_v4 = vmul.f32 %v589_v58, %v587_v42  ;;  %v594_v15 = vmul.f32 %v593_v30, %v587_v42  ;;  %v598_v54 = vmul.f32 %v597_v18, %v587_v42  ;;  %s2577_s3 = sld [smem:[#allocation11 + $0x5b]] }
 0x1ef   :  { %v602_v45 = vmul.f32 %v601_v27, %v587_v42  ;;  %v2884_v51 = vstv %s2881_s8  ;;  %v2885_v13 = vstv %s2882_s14  ;;  %v2886_v5 = vstv %s2140_s27  ;;  %s2523_s27 = sld [smem:[#allocation11 + $0x49]]  ;;  %s2580_s8 = sld [smem:[#allocation11 + $0x5c]] }
 0x1f0   :  { %v621_v46 = vmul.f32 %v2884_v51, %v614_v29  ;;  %v625_v60 = vmul.f32 %v2885_v13, %v614_v29  ;;  %v629_v41 = vmul.f32 %v2886_v5, %v614_v29  ;;  %v640_v40 = vadd.f32 %v638_v14, %v635_v61  ;;  %s2582_s14 = sld [smem:[#allocation11 + $0x5d]] }
 0x1f1   :  { %v591_v55 = vadd.f32 %v590_v4, %v564_v7  ;;  %v595_v58 = vadd.f32 %v594_v15, %v568_v36  ;;  %v599_v30 = vadd.f32 %v598_v54, %v572_v53  ;;  %v603_v18 = vadd.f32 %v602_v45, %v576_v25  ;;  %v665_v31 = vpop.permute.xlu1 %664 }
 0x1f2   :  { %v662_v47 = vmul.f32 %v2104_v62, %v2220_v34  ;;  %v695_v35 = vmax.f32 %v694_v32, 0.0  ;;  %v641_v20 = vmax.f32 %v640_v40, 0.0  ;;  %v678_v21 = vstv %s2488_s29  ;;  %s2571_s29 = sld [smem:[#allocation11 + $0x57]] }
 0x1f3   :  { %v618_v10 = vadd.f32 %v617_v9, %v591_v55  ;;  %v622_v50 = vadd.f32 %v621_v46, %v595_v58  ;;  %v626_v8 = vadd.f32 %v625_v60, %v599_v30  ;;  %v630_v39 = vadd.f32 %v629_v41, %v603_v18 }
 0x1f4   :  { %v644_v29 = vmul.f32 %v643_v11, %v641_v20  ;;  %v648_v44 = vmul.f32 %v647_v56, %v641_v20  ;;  %v652_v27 = vmul.f32 %v651_v16, %v641_v20  ;;  %v656_v28 = vmul.f32 %v655_v52, %v641_v20 }
 0x1f5   :  { %v770_v62 = vmul.f32 %v2150_v3, %v2220_v34  ;;  %v682_v19 = vstv %s2497_s15  ;;  %v667_v23 = vadd.f32 %v665_v31, %v662_v47  ;;  %v724_v48 = vstv %s2499_s18  ;;  %s2592_s15 = sld [smem:[#allocation11 + $0x5f]]  ;;  %s1412_s18 = sld [smem:[#allocation11 + $0x68]] }
 0x1f6   :  { %v645_v24 = vadd.f32 %v644_v29, %v618_v10  ;;  %v649_v49 = vadd.f32 %v648_v44, %v622_v50  ;;  %v653_v26 = vadd.f32 %v652_v27, %v626_v8  ;;  %v657_v59 = vadd.f32 %v656_v28, %v630_v39  ;;  %v719_v38 = vpop.permute.xlu1 %718 }
 0x1f7   :  { %v668_v37 = vmax.f32 %v667_v23, 0.0  ;;  %v728_v43 = vstv %s2506_s20  ;;  %v732_v11 = vstv %s2508_s23  ;;  %v736_v56 = vstv %s2510_s12  ;;  %s1413_s20 = sld [smem:[#allocation11 + $0x69]]  ;;  %s1414_s23 = sld [smem:[#allocation11 + $0x6a]] }
 0x1f8   :  { %v716_v3 = vmul.f32 %v2124_v63, %v2220_v34  ;;  %v2891_v7 = vstv %s2887_s13  ;;  %v775_v53 = vadd.f32 %v773_v6, %v770_v62  ;;  %v751_v25 = vstv %s2518_s9  ;;  %s2636_s12 = sld [smem:[#allocation11 + $0x6c]]  ;;  %s2638_s9 = sld [smem:[#allocation11 + $0x6d]] }
 0x1f9   :  { %v698_v36 = vmul.f32 %v2891_v7, %v695_v35  ;;  %v671_v42 = vmul.f32 %v670_v2, %v668_v37  ;;  %v675_v16 = vmul.f32 %v674_v57, %v668_v37  ;;  %v679_v52 = vmul.f32 %v678_v21, %v668_v37  ;;  %v854_v21 = vpop.permute.xlu0 %853  ;;  %s2646_s13 = sld [smem:[#allocation11 + $0x63]] }
 0x1fa   :  { %v683_v61 = vmul.f32 %v682_v19, %v668_v37  ;;  %v2892_v9 = vstv %s2888_s16  ;;  %v2893_v4 = vstv %s2889_s17  ;;  %v2894_v15 = vstv %s2890_s10  ;;  %s2651_s16 = sld [smem:[#allocation11 + $0x70]]  ;;  %s2655_s17 = sld [smem:[#allocation11 + $0x71]] }
 0x1fb   :  { %v702_v32 = vmul.f32 %v2892_v9, %v695_v35  ;;  %v706_v63 = vmul.f32 %v2893_v4, %v695_v35  ;;  %v710_v54 = vmul.f32 %v2894_v15, %v695_v35  ;;  %v721_v45 = vadd.f32 %v719_v38, %v716_v3  ;;  %v746_v20 = vpop.permute.xlu1 %745  ;;  %s2660_s10 = sld [smem:[#allocation11 + $0x67]] }
 0x1fc   :  { %v672_v14 = vadd.f32 %v671_v42, %v645_v24  ;;  %v676_v2 = vadd.f32 %v675_v16, %v649_v49  ;;  %v680_v57 = vadd.f32 %v679_v52, %v653_v26  ;;  %v684_v51 = vadd.f32 %v683_v61, %v657_v59 }
 0x1fd   :  { %v743_v46 = vmul.f32 %v2135_v0, %v2220_v34  ;;  %v776_v13 = vmax.f32 %v775_v53, 0.0  ;;  %v722_v60 = vmax.f32 %v721_v45, 0.0  ;;  %v755_v5 = vstv %s2523_s27  ;;  %s2641_s27 = sld [smem:[#allocation11 + $0x6e]] }
 0x1fe   :  { %v699_v41 = vadd.f32 %v698_v36, %v672_v14  ;;  %v703_v40 = vadd.f32 %v702_v32, %v676_v2  ;;  %v707_v55 = vadd.f32 %v706_v63, %v680_v57  ;;  %v711_v58 = vadd.f32 %v710_v54, %v684_v51 }
 0x1ff   :  { %v725_v30 = vmul.f32 %v724_v48, %v722_v60  ;;  %v729_v18 = vmul.f32 %v728_v43, %v722_v60  ;;  %v733_v47 = vmul.f32 %v732_v11, %v722_v60  ;;  %v737_v35 = vmul.f32 %v736_v56, %v722_v60 }
 0x200   :  { %v851_v0 = vmul.f32 %v2213_v33, %v2220_v34  ;;  %v759_v10 = vstv %s2532_s0  ;;  %v763_v50 = vstv %s2534_s26  ;;  %v748_v8 = vadd.f32 %v746_v20, %v743_v46  ;;  %v800_v43 = vpop.permute.xlu1 %799  ;;  %s2657_s0 = sld [smem:[#allocation11 + $0x72]]  ;;  %s2662_s26 = sld [smem:[#allocation11 + $0x6b]] }
 0x201   :  { %v726_v39 = vadd.f32 %v725_v30, %v699_v41  ;;  %v730_v29 = vadd.f32 %v729_v18, %v703_v40  ;;  %v734_v44 = vadd.f32 %v733_v47, %v707_v55  ;;  %v738_v27 = vadd.f32 %v737_v35, %v711_v58 }
 0x202   :  { %v749_v28 = vmax.f32 %v748_v8, 0.0  ;;  %v805_v31 = vstv %s2541_s11  ;;  %v809_v62 = vstv %s2543_s5  ;;  %v813_v6 = vstv %s2545_s4  ;;  %s2667_s11 = sld [smem:[#allocation11 + $0x6f]]  ;;  %s2669_s5 = sld [smem:[#allocation11 + $0x74]] }
 0x203   :  { %v797_v33 = vmul.f32 %v2175_v17, %v2220_v34  ;;  %v2895_v19 = vstv %s2833_s19  ;;  %v856_v48 = vadd.f32 %v854_v21, %v851_v0  ;;  %v817_v24 = vstv %s2553_s6  ;;  %s2590_s19 = sld [smem:[#allocation11 + $0x5e]]  ;;  %s2671_s4 = sld [smem:[#allocation11 + $0x75]] }
 0x204   :  { %v779_v23 = vmul.f32 %v2895_v19, %v776_v13  ;;  %v752_v49 = vmul.f32 %v751_v25, %v749_v28  ;;  %v756_v26 = vmul.f32 %v755_v5, %v749_v28  ;;  %v760_v59 = vmul.f32 %v759_v10, %v749_v28  ;;  %s2673_s6 = sld [smem:[#allocation11 + $0x76]] }
 0x205   :  { %v764_v37 = vmul.f32 %v763_v50, %v749_v28  ;;  %v2896_v11 = vstv %s2834_s21  ;;  %v2897_v3 = vstv %s2835_s22  ;;  %v2898_v7 = vstv %s2836_s24  ;;  %v827_v51 = vpop.permute.xlu1 %826  ;;  %s2600_s21 = sld [smem:[#allocation11 + $0x60]]  ;;  %s2605_s22 = sld [smem:[#allocation11 + $0x61]]  ;;  %v903_v50 = vpop.permute.xlu0 %902 }
 0x206   :  { %v783_v56 = vmul.f32 %v2896_v11, %v776_v13  ;;  %v787_v17 = vmul.f32 %v2897_v3, %v776_v13  ;;  %v791_v36 = vmul.f32 %v2898_v7, %v776_v13  ;;  %v802_v53 = vadd.f32 %v800_v43, %v797_v33  ;;  %s2607_s24 = sld [smem:[#allocation11 + $0x62]] }
 0x207   :  { %v753_v25 = vadd.f32 %v752_v49, %v726_v39  ;;  %v757_v42 = vadd.f32 %v756_v26, %v730_v29  ;;  %v761_v16 = vadd.f32 %v760_v59, %v734_v44  ;;  %v765_v52 = vadd.f32 %v764_v37, %v738_v27 }
 0x208   :  { %v824_v61 = vmul.f32 %v2165_v12, %v2220_v34  ;;  %v857_v38 = vmax.f32 %v856_v48, 0.0  ;;  %v803_v9 = vmax.f32 %v802_v53, 0.0  ;;  %v832_v32 = vstv %s2558_s2  ;;  %s2679_s2 = sld [smem:[#allocation11 + $0x73]] }
 0x209   :  { %v780_v4 = vadd.f32 %v779_v23, %v753_v25  ;;  %v784_v63 = vadd.f32 %v783_v56, %v757_v42  ;;  %v788_v15 = vadd.f32 %v787_v17, %v761_v16  ;;  %v792_v54 = vadd.f32 %v791_v36, %v765_v52 }
 0x20a   :  { %v806_v45 = vmul.f32 %v805_v31, %v803_v9  ;;  %v810_v14 = vmul.f32 %v809_v62, %v803_v9  ;;  %v814_v2 = vmul.f32 %v813_v6, %v803_v9  ;;  %v818_v57 = vmul.f32 %v817_v24, %v803_v9  ;;  %v881_v27 = vpop.permute.xlu1 %880 }
 0x20b   :  { %v836_v46 = vstv %s2564_s1  ;;  %v840_v13 = vstv %s2569_s28  ;;  %v844_v12 = vstv %s2571_s29  ;;  %v829_v60 = vadd.f32 %v827_v51, %v824_v61  ;;  %s2681_s1 = sld [smem:[#allocation11 + $0x77]]  ;;  %s2683_s28 = sld [smem:[#allocation11 + $0x78]] }
 0x20c   :  { %v807_v5 = vadd.f32 %v806_v45, %v780_v4  ;;  %v811_v41 = vadd.f32 %v810_v14, %v784_v63  ;;  %v815_v40 = vadd.f32 %v814_v2, %v788_v15  ;;  %v819_v55 = vadd.f32 %v818_v57, %v792_v54  ;;  %v935_v14 = vpop.permute.xlu0 %934  ;;  %s2687_s29 = sld [smem:[#allocation11 + $0x79]] }
 0x20d   :  { %v871_v58 = vstv %s2577_s3  ;;  %v830_v30 = vmax.f32 %v829_v60, 0.0  ;;  %v886_v18 = vstv %s2580_s8  ;;  %v890_v47 = vstv %s2582_s14  ;;  %s2689_s3 = sld [smem:[#allocation11 + $0x7a]]  ;;  %s2696_s8 = sld [smem:[#allocation11 + $0x7b]] }
 0x20e   :  { %v878_v35 = vmul.f32 %v2254_v1, %v2220_v34  ;;  %v2899_v20 = vstv %s2837_s30  ;;  %v894_v21 = vstv %s2590_s19  ;;  %v898_v10 = vstv %s2592_s15  ;;  %s1409_s30 = sld [smem:[#allocation11 + $0x65]]  ;;  %s2706_s14 = sld [smem:[#allocation11 + $0x7f]] }
 0x20f   :  { %v860_v0 = vmul.f32 %v2899_v20, %v857_v38  ;;  %v833_v8 = vmul.f32 %v832_v32, %v830_v30  ;;  %v837_v39 = vmul.f32 %v836_v46, %v830_v30  ;;  %v841_v29 = vmul.f32 %v840_v13, %v830_v30  ;;  %v908_v36 = vpop.permute.xlu1 %907  ;;  %s2708_s19 = sld [smem:[#allocation11 + $0x7d]]  ;;  %s2712_s15 = sld [smem:[#allocation11 + $0x7c]] }
 0x210   :  { %v845_v44 = vmul.f32 %v844_v12, %v830_v30  ;;  %v2900_v28 = vstv %s2163_s7  ;;  %v2901_v62 = vstv %s2838_s25  ;;  %v872_v33 = vmul.f32 %v871_v58, %v857_v38  ;;  %s1408_s7 = sld [smem:[#allocation11 + $0x64]]  ;;  %s1410_s25 = sld [smem:[#allocation11 + $0x66]] }
 0x211   :  { %v864_v31 = vmul.f32 %v2900_v28, %v857_v38  ;;  %v868_v6 = vmul.f32 %v2901_v62, %v857_v38  ;;  %v883_v19 = vadd.f32 %v881_v27, %v878_v35  ;;  %v834_v23 = vadd.f32 %v833_v8, %v807_v5 }
 0x212   :  { %v838_v48 = vadd.f32 %v837_v39, %v811_v41  ;;  %v842_v1 = vadd.f32 %v841_v29, %v815_v40  ;;  %v846_v24 = vadd.f32 %v845_v44, %v819_v55  ;;  %v905_v49 = vmul.f32 %v903_v50, %v2220_v34 }
 0x213   :  { %v884_v26 = vmax.f32 %v883_v19, 0.0  ;;  %v861_v59 = vadd.f32 %v860_v0, %v834_v23  ;;  %v913_v53 = vstv %s2600_s21  ;;  %v917_v25 = vstv %s2605_s22  ;;  %v984_v0 = vpop.permute.xlu0 %983  ;;  %s2714_s21 = sld [smem:[#allocation11 + $0x7e]]  ;;  %s1439_s22 = sld [smem:[#allocation11 + $0x83]] }
 0x214   :  { %v865_v37 = vadd.f32 %v864_v31, %v838_v48  ;;  %v869_v43 = vadd.f32 %v868_v6, %v842_v1  ;;  %v873_v11 = vadd.f32 %v872_v33, %v846_v24  ;;  %v921_v42 = vstv %s2607_s24  ;;  %v930_v54 = vpop.permute.xlu1 %929 }
 0x215   :  { %v887_v56 = vmul.f32 %v886_v18, %v884_v26  ;;  %v891_v3 = vmul.f32 %v890_v47, %v884_v26  ;;  %v895_v17 = vmul.f32 %v894_v21, %v884_v26  ;;  %v899_v7 = vmul.f32 %v898_v10, %v884_v26 }
 0x216   :  { %v910_v16 = vadd.f32 %v908_v36, %v905_v49  ;;  %v932_v45 = vmul.f32 %v930_v54, %v2220_v34  ;;  %v940_v13 = vstv %s1408_s7  ;;  %v944_v12 = vstv %s1409_s30  ;;  %s2902_s30 = sld [smem:[#allocation54_spill]] }
 0x217   :  { %v888_v52 = vadd.f32 %v887_v56, %v861_v59  ;;  %v892_v61 = vadd.f32 %v891_v3, %v865_v37  ;;  %v896_v38 = vadd.f32 %v895_v17, %v869_v43  ;;  %v2623_v9 = vadd.f32 %v899_v7, %v873_v11  ;;  %v2664_v37 = vld [vmem:[#allocation8] sm:$0xff]  ;;  %v1016_v11 = vpop.permute.xlu0 %1015 }
 0x218   :  { %v2625_v32 = vmax.f32 %v910_v16, 0.0  ;;  %v937_v46 = vadd.f32 %v935_v14, %v932_v45  ;;  %v948_v60 = vstv %s1410_s25  ;;  %v967_v10 = vstv %s1412_s18  ;;  %s1437_s25 = sld [smem:[#allocation11 + $0x81]]  ;;  %s1436_s18 = sld [smem:[#allocation11 + $0x80]] }
 0x219   :  { %v957_v41 = vpop.permute.xlu1 %956  ;;  %v971_v50 = vstv %s1413_s20  ;;  %v975_v8 = vstv %s1414_s23  ;;  %v986_v29 = vmul.f32 %v984_v0, %v2220_v34  ;;  %v994_v62 = vstv %s2636_s12  ;;  %s1438_s20 = sld [smem:[#allocation11 + $0x82]]  ;;  %s1814_s23 = smov [#allocation12]  }
 0x21a   :  { %v914_v4 = vmul.f32 %v913_v53, %v2625_v32  ;;  %v918_v63 = vmul.f32 %v917_v25, %v2625_v32  ;;  %v922_v15 = vmul.f32 %v921_v42, %v2625_v32  ;;  %v2631_v5 = vmax.f32 %v937_v46, 0.0  ;;  %s1282_s12 = sshll.u32 %s1814_s23, 4  ;;  %s1283_s12 = int_to_ptr.vmem [resolvable:$true] %s1282_s12 }
 0x21b   :  { %v959_v30 = vmul.f32 %v957_v41, %v2220_v34  ;;  %v998_v6 = vstv %s2638_s9  ;;  %v1002_v48 = vstv %s2641_s27  ;;  %v925_v36 = vstv %s2646_s13  ;;  %v1065_v46 = vpop.permute.xlu0 %1064  ;;  %s1715_s9 = scalar_lea.vmem %s1283_s12, 128  ;;  %p1720_p10 = scmp.lt.s32.totalorder %s1283_s12, %s1283_s12 }
 0x21c   :  { %v915_v2 = vadd.f32 %v914_v4, %v888_v52  ;;  %v919_v57 = vadd.f32 %v918_v63, %v892_v61  ;;  %v923_v51 = vadd.f32 %v922_v15, %v896_v38  ;;  %v941_v40 = vmul.f32 %v940_v13, %v2631_v5  ;;  %p1716_p9 = scmp.ne.s32.totalorder %s1283_s12, %s1715_s9  ;;  %p1721_p11 = scmp.lt.s32.totalorder %s1715_s9, %s1715_s9 }
 0x21d   :  { %v945_v55 = vmul.f32 %v944_v12, %v2631_v5  ;;  %v949_v58 = vmul.f32 %v948_v60, %v2631_v5  ;;  %v962_v18 = vpop.permute.xlu1 %961  ;;  %v1021_v53 = vstv %s2651_s16  ;;  %v1025_v25 = vstv %s2655_s17 }
 0x21e   :  { %v942_v47 = vadd.f32 %v941_v40, %v915_v2  ;;  %v964_v21 = vadd.f32 %v962_v18, %v959_v30  ;;  %v1029_v42 = vstv %s2657_s0  ;;  %v952_v61 = vstv %s2660_s10  ;;  %p1722_p12 = por %p1721_p11, %p1720_p10 }
 0x21f   :  { %v946_v35 = vadd.f32 %v945_v55, %v919_v57  ;;  %v950_v20 = vadd.f32 %v949_v58, %v923_v51  ;;  %v926_v38 = vmul.f32 %v925_v36, %v2625_v32  ;;  %v979_v54 = vstv %s2662_s26 }
 0x220   :  { %v2643_v39 = vmax.f32 %v964_v21, 0.0  ;;  %v953_v14 = vmul.f32 %v952_v61, %v2631_v5  ;;  %v1006_v13 = vstv %s2667_s11  ;;  %v1048_v12 = vstv %s2669_s5  ;;  %p1723_p13 = pnand %p1722_p12, %p1716_p9 }
 0x221   :  { %v927_v41 = vadd.f32 %v926_v38, %v2623_v9  ;;  %v1052_v55 = vstv %s2671_s4  ;;  %v1056_v58 = vstv %s2673_s6  ;;  %v1033_v5 = vstv %s2679_s2 }
 0x222   :  { %v968_v44 = vmul.f32 %v967_v10, %v2643_v39  ;;  %v972_v27 = vmul.f32 %v971_v50, %v2643_v39  ;;  %v976_v28 = vmul.f32 %v975_v8, %v2643_v39  ;;  %v989_v31 = vpop.permute.xlu1 %988  ;;  %v980_v40 = vmul.f32 %v979_v54, %v2643_v39  ;;  %v1130_v54 = vld [vmem:[%s2902_s30] sm:$0xff] }
 0x223   :  { %v991_v33 = vadd.f32 %v989_v31, %v986_v29  ;;  %v1067_v18 = vmul.f32 %v2664_v37, %v1065_v46  ;;  %v1079_v39 = vstv %s2687_s29  ;;  %v1083_v29 = vstv %s2689_s3 }
 0x224   :  { %v969_v19 = vadd.f32 %v968_v44, %v942_v47  ;;  %v973_v34 = vadd.f32 %v972_v27, %v946_v35  ;;  %v977_v23 = vadd.f32 %v976_v28, %v950_v20  ;;  %v954_v47 = vadd.f32 %v953_v14, %v927_v41 }
 0x225   :  { %v992_v1 = vmax.f32 %v991_v33, 0.0  ;;  %v1060_v35 = vstv %s2681_s1  ;;  %v1075_v20 = vstv %s2683_s28 }
 0x226   :  { %v981_v9 = vadd.f32 %v980_v40, %v954_v47 }
 0x227   :  { %v995_v24 = vmul.f32 %v994_v62, %v992_v1  ;;  %v999_v49 = vmul.f32 %v998_v6, %v992_v1  ;;  %v1003_v26 = vmul.f32 %v1002_v48, %v992_v1  ;;  %v1011_v59 = vpop.permute.xlu1 %1010  ;;  %v1007_v0 = vmul.f32 %v1006_v13, %v992_v1 }
 0x228   :  { %v1013_v43 = vmul.f32 %v2664_v37, %v1011_v59  ;;  %v1097_v59 = vpop.permute.xlu0 %1096 }
 0x229   :  { %v996_v56 = vadd.f32 %v995_v24, %v969_v19  ;;  %v1000_v3 = vadd.f32 %v999_v49, %v973_v34  ;;  %v1004_v17 = vadd.f32 %v1003_v26, %v977_v23  ;;  %v1008_v33 = vadd.f32 %v1007_v0, %v981_v9 }
 0x22a   :  { %v1018_v7 = vadd.f32 %v1016_v11, %v1013_v43  ;;  %v1087_v19 = vstv %s2696_s8  ;;  %v1124_v0 = vstv %s1438_s20 }
 0x22c   :  { %v1019_v16 = vmax.f32 %v1018_v7, 0.0  ;;  %v1038_v52 = vpop.permute.xlu1 %1037 }
 0x22d   :  { %v1040_v45 = vmul.f32 %v2664_v37, %v1038_v52 }
 0x22e   :  { %v1022_v4 = vmul.f32 %v1021_v53, %v1019_v16  ;;  %v1026_v63 = vmul.f32 %v1025_v25, %v1019_v16  ;;  %v1030_v15 = vmul.f32 %v1029_v42, %v1019_v16  ;;  %v1034_v27 = vmul.f32 %v1033_v5, %v1019_v16 }
 0x22f   :  { %v1106_v53 = vstv %s2708_s19  ;;  %v1102_v25 = vstv %s2712_s15  ;;  %v1110_v42 = vstv %s2714_s21 }
 0x230   :  { %v1043_v2 = vpop.permute.xlu1 %1042  ;;  %v1023_v57 = vadd.f32 %v1022_v4, %v996_v56  ;;  %v1031_v51 = vadd.f32 %v1030_v15, %v1004_v17  ;;  %v1027_v32 = vadd.f32 %v1026_v63, %v1000_v3  ;;  %v1035_v49 = vadd.f32 %v1034_v27, %v1008_v33 }
 0x231   :  { %v1045_v60 = vadd.f32 %v1043_v2, %v1040_v45  ;;  %v1114_v17 = vstv %s2706_s14  ;;  %v1127_v15 = vstv %s1439_s22 }
 0x233   :  { %v1046_v30 = vmax.f32 %v1045_v60, 0.0 }
 0x235   :  { %v1049_v21 = vmul.f32 %v1048_v12, %v1046_v30  ;;  %v1053_v10 = vmul.f32 %v1052_v55, %v1046_v30  ;;  %v1057_v50 = vmul.f32 %v1056_v58, %v1046_v30  ;;  %v1070_v8 = vpop.permute.xlu1 %1069  ;;  %v1061_v34 = vmul.f32 %v1060_v35, %v1046_v30 }
 0x236   :  { %v1072_v44 = vadd.f32 %v1070_v8, %v1067_v18  ;;  %v1121_v35 = vstv %s1437_s25 }
 0x237   :  { %v1050_v28 = vadd.f32 %v1049_v21, %v1023_v57  ;;  %v1058_v31 = vadd.f32 %v1057_v50, %v1031_v51  ;;  %v1054_v62 = vadd.f32 %v1053_v10, %v1027_v32  ;;  %v1062_v36 = vadd.f32 %v1061_v34, %v1035_v49 }
 0x238   :  { %v1073_v6 = vmax.f32 %v1072_v44, 0.0  ;;  %v1131_v32 = vsub.f32 0.0, %v1130_v54 }
 0x23a   :  { %v1076_v23 = vmul.f32 %v1075_v20, %v1073_v6  ;;  %v1080_v48 = vmul.f32 %v1079_v39, %v1073_v6  ;;  %v1084_v1 = vmul.f32 %v1083_v29, %v1073_v6  ;;  %v1092_v24 = vpop.permute.xlu1 %1091  ;;  %v1088_v43 = vmul.f32 %v1087_v19, %v1073_v6 }
 0x23b   :  { %v1094_v26 = vmul.f32 %v2664_v37, %v1092_v24  ;;  %v1118_v20 = vstv %s1436_s18 }
 0x23c   :  { %v1081_v11 = vadd.f32 %v1080_v48, %v1054_v62  ;;  %v1077_v56 = vadd.f32 %v1076_v23, %v1050_v28  ;;  %v1085_v3 = vadd.f32 %v1084_v1, %v1058_v31  ;;  %v1089_v52 = vadd.f32 %v1088_v43, %v1062_v36 }
 0x23d   :  { %v1099_v7 = vadd.f32 %v1097_v59, %v1094_v26 }
 0x23f   :  { %v1100_v16 = vmax.f32 %v1099_v7, 0.0 }
 0x241   :  { %v1115_v61 = vmul.f32 %v1114_v17, %v1100_v16  ;;  %v1107_v38 = vmul.f32 %v1106_v53, %v1100_v16  ;;  %v1103_v4 = vmul.f32 %v1102_v25, %v1100_v16  ;;  %v1111_v63 = vmul.f32 %v1110_v42, %v1100_v16 }
 0x243   :  { %v1116_v45 = vadd.f32 %v1115_v61, %v1089_v52  ;;  %v1108_v14 = vadd.f32 %v1107_v38, %v1081_v11  ;;  %v1104_v2 = vadd.f32 %v1103_v4, %v1077_v56  ;;  %v1112_v57 = vadd.f32 %v1111_v63, %v1085_v3 }
 0x245   :  { %v1128_v51 = vadd.f32 %v1127_v15, %v1116_v45  ;;  %v1122_v50 = vadd.f32 %v1121_v35, %v1108_v14  ;;  %v1119_v8 = vadd.f32 %v1118_v20, %v1104_v2  ;;  %v1125_v9 = vadd.f32 %v1124_v0, %v1112_v57 }
 0x247   :  { %v1129_v46 = vmax.f32 %v1128_v51, 0.0 }
 0x249   :  { %v1132_v13 = vmul.f32 %v1131_v32, %v1129_v46 }
 0x24b   :  { %v1133_v12 = vmul.f32 1.442695, %v1132_v13 }
 0x24d   :  { %1608 = vpow2.f32 %v1133_v12 }
 0x257   :  { %v1609_v60 = vpop.eup %1608 }
 0x258   :  { %v1135_v41 = vsub.f32 1.0, %v1609_v60 }
 0x25a   :  { %v1136_v40 = vsub.f32 1.0, %v1135_v41 }
 0x25c   :  { %v1137_v55 = vadd.f32 1e-10, %v1136_v40 }
 0x25e   :  { %1610 = vlog2.f32 %v1137_v55 }
 0x268   :  { %v1611_v58 = vpop.eup %1610 }
 0x269   :  { %v1139_v5 = vmul.f32 0.6931472, %v1611_v58 }
 0x26b   :  { %1475 = vmatmul.mubr.msk.f32.vlgmr.msra.gmra.mrb[0].mxu0 %vm1167_vm13, %v1139_v5 }
 0x33e   :  { %v1237_v30 = vpop.f32.mrb[0].mxu0 }
 0x33f   :  { %v1241_v18 = vmul.f32 1.442695, %v1237_v30  ;;  %v1476_v47 = vpop.f32.mrb[1].mxu0 }
 0x341   :  { %1612 = vpow2.f32 %v1241_v18 }
 0x34b   :  { %v1613_v21 = vpop.eup %1612 }
 0x34c   :  { %v1243_v10 = vmul.f32 %v1613_v21, %v1135_v41 }
 0x34e   :  { %1244 = vst.msk [vmem:[#allocation12] sm:$0xff] %vm1167_vm13, %v1243_v10  ;;  %v1251_v39 = vmul.f32 %v1243_v10, %v1122_v50  ;;  %v1245_v29 = vmul.f32 %v1243_v10, %v1119_v8  ;;  %v1257_v44 = vmul.f32 %v1243_v10, %v1125_v9  ;;  %v1263_v31 = vmul.f32 %v2664_v37, %v1243_v10 }
 0x34f   :  { %v1269_v33 = vsel %vm1167_vm13, %v1243_v10, 0.0 }
 0x350   :  { %v1252_v27 = vsel %vm1167_vm13, %v1251_v39, 0.0  ;;  %v1246_v28 = vsel %vm1167_vm13, %v1245_v29, 0.0  ;;  %v1264_v62 = vsel %vm1167_vm13, %v1263_v31, 0.0  ;;  %v1258_v6 = vsel %vm1167_vm13, %v1257_v44, 0.0 }
 0x351   :  { %1253 = vadd.xlane.f32.xlu0 %v1252_v27  ;;  %1247 = vadd.xlane.f32.xlu1 %v1246_v28 }
 0x355   :  { %1265 = vadd.xlane.f32.xlu0 %v1264_v62  ;;  %1259 = vadd.xlane.f32.xlu1 %v1258_v6 }
 0x359   :  { %1270 = vadd.xlane.f32.xlu1 %v1269_v33 }
 0x35a   :  { %1726 = shalt.err (!%p1723_p13)
}
 0x35b   :  { %s2903_s16 = sld [smem:[#allocation55_spill]] }
 0x361   :  { %s1727_s17 = scalar_lea.hbm %s2903_s16, 128 }
 0x362   :  { %p1728_p0 = scmp.ne.s32.totalorder %s2903_s16, %s1727_s17  ;;  %p1731_p1 = scmp.lt.u32.totalorder %s1727_s17, %s2903_s16 }
 0x364   :  { %p1733_p2 = pnand %p1731_p1, %p1728_p0 }
 0x366   :  { %1736 = shalt.err (!%p1733_p2)
}
 0x367   :  { %1285 = dma.vmem_to_hbm [thread:$0]  %s1283_s12, 128, %s2903_s16, [#allocation4]   ;;  %vm1249_vm14 = vcmask 7168   ;;  %vm1255_vm15 = vcmask 15368   ;;  %vm1261_vm0 = vcmask 23568   ;;  %vm1267_vm1 = vcmask 31768  }
 0x368   :  { %s1815_s6 = smov [#allocation13]   ;;  %vm1272_vm2 = vcmask 39968   ;;  %vm1274_vm3 = vcmask 64552  }
 0x369   :  { %s1292_s2 = sshll.u32 %s1815_s6, 4  ;;  %s1293_s2 = int_to_ptr.vmem [resolvable:$true] %s1292_s2 }
 0x36a   :  { %s1737_s1 = scalar_lea.vmem %s1293_s2, 128  ;;  %p1742_p4 = scmp.lt.s32.totalorder %s1293_s2, %s1293_s2 }
 0x36b   :  { %p1738_p3 = scmp.ne.s32.totalorder %s1293_s2, %s1737_s1  ;;  %p1743_p5 = scmp.lt.s32.totalorder %s1737_s1, %s1737_s1 }
 0x36d   :  { %p1744_p6 = por %p1743_p5, %p1742_p4 }
 0x36f   :  { %p1745_p7 = pnand %p1744_p6, %p1738_p3 }
 0x3de   :  { %v1254_v37 = vpop.xlane.xlu0 %1253  ;;  %v1248_v19 = vpop.xlane.xlu1 %1247 }
 0x3df   :  { %1250 = vst.msk [vmem:[#allocation13] sm:$0xff] %vm1249_vm14, %v1248_v19 }
 0x3e0   :  { %1256 = vst.msk [vmem:[#allocation13] sm:$0xff] %vm1255_vm15, %v1254_v37 }
 0x3e2   :  { %v1266_v34 = vpop.xlane.xlu0 %1265  ;;  %v1260_v23 = vpop.xlane.xlu1 %1259 }
 0x3e3   :  { %1262 = vst.msk [vmem:[#allocation13] sm:$0xff] %vm1261_vm0, %v1260_v23 }
 0x3e4   :  { %1268 = vst.msk [vmem:[#allocation13] sm:$0xff] %vm1267_vm1, %v1266_v34 }
 0x3e6   :  { %v1271_v48 = vpop.xlane.xlu1 %1270 }
 0x3e7   :  { %1273 = vst.msk [vmem:[#allocation13] sm:$0xff] %vm1272_vm2, %v1271_v48 }
 0x3e8   :  { %1275 = vst.msk [vmem:[#allocation13] sm:$0xff] %vm1274_vm3, %v1813_v22 }
 0x3e9   :  { %1748 = shalt.err (!%p1745_p7)
}
 0x3ea   :  { %s2904_s3 = sld [smem:[#allocation56_spill]] }
 0x3f0   :  { %s1749_s8 = scalar_lea.hbm %s2904_s3, 128 }
 0x3f1   :  { %p1750_p8 = scmp.ne.s32.totalorder %s2904_s3, %s1749_s8  ;;  %p1753_p9 = scmp.lt.u32.totalorder %s1749_s8, %s2904_s3 }
 0x3f3   :  { %p1755_p10 = pnand %p1753_p9, %p1750_p8 }
 0x3f5   :  { %1758 = shalt.err (!%p1755_p10)
}
 0x3f6   :  { %1295 = dma.vmem_to_hbm [thread:$0]  %s1293_s2, 128, %s2904_s3, [#allocation14]  }
 0x3f7   :  { %1767 = dma.done.wait [#allocation4], 128  }
 0x3f8   :  { %1768 = vsyncadd [#allocation4], 4294967168 }
 0x3f9   :  { %1769 = dma.done.wait [#allocation14], 128  }
 0x3fa   :  { %1770 = vsyncadd [#allocation14], 4294967168 }
 0x3fb   :  { %1302 = vsyncpa [#allocation3], 1 }
 0x3fc   :  { %1303 = vsyncpa [#allocation7], 1 }
 0x3fd   :  { %1304 = vsyncpa [#allocation10], 1 }
 0x3fe   :  { %1305 = vsyncpa [#allocation4], 1 }
 0x3ff   :  { %1306 = vsyncpa [#allocation14], 1 }
 0x400   :  { %1307 = vsyncpa [#allocation5], 1 }

</bundles_post_ra>
